<compile_context>
chip_gen: v7x
topology: tpu7x:2x2x1
jax: 0.10.0
libtpu: 0.0.40
codegen_flags: <defaults>
</compile_context>

<pallas_src>
import math

import jax
import jax.numpy as jnp
from jax.experimental import pallas as pl
from jax.experimental.pallas import tpu as pltpu

# ---------------- scaled-down CLIP-ViT config ----------------
IMG = 32          # image size (CLIP: 224)
PATCH = 8         # patch size (CLIP: 32)
C_IN = 3          # RGB
D = 32            # hidden size (CLIP: 768)
NUM_HEADS = 4     # (CLIP: 12)
HEAD_DIM = D // NUM_HEADS
LAYERS = 2        # (CLIP: 12)
MLP = 4 * D       # intermediate size
NUM_CLASSES = 10  # (module default: 100)
B = 2
GRID = IMG // PATCH
NUM_PATCHES = GRID * GRID
S = NUM_PATCHES + 1              # +1 CLS token
PATCH_DIM = C_IN * PATCH * PATCH
PROBE_PAD = 128                  # lane-dense probe output width


# ---------------- in-kernel helpers ----------------
def _ln(x, g, b, eps=1e-5):
    mu = jnp.mean(x, axis=-1, keepdims=True)
    var = jnp.mean(jnp.square(x - mu), axis=-1, keepdims=True)
    return (x - mu) * jax.lax.rsqrt(var + eps) * g + b


def _mm(a, b):
    """MXU matmul with bf16 operands and f32 accumulation."""
    return jnp.dot(a.astype(jnp.bfloat16), b.astype(jnp.bfloat16),
                   preferred_element_type=jnp.float32)


# ---------------- fused forward kernel (one grid step per batch item) ----------------
def fused_clip_kernel(patches_ref, tok_ref, w_patch_ref, pre_g_ref, pre_b_ref,
                      ln1g_ref, ln1b_ref, wqkv_ref, bqkv_ref, wo_ref, bo_ref,
                      ln2g_ref, ln2b_ref, w1_ref, b1_ref, w2_ref, b2_ref,
                      wp_ref, bp_ref, out_ref):
    # ---- patch embedding (f32 matmul; row 0 of patches is zero => CLS slot),
    #      then add CLS/positional token table ----
    h = jnp.dot(patches_ref[0], w_patch_ref[...],
                preferred_element_type=jnp.float32) + tok_ref[...]      # [S, D]

    # ---- CLIP pre_layrnorm ----
    h = _ln(h, pre_g_ref[...], pre_b_ref[...])

    scale = 1.0 / math.sqrt(HEAD_DIM)
    for l in range(LAYERS):                     # static unroll (LAYERS == 2)
        # ---- multi-head self-attention (pre-LN) ----
        hn = _ln(h, ln1g_ref[l], ln1b_ref[l])
        qkv = _mm(hn, wqkv_ref[l]) + bqkv_ref[l]                        # [S, 3D]
        q = qkv[:, :D] * scale
        k = qkv[:, D:2 * D]
        v = qkv[:, 2 * D:]
        heads = []
        for hh in range(NUM_HEADS):
            sl = slice(hh * HEAD_DIM, (hh + 1) * HEAD_DIM)
            s = _mm(q[:, sl], k[:, sl].T)                               # [S, S]
            s = s - jnp.max(s, axis=-1, keepdims=True)
            p = jnp.exp(s)
            p = p * pl.reciprocal(jnp.sum(p, axis=-1, keepdims=True), approx=True)
            heads.append(_mm(p, v[:, sl]))                              # [S, hd]
        ctx = jnp.concatenate(heads, axis=-1)                           # [S, D]
        h = h + _mm(ctx, wo_ref[l]) + bo_ref[l]       # single Wo projection

        # ---- MLP (pre-LN, quick_gelu as in CLIP) ----
        hn = _ln(h, ln2g_ref[l], ln2b_ref[l])
        f = _mm(hn, w1_ref[l]) + b1_ref[l]
        f = f * jax.nn.sigmoid(1.702 * f)
        h = h + _mm(f, w2_ref[l]) + b2_ref[l]

    # ---- linear probe on CLS token (lane-dense 128-wide padded output) ----
    out_ref[0] = _mm(h[0:1, :], wp_ref[...]) + bp_ref[...]


def _const_spec(shape):
    n = len(shape)
    return pl.BlockSpec(shape, lambda i, _n=n: (0,) * _n)


# ---------------- forward pass wrapper ----------------
def clip_linear_probe_forward(x, params):
    """x: [B, 3, IMG, IMG] (NCHW, like PyTorch) -> logits [B, NUM_CLASSES]."""
    Bb = x.shape[0]
    # NCHW -> [B, NUM_PATCHES, C*P*P] (== Conv2d(kernel=stride=PATCH, no bias))
    patches = x.reshape(Bb, C_IN, GRID, PATCH, GRID, PATCH)
    patches = patches.transpose(0, 2, 4, 1, 3, 5).reshape(Bb, NUM_PATCHES, PATCH_DIM)
    # zero row at seq position 0 so the kernel sees one [S, PATCH_DIM] slab;
    # the CLS embedding is folded (with pos_emb) into an additive token table.
    patches = jnp.pad(patches, ((0, 0), (1, 0), (0, 0)))
    tok_emb = params["pos_emb"].at[0].add(params["cls_emb"])
    # lane-dense probe weights (pad NUM_CLASSES -> 128 lanes; sliced back below)
    wp = jnp.zeros((D, PROBE_PAD), jnp.float32).at[:, :NUM_CLASSES].set(params["w_probe"])
    bp = jnp.zeros((1, PROBE_PAD), jnp.float32).at[:, :NUM_CLASSES].set(params["b_probe"])

    lw = params["layers"]
    weights = (tok_emb, params["w_patch"], params["pre_ln_g"], params["pre_ln_b"],
               lw["ln1_g"], lw["ln1_b"], lw["w_qkv"], lw["b_qkv"],
               lw["w_o"], lw["b_o"], lw["ln2_g"], lw["ln2_b"],
               lw["w_fc1"], lw["b_fc1"], lw["w_fc2"], lw["b_fc2"], wp, bp)

    out = pl.pallas_call(
        fused_clip_kernel,
        out_shape=jax.ShapeDtypeStruct((Bb, 1, PROBE_PAD), jnp.float32),
        grid=(Bb,),
        in_specs=[pl.BlockSpec((1, S, PATCH_DIM), lambda i: (i, 0, 0))]
                 + [_const_spec(w.shape) for w in weights],
        out_specs=pl.BlockSpec((1, 1, PROBE_PAD), lambda i: (i, 0, 0)),
        compiler_params=pltpu.CompilerParams(dimension_semantics=("parallel",)),
    )(patches, *weights)
    return out[:, 0, :NUM_CLASSES]


# ---------------- pure-JAX (f32) reference: same math ----------------
def reference_forward(x, params):
    Bb = x.shape[0]
    patches = x.reshape(Bb, C_IN, GRID, PATCH, GRID, PATCH)
    patches = patches.transpose(0, 2, 4, 1, 3, 5).reshape(Bb, NUM_PATCHES, PATCH_DIM)
    emb = patches @ params["w_patch"]
    cls = jnp.broadcast_to(params["cls_emb"][None, None, :], (Bb, 1, D))
    h = jnp.concatenate([cls, emb], axis=1) + params["pos_emb"][None]

    def ln(v, g, b):
        mu = jnp.mean(v, -1, keepdims=True)
        var = jnp.mean(jnp.square(v - mu), -1, keepdims=True)
        return (v - mu) * jax.lax.rsqrt(var + 1e-5) * g + b

    h = ln(h, params["pre_ln_g"], params["pre_ln_b"])
    L = params["layers"]
    for l in range(LAYERS):
        hn = ln(h, L["ln1_g"][l], L["ln1_b"][l])
        qkv = hn @ L["w_qkv"][l] + L["b_qkv"][l]
        q, k, v = qkv[..., :D], qkv[..., D:2 * D], qkv[..., 2 * D:]
        q = q.reshape(Bb, S, NUM_HEADS, HEAD_DIM).transpose(0, 2, 1, 3) / math.sqrt(HEAD_DIM)
        k = k.reshape(Bb, S, NUM_HEADS, HEAD_DIM).transpose(0, 2, 1, 3)
        v = v.reshape(Bb, S, NUM_HEADS, HEAD_DIM).transpose(0, 2, 1, 3)
        s = jnp.einsum("bhqd,bhkd->bhqk", q, k)
        p = jax.nn.softmax(s, axis=-1)
        o = jnp.einsum("bhqk,bhkd->bhqd", p, v).transpose(0, 2, 1, 3).reshape(Bb, S, D)
        h = h + o @ L["w_o"][l] + L["b_o"][l]
        hn = ln(h, L["ln2_g"][l], L["ln2_b"][l])
        f = hn @ L["w_fc1"][l] + L["b_fc1"][l]
        f = f * jax.nn.sigmoid(1.702 * f)
        h = h + f @ L["w_fc2"][l] + L["b_fc2"][l]
    return h[:, 0, :] @ params["w_probe"] + params["b_probe"]


# ---------------- deterministic parameter init ----------------
def init_params(key):
    std = 0.02

    def nrm(k, shape):
        return jax.random.normal(k, shape, jnp.float32) * std

    keys = iter(jax.random.split(key, 4 + LAYERS * 4))
    params = {
        "w_patch": nrm(next(keys), (PATCH_DIM, D)),        # CLIP patch conv has no bias
        "cls_emb": nrm(next(keys), (D,)),
        "pos_emb": nrm(next(keys), (S, D)),
        "pre_ln_g": jnp.ones((1, D), jnp.float32),
        "pre_ln_b": jnp.zeros((1, D), jnp.float32),
        "w_probe": nrm(next(keys), (D, NUM_CLASSES)),
        "b_probe": jnp.zeros((1, NUM_CLASSES), jnp.float32),
    }
    w_qkv, w_o, w_fc1, w_fc2 = [], [], [], []
    for _ in range(LAYERS):
        w_qkv.append(nrm(next(keys), (D, 3 * D)))
        w_o.append(nrm(next(keys), (D, D)))
        w_fc1.append(nrm(next(keys), (D, MLP)))
        w_fc2.append(nrm(next(keys), (MLP, D)))
    params["layers"] = {
        "ln1_g": jnp.ones((LAYERS, 1, D), jnp.float32),
        "ln1_b": jnp.zeros((LAYERS, 1, D), jnp.float32),
        "w_qkv": jnp.stack(w_qkv),
        "b_qkv": jnp.zeros((LAYERS, 1, 3 * D), jnp.float32),
        "w_o": jnp.stack(w_o),
        "b_o": jnp.zeros((LAYERS, 1, D), jnp.float32),
        "ln2_g": jnp.ones((LAYERS, 1, D), jnp.float32),
        "ln2_b": jnp.zeros((LAYERS, 1, D), jnp.float32),
        "w_fc1": jnp.stack(w_fc1),
        "b_fc1": jnp.zeros((LAYERS, 1, MLP), jnp.float32),
        "w_fc2": jnp.stack(w_fc2),
        "b_fc2": jnp.zeros((LAYERS, 1, D), jnp.float32),
    }
    return params


if __name__ == "__main__":
    key = jax.random.PRNGKey(0)
    k_param, k_x = jax.random.split(key)
    params = init_params(k_param)
    x = jax.random.normal(k_x, (B, C_IN, IMG, IMG), jnp.float32)   # NCHW like PyTorch

    forward = jax.jit(clip_linear_probe_forward)
    logits = jax.block_until_ready(forward(x, params))

    ref = reference_forward(x, params)
    assert logits.shape == (B, NUM_CLASSES)
    max_err = float(jnp.max(jnp.abs(logits - ref)))
    assert jnp.allclose(logits, ref, atol=2e-3, rtol=2e-3), f"max abs err {max_err}"
    print("KERNEL_OK")
</pallas_src>

<mosaic_0001>
module attributes {stable_mosaic.version = 11 : i64} {
  func.func @fused_clip_kernel(%arg0: i32, %arg1: memref<1x17x192xf32, #tpu.memory_space<vmem>>, %arg2: memref<17x32xf32, #tpu.memory_space<vmem>>, %arg3: memref<192x32xf32, #tpu.memory_space<vmem>>, %arg4: memref<1x32xf32, #tpu.memory_space<vmem>>, %arg5: memref<1x32xf32, #tpu.memory_space<vmem>>, %arg6: memref<2x1x32xf32, #tpu.memory_space<vmem>>, %arg7: memref<2x1x32xf32, #tpu.memory_space<vmem>>, %arg8: memref<2x32x96xf32, #tpu.memory_space<vmem>>, %arg9: memref<2x1x96xf32, #tpu.memory_space<vmem>>, %arg10: memref<2x32x32xf32, #tpu.memory_space<vmem>>, %arg11: memref<2x1x32xf32, #tpu.memory_space<vmem>>, %arg12: memref<2x1x32xf32, #tpu.memory_space<vmem>>, %arg13: memref<2x1x32xf32, #tpu.memory_space<vmem>>, %arg14: memref<2x32x128xf32, #tpu.memory_space<vmem>>, %arg15: memref<2x1x128xf32, #tpu.memory_space<vmem>>, %arg16: memref<2x128x32xf32, #tpu.memory_space<vmem>>, %arg17: memref<2x1x32xf32, #tpu.memory_space<vmem>>, %arg18: memref<32x128xf32, #tpu.memory_space<vmem>>, %arg19: memref<1x128xf32, #tpu.memory_space<vmem>>, %arg20: memref<1x1x128xf32, #tpu.memory_space<vmem>>) attributes {dimension_semantics = [#tpu.dimension_semantics<parallel>], iteration_bounds = array<i64: 2>, scalar_prefetch = 0 : i64, scratch_operands = 0 : i64, tpu.core_type = #tpu.core_type<tc>, window_params = [{transform_indices = @transform_0, window_bounds = array<i64: 1, 17, 192>}, {pipeline_mode = #tpu.pipeline_mode<synchronous>, transform_indices = @transform_1, window_bounds = array<i64: 17, 32>}, {pipeline_mode = #tpu.pipeline_mode<synchronous>, transform_indices = @transform_2, window_bounds = array<i64: 192, 32>}, {pipeline_mode = #tpu.pipeline_mode<synchronous>, transform_indices = @transform_3, window_bounds = array<i64: 1, 32>}, {pipeline_mode = #tpu.pipeline_mode<synchronous>, transform_indices = @transform_4, window_bounds = array<i64: 1, 32>}, {pipeline_mode = #tpu.pipeline_mode<synchronous>, transform_indices = @transform_5, window_bounds = array<i64: 2, 1, 32>}, {pipeline_mode = #tpu.pipeline_mode<synchronous>, transform_indices = @transform_6, window_bounds = array<i64: 2, 1, 32>}, {pipeline_mode = #tpu.pipeline_mode<synchronous>, transform_indices = @transform_7, window_bounds = array<i64: 2, 32, 96>}, {pipeline_mode = #tpu.pipeline_mode<synchronous>, transform_indices = @transform_8, window_bounds = array<i64: 2, 1, 96>}, {pipeline_mode = #tpu.pipeline_mode<synchronous>, transform_indices = @transform_9, window_bounds = array<i64: 2, 32, 32>}, {pipeline_mode = #tpu.pipeline_mode<synchronous>, transform_indices = @transform_10, window_bounds = array<i64: 2, 1, 32>}, {pipeline_mode = #tpu.pipeline_mode<synchronous>, transform_indices = @transform_11, window_bounds = array<i64: 2, 1, 32>}, {pipeline_mode = #tpu.pipeline_mode<synchronous>, transform_indices = @transform_12, window_bounds = array<i64: 2, 1, 32>}, {pipeline_mode = #tpu.pipeline_mode<synchronous>, transform_indices = @transform_13, window_bounds = array<i64: 2, 32, 128>}, {pipeline_mode = #tpu.pipeline_mode<synchronous>, transform_indices = @transform_14, window_bounds = array<i64: 2, 1, 128>}, {pipeline_mode = #tpu.pipeline_mode<synchronous>, transform_indices = @transform_15, window_bounds = array<i64: 2, 128, 32>}, {pipeline_mode = #tpu.pipeline_mode<synchronous>, transform_indices = @transform_16, window_bounds = array<i64: 2, 1, 32>}, {pipeline_mode = #tpu.pipeline_mode<synchronous>, transform_indices = @transform_17, window_bounds = array<i64: 32, 128>}, {pipeline_mode = #tpu.pipeline_mode<synchronous>, transform_indices = @transform_18, window_bounds = array<i64: 1, 128>}, {transform_indices = @transform_19, window_bounds = array<i64: 1, 1, 128>}]} {
    %c0 = arith.constant 0 : index
    %c0_0 = arith.constant 0 : index
    %c0_1 = arith.constant 0 : index
    %0 = vector.load %arg1[%c0, %c0_0, %c0_1] : memref<1x17x192xf32, #tpu.memory_space<vmem>>, vector<1x17x192xf32>
    %1 = vector.shape_cast %0 : vector<1x17x192xf32> to vector<17x192xf32>
    %c0_2 = arith.constant 0 : index
    %c0_3 = arith.constant 0 : index
    %2 = vector.load %arg3[%c0_2, %c0_3] : memref<192x32xf32, #tpu.memory_space<vmem>>, vector<192x32xf32>
    %cst = arith.constant dense<0.000000e+00> : vector<17x32xf32>
    %3 = tpu.matmul %1, %2, %cst {dimension_numbers = #tpu.dot_dimension_numbers<[1], [0], [0], [1], [0, 0, 1, 1], [], []>} : vector<17x192xf32>, vector<192x32xf32>, vector<17x32xf32> -> vector<17x32xf32>
    %c0_4 = arith.constant 0 : index
    %c0_5 = arith.constant 0 : index
    %4 = vector.load %arg2[%c0_4, %c0_5] : memref<17x32xf32, #tpu.memory_space<vmem>>, vector<17x32xf32>
    %5 = arith.addf %3, %4 : vector<17x32xf32>
    %c0_6 = arith.constant 0 : index
    %c0_7 = arith.constant 0 : index
    %6 = vector.load %arg4[%c0_6, %c0_7] : memref<1x32xf32, #tpu.memory_space<vmem>>, vector<1x32xf32>
    %c0_8 = arith.constant 0 : index
    %c0_9 = arith.constant 0 : index
    %7 = vector.load %arg5[%c0_8, %c0_9] : memref<1x32xf32, #tpu.memory_space<vmem>>, vector<1x32xf32>
    %cst_10 = arith.constant dense<0.000000e+00> : vector<17xf32>
    %8 = vector.multi_reduction <add>, %5, %cst_10 [1] : vector<17x32xf32> to vector<17xf32>
    %9 = vector.shape_cast %8 : vector<17xf32> to vector<17x1xf32>
    %cst_11 = arith.constant 3.200000e+01 : f32
    %10 = vector.broadcast %cst_11 : f32 to vector<17x1xf32>
    %11 = arith.divf %9, %10 : vector<17x1xf32>
    %12 = vector.broadcast %11 : vector<17x1xf32> to vector<17x32xf32>
    %13 = arith.subf %5, %12 : vector<17x32xf32>
    %14 = arith.mulf %13, %13 : vector<17x32xf32>
    %cst_12 = arith.constant dense<0.000000e+00> : vector<17xf32>
    %15 = vector.multi_reduction <add>, %14, %cst_12 [1] : vector<17x32xf32> to vector<17xf32>
    %16 = vector.shape_cast %15 : vector<17xf32> to vector<17x1xf32>
    %cst_13 = arith.constant 3.200000e+01 : f32
    %17 = vector.broadcast %cst_13 : f32 to vector<17x1xf32>
    %18 = arith.divf %16, %17 : vector<17x1xf32>
    %19 = vector.broadcast %11 : vector<17x1xf32> to vector<17x32xf32>
    %20 = arith.subf %5, %19 : vector<17x32xf32>
    %cst_14 = arith.constant 9.99999974E-6 : f32
    %21 = vector.broadcast %cst_14 : f32 to vector<17x1xf32>
    %22 = arith.addf %18, %21 : vector<17x1xf32>
    %23 = math.rsqrt %22 : vector<17x1xf32>
    %24 = vector.broadcast %23 : vector<17x1xf32> to vector<17x32xf32>
    %25 = arith.mulf %20, %24 : vector<17x32xf32>
    %26 = vector.broadcast %6 : vector<1x32xf32> to vector<17x32xf32>
    %27 = arith.mulf %25, %26 : vector<17x32xf32>
    %28 = vector.broadcast %7 : vector<1x32xf32> to vector<17x32xf32>
    %29 = arith.addf %27, %28 : vector<17x32xf32>
    %c0_15 = arith.constant 0 : index
    %c0_16 = arith.constant 0 : index
    %c0_17 = arith.constant 0 : index
    %30 = vector.load %arg6[%c0_15, %c0_16, %c0_17] : memref<2x1x32xf32, #tpu.memory_space<vmem>>, vector<1x1x32xf32>
    %31 = vector.shape_cast %30 : vector<1x1x32xf32> to vector<1x32xf32>
    %c0_18 = arith.constant 0 : index
    %c0_19 = arith.constant 0 : index
    %c0_20 = arith.constant 0 : index
    %32 = vector.load %arg7[%c0_18, %c0_19, %c0_20] : memref<2x1x32xf32, #tpu.memory_space<vmem>>, vector<1x1x32xf32>
    %33 = vector.shape_cast %32 : vector<1x1x32xf32> to vector<1x32xf32>
    %cst_21 = arith.constant dense<0.000000e+00> : vector<17xf32>
    %34 = vector.multi_reduction <add>, %29, %cst_21 [1] : vector<17x32xf32> to vector<17xf32>
    %35 = vector.shape_cast %34 : vector<17xf32> to vector<17x1xf32>
    %cst_22 = arith.constant 3.200000e+01 : f32
    %36 = vector.broadcast %cst_22 : f32 to vector<17x1xf32>
    %37 = arith.divf %35, %36 : vector<17x1xf32>
    %38 = vector.broadcast %37 : vector<17x1xf32> to vector<17x32xf32>
    %39 = arith.subf %29, %38 : vector<17x32xf32>
    %40 = arith.mulf %39, %39 : vector<17x32xf32>
    %cst_23 = arith.constant dense<0.000000e+00> : vector<17xf32>
    %41 = vector.multi_reduction <add>, %40, %cst_23 [1] : vector<17x32xf32> to vector<17xf32>
    %42 = vector.shape_cast %41 : vector<17xf32> to vector<17x1xf32>
    %cst_24 = arith.constant 3.200000e+01 : f32
    %43 = vector.broadcast %cst_24 : f32 to vector<17x1xf32>
    %44 = arith.divf %42, %43 : vector<17x1xf32>
    %45 = vector.broadcast %37 : vector<17x1xf32> to vector<17x32xf32>
    %46 = arith.subf %29, %45 : vector<17x32xf32>
    %cst_25 = arith.constant 9.99999974E-6 : f32
    %47 = vector.broadcast %cst_25 : f32 to vector<17x1xf32>
    %48 = arith.addf %44, %47 : vector<17x1xf32>
    %49 = math.rsqrt %48 : vector<17x1xf32>
    %50 = vector.broadcast %49 : vector<17x1xf32> to vector<17x32xf32>
    %51 = arith.mulf %46, %50 : vector<17x32xf32>
    %52 = vector.broadcast %31 : vector<1x32xf32> to vector<17x32xf32>
    %53 = arith.mulf %51, %52 : vector<17x32xf32>
    %54 = vector.broadcast %33 : vector<1x32xf32> to vector<17x32xf32>
    %55 = arith.addf %53, %54 : vector<17x32xf32>
    %c0_26 = arith.constant 0 : index
    %c0_27 = arith.constant 0 : index
    %c0_28 = arith.constant 0 : index
    %56 = vector.load %arg8[%c0_26, %c0_27, %c0_28] : memref<2x32x96xf32, #tpu.memory_space<vmem>>, vector<1x32x96xf32>
    %57 = vector.shape_cast %56 : vector<1x32x96xf32> to vector<32x96xf32>
    %58 = arith.truncf %55 : vector<17x32xf32> to vector<17x32xbf16>
    %59 = arith.truncf %57 : vector<32x96xf32> to vector<32x96xbf16>
    %cst_29 = arith.constant dense<0.000000e+00> : vector<17x96xf32>
    %60 = tpu.matmul %58, %59, %cst_29 {dimension_numbers = #tpu.dot_dimension_numbers<[1], [0], [0], [1], [0, 0, 1, 1], [], []>} : vector<17x32xbf16>, vector<32x96xbf16>, vector<17x96xf32> -> vector<17x96xf32>
    %c0_30 = arith.constant 0 : index
    %c0_31 = arith.constant 0 : index
    %c0_32 = arith.constant 0 : index
    %61 = vector.load %arg9[%c0_30, %c0_31, %c0_32] : memref<2x1x96xf32, #tpu.memory_space<vmem>>, vector<1x1x96xf32>
    %62 = vector.shape_cast %61 : vector<1x1x96xf32> to vector<1x96xf32>
    %63 = vector.broadcast %62 : vector<1x96xf32> to vector<17x96xf32>
    %64 = arith.addf %60, %63 : vector<17x96xf32>
    %65 = vector.extract_strided_slice %64 {offsets = [0, 0], sizes = [17, 32], strides = [1, 1]} : vector<17x96xf32> to vector<17x32xf32>
    %cst_33 = arith.constant 0.353553385 : f32
    %66 = vector.broadcast %cst_33 : f32 to vector<17x32xf32>
    %67 = arith.mulf %65, %66 : vector<17x32xf32>
    %68 = vector.extract_strided_slice %64 {offsets = [0, 32], sizes = [17, 32], strides = [1, 1]} : vector<17x96xf32> to vector<17x32xf32>
    %69 = vector.extract_strided_slice %64 {offsets = [0, 64], sizes = [17, 32], strides = [1, 1]} : vector<17x96xf32> to vector<17x32xf32>
    %70 = vector.extract_strided_slice %67 {offsets = [0, 0], sizes = [17, 8], strides = [1, 1]} : vector<17x32xf32> to vector<17x8xf32>
    %71 = vector.extract_strided_slice %68 {offsets = [0, 0], sizes = [17, 8], strides = [1, 1]} : vector<17x32xf32> to vector<17x8xf32>
    %72 = tpu.transpose %71, [1, 0] : vector<17x8xf32> -> vector<8x17xf32>
    %73 = arith.truncf %70 : vector<17x8xf32> to vector<17x8xbf16>
    %74 = arith.truncf %72 : vector<8x17xf32> to vector<8x17xbf16>
    %cst_34 = arith.constant dense<0.000000e+00> : vector<17x17xf32>
    %75 = tpu.matmul %73, %74, %cst_34 {dimension_numbers = #tpu.dot_dimension_numbers<[1], [0], [0], [1], [0, 0, 1, 1], [], []>} : vector<17x8xbf16>, vector<8x17xbf16>, vector<17x17xf32> -> vector<17x17xf32>
    %cst_35 = arith.constant dense<0xFF800000> : vector<17xf32>
    %76 = vector.multi_reduction <maximumf>, %75, %cst_35 [1] : vector<17x17xf32> to vector<17xf32>
    %77 = vector.shape_cast %76 : vector<17xf32> to vector<17x1xf32>
    %78 = vector.broadcast %77 : vector<17x1xf32> to vector<17x17xf32>
    %79 = arith.subf %75, %78 : vector<17x17xf32>
    %80 = math.exp %79 : vector<17x17xf32>
    %cst_36 = arith.constant dense<0.000000e+00> : vector<17xf32>
    %81 = vector.multi_reduction <add>, %80, %cst_36 [1] : vector<17x17xf32> to vector<17xf32>
    %82 = vector.shape_cast %81 : vector<17xf32> to vector<17x1xf32>
    %83 = tpu.reciprocal %82 {approx = true} : vector<17x1xf32> -> vector<17x1xf32>
    %84 = vector.broadcast %83 : vector<17x1xf32> to vector<17x17xf32>
    %85 = arith.mulf %80, %84 : vector<17x17xf32>
    %86 = vector.extract_strided_slice %69 {offsets = [0, 0], sizes = [17, 8], strides = [1, 1]} : vector<17x32xf32> to vector<17x8xf32>
    %87 = arith.truncf %85 : vector<17x17xf32> to vector<17x17xbf16>
    %88 = arith.truncf %86 : vector<17x8xf32> to vector<17x8xbf16>
    %cst_37 = arith.constant dense<0.000000e+00> : vector<17x8xf32>
    %89 = tpu.matmul %87, %88, %cst_37 {dimension_numbers = #tpu.dot_dimension_numbers<[1], [0], [0], [1], [0, 0, 1, 1], [], []>} : vector<17x17xbf16>, vector<17x8xbf16>, vector<17x8xf32> -> vector<17x8xf32>
    %90 = vector.extract_strided_slice %67 {offsets = [0, 8], sizes = [17, 8], strides = [1, 1]} : vector<17x32xf32> to vector<17x8xf32>
    %91 = vector.extract_strided_slice %68 {offsets = [0, 8], sizes = [17, 8], strides = [1, 1]} : vector<17x32xf32> to vector<17x8xf32>
    %92 = tpu.transpose %91, [1, 0] : vector<17x8xf32> -> vector<8x17xf32>
    %93 = arith.truncf %90 : vector<17x8xf32> to vector<17x8xbf16>
    %94 = arith.truncf %92 : vector<8x17xf32> to vector<8x17xbf16>
    %cst_38 = arith.constant dense<0.000000e+00> : vector<17x17xf32>
    %95 = tpu.matmul %93, %94, %cst_38 {dimension_numbers = #tpu.dot_dimension_numbers<[1], [0], [0], [1], [0, 0, 1, 1], [], []>} : vector<17x8xbf16>, vector<8x17xbf16>, vector<17x17xf32> -> vector<17x17xf32>
    %cst_39 = arith.constant dense<0xFF800000> : vector<17xf32>
    %96 = vector.multi_reduction <maximumf>, %95, %cst_39 [1] : vector<17x17xf32> to vector<17xf32>
    %97 = vector.shape_cast %96 : vector<17xf32> to vector<17x1xf32>
    %98 = vector.broadcast %97 : vector<17x1xf32> to vector<17x17xf32>
    %99 = arith.subf %95, %98 : vector<17x17xf32>
    %100 = math.exp %99 : vector<17x17xf32>
    %cst_40 = arith.constant dense<0.000000e+00> : vector<17xf32>
    %101 = vector.multi_reduction <add>, %100, %cst_40 [1] : vector<17x17xf32> to vector<17xf32>
    %102 = vector.shape_cast %101 : vector<17xf32> to vector<17x1xf32>
    %103 = tpu.reciprocal %102 {approx = true} : vector<17x1xf32> -> vector<17x1xf32>
    %104 = vector.broadcast %103 : vector<17x1xf32> to vector<17x17xf32>
    %105 = arith.mulf %100, %104 : vector<17x17xf32>
    %106 = vector.extract_strided_slice %69 {offsets = [0, 8], sizes = [17, 8], strides = [1, 1]} : vector<17x32xf32> to vector<17x8xf32>
    %107 = arith.truncf %105 : vector<17x17xf32> to vector<17x17xbf16>
    %108 = arith.truncf %106 : vector<17x8xf32> to vector<17x8xbf16>
    %cst_41 = arith.constant dense<0.000000e+00> : vector<17x8xf32>
    %109 = tpu.matmul %107, %108, %cst_41 {dimension_numbers = #tpu.dot_dimension_numbers<[1], [0], [0], [1], [0, 0, 1, 1], [], []>} : vector<17x17xbf16>, vector<17x8xbf16>, vector<17x8xf32> -> vector<17x8xf32>
    %110 = vector.extract_strided_slice %67 {offsets = [0, 16], sizes = [17, 8], strides = [1, 1]} : vector<17x32xf32> to vector<17x8xf32>
    %111 = vector.extract_strided_slice %68 {offsets = [0, 16], sizes = [17, 8], strides = [1, 1]} : vector<17x32xf32> to vector<17x8xf32>
    %112 = tpu.transpose %111, [1, 0] : vector<17x8xf32> -> vector<8x17xf32>
    %113 = arith.truncf %110 : vector<17x8xf32> to vector<17x8xbf16>
    %114 = arith.truncf %112 : vector<8x17xf32> to vector<8x17xbf16>
    %cst_42 = arith.constant dense<0.000000e+00> : vector<17x17xf32>
    %115 = tpu.matmul %113, %114, %cst_42 {dimension_numbers = #tpu.dot_dimension_numbers<[1], [0], [0], [1], [0, 0, 1, 1], [], []>} : vector<17x8xbf16>, vector<8x17xbf16>, vector<17x17xf32> -> vector<17x17xf32>
    %cst_43 = arith.constant dense<0xFF800000> : vector<17xf32>
    %116 = vector.multi_reduction <maximumf>, %115, %cst_43 [1] : vector<17x17xf32> to vector<17xf32>
    %117 = vector.shape_cast %116 : vector<17xf32> to vector<17x1xf32>
    %118 = vector.broadcast %117 : vector<17x1xf32> to vector<17x17xf32>
    %119 = arith.subf %115, %118 : vector<17x17xf32>
    %120 = math.exp %119 : vector<17x17xf32>
    %cst_44 = arith.constant dense<0.000000e+00> : vector<17xf32>
    %121 = vector.multi_reduction <add>, %120, %cst_44 [1] : vector<17x17xf32> to vector<17xf32>
    %122 = vector.shape_cast %121 : vector<17xf32> to vector<17x1xf32>
    %123 = tpu.reciprocal %122 {approx = true} : vector<17x1xf32> -> vector<17x1xf32>
    %124 = vector.broadcast %123 : vector<17x1xf32> to vector<17x17xf32>
    %125 = arith.mulf %120, %124 : vector<17x17xf32>
    %126 = vector.extract_strided_slice %69 {offsets = [0, 16], sizes = [17, 8], strides = [1, 1]} : vector<17x32xf32> to vector<17x8xf32>
    %127 = arith.truncf %125 : vector<17x17xf32> to vector<17x17xbf16>
    %128 = arith.truncf %126 : vector<17x8xf32> to vector<17x8xbf16>
    %cst_45 = arith.constant dense<0.000000e+00> : vector<17x8xf32>
    %129 = tpu.matmul %127, %128, %cst_45 {dimension_numbers = #tpu.dot_dimension_numbers<[1], [0], [0], [1], [0, 0, 1, 1], [], []>} : vector<17x17xbf16>, vector<17x8xbf16>, vector<17x8xf32> -> vector<17x8xf32>
    %130 = vector.extract_strided_slice %67 {offsets = [0, 24], sizes = [17, 8], strides = [1, 1]} : vector<17x32xf32> to vector<17x8xf32>
    %131 = vector.extract_strided_slice %68 {offsets = [0, 24], sizes = [17, 8], strides = [1, 1]} : vector<17x32xf32> to vector<17x8xf32>
    %132 = tpu.transpose %131, [1, 0] : vector<17x8xf32> -> vector<8x17xf32>
    %133 = arith.truncf %130 : vector<17x8xf32> to vector<17x8xbf16>
    %134 = arith.truncf %132 : vector<8x17xf32> to vector<8x17xbf16>
    %cst_46 = arith.constant dense<0.000000e+00> : vector<17x17xf32>
    %135 = tpu.matmul %133, %134, %cst_46 {dimension_numbers = #tpu.dot_dimension_numbers<[1], [0], [0], [1], [0, 0, 1, 1], [], []>} : vector<17x8xbf16>, vector<8x17xbf16>, vector<17x17xf32> -> vector<17x17xf32>
    %cst_47 = arith.constant dense<0xFF800000> : vector<17xf32>
    %136 = vector.multi_reduction <maximumf>, %135, %cst_47 [1] : vector<17x17xf32> to vector<17xf32>
    %137 = vector.shape_cast %136 : vector<17xf32> to vector<17x1xf32>
    %138 = vector.broadcast %137 : vector<17x1xf32> to vector<17x17xf32>
    %139 = arith.subf %135, %138 : vector<17x17xf32>
    %140 = math.exp %139 : vector<17x17xf32>
    %cst_48 = arith.constant dense<0.000000e+00> : vector<17xf32>
    %141 = vector.multi_reduction <add>, %140, %cst_48 [1] : vector<17x17xf32> to vector<17xf32>
    %142 = vector.shape_cast %141 : vector<17xf32> to vector<17x1xf32>
    %143 = tpu.reciprocal %142 {approx = true} : vector<17x1xf32> -> vector<17x1xf32>
    %144 = vector.broadcast %143 : vector<17x1xf32> to vector<17x17xf32>
    %145 = arith.mulf %140, %144 : vector<17x17xf32>
    %146 = vector.extract_strided_slice %69 {offsets = [0, 24], sizes = [17, 8], strides = [1, 1]} : vector<17x32xf32> to vector<17x8xf32>
    %147 = arith.truncf %145 : vector<17x17xf32> to vector<17x17xbf16>
    %148 = arith.truncf %146 : vector<17x8xf32> to vector<17x8xbf16>
    %cst_49 = arith.constant dense<0.000000e+00> : vector<17x8xf32>
    %149 = tpu.matmul %147, %148, %cst_49 {dimension_numbers = #tpu.dot_dimension_numbers<[1], [0], [0], [1], [0, 0, 1, 1], [], []>} : vector<17x17xbf16>, vector<17x8xbf16>, vector<17x8xf32> -> vector<17x8xf32>
    %150 = tpu.concatenate %89, %109, %129, %149 in 1 : vector<17x8xf32>, vector<17x8xf32>, vector<17x8xf32>, vector<17x8xf32> -> vector<17x32xf32>
    %c0_50 = arith.constant 0 : index
    %c0_51 = arith.constant 0 : index
    %c0_52 = arith.constant 0 : index
    %151 = vector.load %arg10[%c0_50, %c0_51, %c0_52] : memref<2x32x32xf32, #tpu.memory_space<vmem>>, vector<1x32x32xf32>
    %152 = vector.shape_cast %151 : vector<1x32x32xf32> to vector<32x32xf32>
    %153 = arith.truncf %150 : vector<17x32xf32> to vector<17x32xbf16>
    %154 = arith.truncf %152 : vector<32x32xf32> to vector<32x32xbf16>
    %cst_53 = arith.constant dense<0.000000e+00> : vector<17x32xf32>
    %155 = tpu.matmul %153, %154, %cst_53 {dimension_numbers = #tpu.dot_dimension_numbers<[1], [0], [0], [1], [0, 0, 1, 1], [], []>} : vector<17x32xbf16>, vector<32x32xbf16>, vector<17x32xf32> -> vector<17x32xf32>
    %156 = arith.addf %29, %155 : vector<17x32xf32>
    %c0_54 = arith.constant 0 : index
    %c0_55 = arith.constant 0 : index
    %c0_56 = arith.constant 0 : index
    %157 = vector.load %arg11[%c0_54, %c0_55, %c0_56] : memref<2x1x32xf32, #tpu.memory_space<vmem>>, vector<1x1x32xf32>
    %158 = vector.shape_cast %157 : vector<1x1x32xf32> to vector<1x32xf32>
    %159 = vector.broadcast %158 : vector<1x32xf32> to vector<17x32xf32>
    %160 = arith.addf %156, %159 : vector<17x32xf32>
    %c0_57 = arith.constant 0 : index
    %c0_58 = arith.constant 0 : index
    %c0_59 = arith.constant 0 : index
    %161 = vector.load %arg12[%c0_57, %c0_58, %c0_59] : memref<2x1x32xf32, #tpu.memory_space<vmem>>, vector<1x1x32xf32>
    %162 = vector.shape_cast %161 : vector<1x1x32xf32> to vector<1x32xf32>
    %c0_60 = arith.constant 0 : index
    %c0_61 = arith.constant 0 : index
    %c0_62 = arith.constant 0 : index
    %163 = vector.load %arg13[%c0_60, %c0_61, %c0_62] : memref<2x1x32xf32, #tpu.memory_space<vmem>>, vector<1x1x32xf32>
    %164 = vector.shape_cast %163 : vector<1x1x32xf32> to vector<1x32xf32>
    %cst_63 = arith.constant dense<0.000000e+00> : vector<17xf32>
    %165 = vector.multi_reduction <add>, %160, %cst_63 [1] : vector<17x32xf32> to vector<17xf32>
    %166 = vector.shape_cast %165 : vector<17xf32> to vector<17x1xf32>
    %cst_64 = arith.constant 3.200000e+01 : f32
    %167 = vector.broadcast %cst_64 : f32 to vector<17x1xf32>
    %168 = arith.divf %166, %167 : vector<17x1xf32>
    %169 = vector.broadcast %168 : vector<17x1xf32> to vector<17x32xf32>
    %170 = arith.subf %160, %169 : vector<17x32xf32>
    %171 = arith.mulf %170, %170 : vector<17x32xf32>
    %cst_65 = arith.constant dense<0.000000e+00> : vector<17xf32>
    %172 = vector.multi_reduction <add>, %171, %cst_65 [1] : vector<17x32xf32> to vector<17xf32>
    %173 = vector.shape_cast %172 : vector<17xf32> to vector<17x1xf32>
    %cst_66 = arith.constant 3.200000e+01 : f32
    %174 = vector.broadcast %cst_66 : f32 to vector<17x1xf32>
    %175 = arith.divf %173, %174 : vector<17x1xf32>
    %176 = vector.broadcast %168 : vector<17x1xf32> to vector<17x32xf32>
    %177 = arith.subf %160, %176 : vector<17x32xf32>
    %cst_67 = arith.constant 9.99999974E-6 : f32
    %178 = vector.broadcast %cst_67 : f32 to vector<17x1xf32>
    %179 = arith.addf %175, %178 : vector<17x1xf32>
    %180 = math.rsqrt %179 : vector<17x1xf32>
    %181 = vector.broadcast %180 : vector<17x1xf32> to vector<17x32xf32>
    %182 = arith.mulf %177, %181 : vector<17x32xf32>
    %183 = vector.broadcast %162 : vector<1x32xf32> to vector<17x32xf32>
    %184 = arith.mulf %182, %183 : vector<17x32xf32>
    %185 = vector.broadcast %164 : vector<1x32xf32> to vector<17x32xf32>
    %186 = arith.addf %184, %185 : vector<17x32xf32>
    %c0_68 = arith.constant 0 : index
    %c0_69 = arith.constant 0 : index
    %c0_70 = arith.constant 0 : index
    %187 = vector.load %arg14[%c0_68, %c0_69, %c0_70] : memref<2x32x128xf32, #tpu.memory_space<vmem>>, vector<1x32x128xf32>
    %188 = vector.shape_cast %187 : vector<1x32x128xf32> to vector<32x128xf32>
    %189 = arith.truncf %186 : vector<17x32xf32> to vector<17x32xbf16>
    %190 = arith.truncf %188 : vector<32x128xf32> to vector<32x128xbf16>
    %cst_71 = arith.constant dense<0.000000e+00> : vector<17x128xf32>
    %191 = tpu.matmul %189, %190, %cst_71 {dimension_numbers = #tpu.dot_dimension_numbers<[1], [0], [0], [1], [0, 0, 1, 1], [], []>} : vector<17x32xbf16>, vector<32x128xbf16>, vector<17x128xf32> -> vector<17x128xf32>
    %c0_72 = arith.constant 0 : index
    %c0_73 = arith.constant 0 : index
    %c0_74 = arith.constant 0 : index
    %192 = vector.load %arg15[%c0_72, %c0_73, %c0_74] : memref<2x1x128xf32, #tpu.memory_space<vmem>>, vector<1x1x128xf32>
    %193 = vector.shape_cast %192 : vector<1x1x128xf32> to vector<1x128xf32>
    %194 = vector.broadcast %193 : vector<1x128xf32> to vector<17x128xf32>
    %195 = arith.addf %191, %194 : vector<17x128xf32>
    %cst_75 = arith.constant 1.702000e+00 : f32
    %196 = vector.broadcast %cst_75 : f32 to vector<17x128xf32>
    %197 = arith.mulf %196, %195 : vector<17x128xf32>
    %198 = arith.negf %197 : vector<17x128xf32>
    %199 = math.exp %198 : vector<17x128xf32>
    %cst_76 = arith.constant 1.000000e+00 : f32
    %200 = vector.broadcast %cst_76 : f32 to vector<17x128xf32>
    %201 = arith.addf %200, %199 : vector<17x128xf32>
    %202 = arith.divf %200, %201 : vector<17x128xf32>
    %203 = arith.mulf %195, %202 : vector<17x128xf32>
    %c0_77 = arith.constant 0 : index
    %c0_78 = arith.constant 0 : index
    %c0_79 = arith.constant 0 : index
    %204 = vector.load %arg16[%c0_77, %c0_78, %c0_79] : memref<2x128x32xf32, #tpu.memory_space<vmem>>, vector<1x128x32xf32>
    %205 = vector.shape_cast %204 : vector<1x128x32xf32> to vector<128x32xf32>
    %206 = arith.truncf %203 : vector<17x128xf32> to vector<17x128xbf16>
    %207 = arith.truncf %205 : vector<128x32xf32> to vector<128x32xbf16>
    %cst_80 = arith.constant dense<0.000000e+00> : vector<17x32xf32>
    %208 = tpu.matmul %206, %207, %cst_80 {dimension_numbers = #tpu.dot_dimension_numbers<[1], [0], [0], [1], [0, 0, 1, 1], [], []>} : vector<17x128xbf16>, vector<128x32xbf16>, vector<17x32xf32> -> vector<17x32xf32>
    %209 = arith.addf %160, %208 : vector<17x32xf32>
    %c0_81 = arith.constant 0 : index
    %c0_82 = arith.constant 0 : index
    %c0_83 = arith.constant 0 : index
    %210 = vector.load %arg17[%c0_81, %c0_82, %c0_83] : memref<2x1x32xf32, #tpu.memory_space<vmem>>, vector<1x1x32xf32>
    %211 = vector.shape_cast %210 : vector<1x1x32xf32> to vector<1x32xf32>
    %212 = vector.broadcast %211 : vector<1x32xf32> to vector<17x32xf32>
    %213 = arith.addf %209, %212 : vector<17x32xf32>
    %c1 = arith.constant 1 : index
    %c0_84 = arith.constant 0 : index
    %c0_85 = arith.constant 0 : index
    %214 = vector.load %arg6[%c1, %c0_84, %c0_85] : memref<2x1x32xf32, #tpu.memory_space<vmem>>, vector<1x1x32xf32>
    %215 = vector.shape_cast %214 : vector<1x1x32xf32> to vector<1x32xf32>
    %c1_86 = arith.constant 1 : index
    %c0_87 = arith.constant 0 : index
    %c0_88 = arith.constant 0 : index
    %216 = vector.load %arg7[%c1_86, %c0_87, %c0_88] : memref<2x1x32xf32, #tpu.memory_space<vmem>>, vector<1x1x32xf32>
    %217 = vector.shape_cast %216 : vector<1x1x32xf32> to vector<1x32xf32>
    %cst_89 = arith.constant dense<0.000000e+00> : vector<17xf32>
    %218 = vector.multi_reduction <add>, %213, %cst_89 [1] : vector<17x32xf32> to vector<17xf32>
    %219 = vector.shape_cast %218 : vector<17xf32> to vector<17x1xf32>
    %cst_90 = arith.constant 3.200000e+01 : f32
    %220 = vector.broadcast %cst_90 : f32 to vector<17x1xf32>
    %221 = arith.divf %219, %220 : vector<17x1xf32>
    %222 = vector.broadcast %221 : vector<17x1xf32> to vector<17x32xf32>
    %223 = arith.subf %213, %222 : vector<17x32xf32>
    %224 = arith.mulf %223, %223 : vector<17x32xf32>
    %cst_91 = arith.constant dense<0.000000e+00> : vector<17xf32>
    %225 = vector.multi_reduction <add>, %224, %cst_91 [1] : vector<17x32xf32> to vector<17xf32>
    %226 = vector.shape_cast %225 : vector<17xf32> to vector<17x1xf32>
    %cst_92 = arith.constant 3.200000e+01 : f32
    %227 = vector.broadcast %cst_92 : f32 to vector<17x1xf32>
    %228 = arith.divf %226, %227 : vector<17x1xf32>
    %229 = vector.broadcast %221 : vector<17x1xf32> to vector<17x32xf32>
    %230 = arith.subf %213, %229 : vector<17x32xf32>
    %cst_93 = arith.constant 9.99999974E-6 : f32
    %231 = vector.broadcast %cst_93 : f32 to vector<17x1xf32>
    %232 = arith.addf %228, %231 : vector<17x1xf32>
    %233 = math.rsqrt %232 : vector<17x1xf32>
    %234 = vector.broadcast %233 : vector<17x1xf32> to vector<17x32xf32>
    %235 = arith.mulf %230, %234 : vector<17x32xf32>
    %236 = vector.broadcast %215 : vector<1x32xf32> to vector<17x32xf32>
    %237 = arith.mulf %235, %236 : vector<17x32xf32>
    %238 = vector.broadcast %217 : vector<1x32xf32> to vector<17x32xf32>
    %239 = arith.addf %237, %238 : vector<17x32xf32>
    %c1_94 = arith.constant 1 : index
    %c0_95 = arith.constant 0 : index
    %c0_96 = arith.constant 0 : index
    %240 = vector.load %arg8[%c1_94, %c0_95, %c0_96] : memref<2x32x96xf32, #tpu.memory_space<vmem>>, vector<1x32x96xf32>
    %241 = vector.shape_cast %240 : vector<1x32x96xf32> to vector<32x96xf32>
    %242 = arith.truncf %239 : vector<17x32xf32> to vector<17x32xbf16>
    %243 = arith.truncf %241 : vector<32x96xf32> to vector<32x96xbf16>
    %cst_97 = arith.constant dense<0.000000e+00> : vector<17x96xf32>
    %244 = tpu.matmul %242, %243, %cst_97 {dimension_numbers = #tpu.dot_dimension_numbers<[1], [0], [0], [1], [0, 0, 1, 1], [], []>} : vector<17x32xbf16>, vector<32x96xbf16>, vector<17x96xf32> -> vector<17x96xf32>
    %c1_98 = arith.constant 1 : index
    %c0_99 = arith.constant 0 : index
    %c0_100 = arith.constant 0 : index
    %245 = vector.load %arg9[%c1_98, %c0_99, %c0_100] : memref<2x1x96xf32, #tpu.memory_space<vmem>>, vector<1x1x96xf32>
    %246 = vector.shape_cast %245 : vector<1x1x96xf32> to vector<1x96xf32>
    %247 = vector.broadcast %246 : vector<1x96xf32> to vector<17x96xf32>
    %248 = arith.addf %244, %247 : vector<17x96xf32>
    %249 = vector.extract_strided_slice %248 {offsets = [0, 0], sizes = [17, 32], strides = [1, 1]} : vector<17x96xf32> to vector<17x32xf32>
    %cst_101 = arith.constant 0.353553385 : f32
    %250 = vector.broadcast %cst_101 : f32 to vector<17x32xf32>
    %251 = arith.mulf %249, %250 : vector<17x32xf32>
    %252 = vector.extract_strided_slice %248 {offsets = [0, 32], sizes = [17, 32], strides = [1, 1]} : vector<17x96xf32> to vector<17x32xf32>
    %253 = vector.extract_strided_slice %248 {offsets = [0, 64], sizes = [17, 32], strides = [1, 1]} : vector<17x96xf32> to vector<17x32xf32>
    %254 = vector.extract_strided_slice %251 {offsets = [0, 0], sizes = [17, 8], strides = [1, 1]} : vector<17x32xf32> to vector<17x8xf32>
    %255 = vector.extract_strided_slice %252 {offsets = [0, 0], sizes = [17, 8], strides = [1, 1]} : vector<17x32xf32> to vector<17x8xf32>
    %256 = tpu.transpose %255, [1, 0] : vector<17x8xf32> -> vector<8x17xf32>
    %257 = arith.truncf %254 : vector<17x8xf32> to vector<17x8xbf16>
    %258 = arith.truncf %256 : vector<8x17xf32> to vector<8x17xbf16>
    %cst_102 = arith.constant dense<0.000000e+00> : vector<17x17xf32>
    %259 = tpu.matmul %257, %258, %cst_102 {dimension_numbers = #tpu.dot_dimension_numbers<[1], [0], [0], [1], [0, 0, 1, 1], [], []>} : vector<17x8xbf16>, vector<8x17xbf16>, vector<17x17xf32> -> vector<17x17xf32>
    %cst_103 = arith.constant dense<0xFF800000> : vector<17xf32>
    %260 = vector.multi_reduction <maximumf>, %259, %cst_103 [1] : vector<17x17xf32> to vector<17xf32>
    %261 = vector.shape_cast %260 : vector<17xf32> to vector<17x1xf32>
    %262 = vector.broadcast %261 : vector<17x1xf32> to vector<17x17xf32>
    %263 = arith.subf %259, %262 : vector<17x17xf32>
    %264 = math.exp %263 : vector<17x17xf32>
    %cst_104 = arith.constant dense<0.000000e+00> : vector<17xf32>
    %265 = vector.multi_reduction <add>, %264, %cst_104 [1] : vector<17x17xf32> to vector<17xf32>
    %266 = vector.shape_cast %265 : vector<17xf32> to vector<17x1xf32>
    %267 = tpu.reciprocal %266 {approx = true} : vector<17x1xf32> -> vector<17x1xf32>
    %268 = vector.broadcast %267 : vector<17x1xf32> to vector<17x17xf32>
    %269 = arith.mulf %264, %268 : vector<17x17xf32>
    %270 = vector.extract_strided_slice %253 {offsets = [0, 0], sizes = [17, 8], strides = [1, 1]} : vector<17x32xf32> to vector<17x8xf32>
    %271 = arith.truncf %269 : vector<17x17xf32> to vector<17x17xbf16>
    %272 = arith.truncf %270 : vector<17x8xf32> to vector<17x8xbf16>
    %cst_105 = arith.constant dense<0.000000e+00> : vector<17x8xf32>
    %273 = tpu.matmul %271, %272, %cst_105 {dimension_numbers = #tpu.dot_dimension_numbers<[1], [0], [0], [1], [0, 0, 1, 1], [], []>} : vector<17x17xbf16>, vector<17x8xbf16>, vector<17x8xf32> -> vector<17x8xf32>
    %274 = vector.extract_strided_slice %251 {offsets = [0, 8], sizes = [17, 8], strides = [1, 1]} : vector<17x32xf32> to vector<17x8xf32>
    %275 = vector.extract_strided_slice %252 {offsets = [0, 8], sizes = [17, 8], strides = [1, 1]} : vector<17x32xf32> to vector<17x8xf32>
    %276 = tpu.transpose %275, [1, 0] : vector<17x8xf32> -> vector<8x17xf32>
    %277 = arith.truncf %274 : vector<17x8xf32> to vector<17x8xbf16>
    %278 = arith.truncf %276 : vector<8x17xf32> to vector<8x17xbf16>
    %cst_106 = arith.constant dense<0.000000e+00> : vector<17x17xf32>
    %279 = tpu.matmul %277, %278, %cst_106 {dimension_numbers = #tpu.dot_dimension_numbers<[1], [0], [0], [1], [0, 0, 1, 1], [], []>} : vector<17x8xbf16>, vector<8x17xbf16>, vector<17x17xf32> -> vector<17x17xf32>
    %cst_107 = arith.constant dense<0xFF800000> : vector<17xf32>
    %280 = vector.multi_reduction <maximumf>, %279, %cst_107 [1] : vector<17x17xf32> to vector<17xf32>
    %281 = vector.shape_cast %280 : vector<17xf32> to vector<17x1xf32>
    %282 = vector.broadcast %281 : vector<17x1xf32> to vector<17x17xf32>
    %283 = arith.subf %279, %282 : vector<17x17xf32>
    %284 = math.exp %283 : vector<17x17xf32>
    %cst_108 = arith.constant dense<0.000000e+00> : vector<17xf32>
    %285 = vector.multi_reduction <add>, %284, %cst_108 [1] : vector<17x17xf32> to vector<17xf32>
    %286 = vector.shape_cast %285 : vector<17xf32> to vector<17x1xf32>
    %287 = tpu.reciprocal %286 {approx = true} : vector<17x1xf32> -> vector<17x1xf32>
    %288 = vector.broadcast %287 : vector<17x1xf32> to vector<17x17xf32>
    %289 = arith.mulf %284, %288 : vector<17x17xf32>
    %290 = vector.extract_strided_slice %253 {offsets = [0, 8], sizes = [17, 8], strides = [1, 1]} : vector<17x32xf32> to vector<17x8xf32>
    %291 = arith.truncf %289 : vector<17x17xf32> to vector<17x17xbf16>
    %292 = arith.truncf %290 : vector<17x8xf32> to vector<17x8xbf16>
    %cst_109 = arith.constant dense<0.000000e+00> : vector<17x8xf32>
    %293 = tpu.matmul %291, %292, %cst_109 {dimension_numbers = #tpu.dot_dimension_numbers<[1], [0], [0], [1], [0, 0, 1, 1], [], []>} : vector<17x17xbf16>, vector<17x8xbf16>, vector<17x8xf32> -> vector<17x8xf32>
    %294 = vector.extract_strided_slice %251 {offsets = [0, 16], sizes = [17, 8], strides = [1, 1]} : vector<17x32xf32> to vector<17x8xf32>
    %295 = vector.extract_strided_slice %252 {offsets = [0, 16], sizes = [17, 8], strides = [1, 1]} : vector<17x32xf32> to vector<17x8xf32>
    %296 = tpu.transpose %295, [1, 0] : vector<17x8xf32> -> vector<8x17xf32>
    %297 = arith.truncf %294 : vector<17x8xf32> to vector<17x8xbf16>
    %298 = arith.truncf %296 : vector<8x17xf32> to vector<8x17xbf16>
    %cst_110 = arith.constant dense<0.000000e+00> : vector<17x17xf32>
    %299 = tpu.matmul %297, %298, %cst_110 {dimension_numbers = #tpu.dot_dimension_numbers<[1], [0], [0], [1], [0, 0, 1, 1], [], []>} : vector<17x8xbf16>, vector<8x17xbf16>, vector<17x17xf32> -> vector<17x17xf32>
    %cst_111 = arith.constant dense<0xFF800000> : vector<17xf32>
    %300 = vector.multi_reduction <maximumf>, %299, %cst_111 [1] : vector<17x17xf32> to vector<17xf32>
    %301 = vector.shape_cast %300 : vector<17xf32> to vector<17x1xf32>
    %302 = vector.broadcast %301 : vector<17x1xf32> to vector<17x17xf32>
    %303 = arith.subf %299, %302 : vector<17x17xf32>
    %304 = math.exp %303 : vector<17x17xf32>
    %cst_112 = arith.constant dense<0.000000e+00> : vector<17xf32>
    %305 = vector.multi_reduction <add>, %304, %cst_112 [1] : vector<17x17xf32> to vector<17xf32>
    %306 = vector.shape_cast %305 : vector<17xf32> to vector<17x1xf32>
    %307 = tpu.reciprocal %306 {approx = true} : vector<17x1xf32> -> vector<17x1xf32>
    %308 = vector.broadcast %307 : vector<17x1xf32> to vector<17x17xf32>
    %309 = arith.mulf %304, %308 : vector<17x17xf32>
    %310 = vector.extract_strided_slice %253 {offsets = [0, 16], sizes = [17, 8], strides = [1, 1]} : vector<17x32xf32> to vector<17x8xf32>
    %311 = arith.truncf %309 : vector<17x17xf32> to vector<17x17xbf16>
    %312 = arith.truncf %310 : vector<17x8xf32> to vector<17x8xbf16>
    %cst_113 = arith.constant dense<0.000000e+00> : vector<17x8xf32>
    %313 = tpu.matmul %311, %312, %cst_113 {dimension_numbers = #tpu.dot_dimension_numbers<[1], [0], [0], [1], [0, 0, 1, 1], [], []>} : vector<17x17xbf16>, vector<17x8xbf16>, vector<17x8xf32> -> vector<17x8xf32>
    %314 = vector.extract_strided_slice %251 {offsets = [0, 24], sizes = [17, 8], strides = [1, 1]} : vector<17x32xf32> to vector<17x8xf32>
    %315 = vector.extract_strided_slice %252 {offsets = [0, 24], sizes = [17, 8], strides = [1, 1]} : vector<17x32xf32> to vector<17x8xf32>
    %316 = tpu.transpose %315, [1, 0] : vector<17x8xf32> -> vector<8x17xf32>
    %317 = arith.truncf %314 : vector<17x8xf32> to vector<17x8xbf16>
    %318 = arith.truncf %316 : vector<8x17xf32> to vector<8x17xbf16>
    %cst_114 = arith.constant dense<0.000000e+00> : vector<17x17xf32>
    %319 = tpu.matmul %317, %318, %cst_114 {dimension_numbers = #tpu.dot_dimension_numbers<[1], [0], [0], [1], [0, 0, 1, 1], [], []>} : vector<17x8xbf16>, vector<8x17xbf16>, vector<17x17xf32> -> vector<17x17xf32>
    %cst_115 = arith.constant dense<0xFF800000> : vector<17xf32>
    %320 = vector.multi_reduction <maximumf>, %319, %cst_115 [1] : vector<17x17xf32> to vector<17xf32>
    %321 = vector.shape_cast %320 : vector<17xf32> to vector<17x1xf32>
    %322 = vector.broadcast %321 : vector<17x1xf32> to vector<17x17xf32>
    %323 = arith.subf %319, %322 : vector<17x17xf32>
    %324 = math.exp %323 : vector<17x17xf32>
    %cst_116 = arith.constant dense<0.000000e+00> : vector<17xf32>
    %325 = vector.multi_reduction <add>, %324, %cst_116 [1] : vector<17x17xf32> to vector<17xf32>
    %326 = vector.shape_cast %325 : vector<17xf32> to vector<17x1xf32>
    %327 = tpu.reciprocal %326 {approx = true} : vector<17x1xf32> -> vector<17x1xf32>
    %328 = vector.broadcast %327 : vector<17x1xf32> to vector<17x17xf32>
    %329 = arith.mulf %324, %328 : vector<17x17xf32>
    %330 = vector.extract_strided_slice %253 {offsets = [0, 24], sizes = [17, 8], strides = [1, 1]} : vector<17x32xf32> to vector<17x8xf32>
    %331 = arith.truncf %329 : vector<17x17xf32> to vector<17x17xbf16>
    %332 = arith.truncf %330 : vector<17x8xf32> to vector<17x8xbf16>
    %cst_117 = arith.constant dense<0.000000e+00> : vector<17x8xf32>
    %333 = tpu.matmul %331, %332, %cst_117 {dimension_numbers = #tpu.dot_dimension_numbers<[1], [0], [0], [1], [0, 0, 1, 1], [], []>} : vector<17x17xbf16>, vector<17x8xbf16>, vector<17x8xf32> -> vector<17x8xf32>
    %334 = tpu.concatenate %273, %293, %313, %333 in 1 : vector<17x8xf32>, vector<17x8xf32>, vector<17x8xf32>, vector<17x8xf32> -> vector<17x32xf32>
    %c1_118 = arith.constant 1 : index
    %c0_119 = arith.constant 0 : index
    %c0_120 = arith.constant 0 : index
    %335 = vector.load %arg10[%c1_118, %c0_119, %c0_120] : memref<2x32x32xf32, #tpu.memory_space<vmem>>, vector<1x32x32xf32>
    %336 = vector.shape_cast %335 : vector<1x32x32xf32> to vector<32x32xf32>
    %337 = arith.truncf %334 : vector<17x32xf32> to vector<17x32xbf16>
    %338 = arith.truncf %336 : vector<32x32xf32> to vector<32x32xbf16>
    %cst_121 = arith.constant dense<0.000000e+00> : vector<17x32xf32>
    %339 = tpu.matmul %337, %338, %cst_121 {dimension_numbers = #tpu.dot_dimension_numbers<[1], [0], [0], [1], [0, 0, 1, 1], [], []>} : vector<17x32xbf16>, vector<32x32xbf16>, vector<17x32xf32> -> vector<17x32xf32>
    %340 = arith.addf %213, %339 : vector<17x32xf32>
    %c1_122 = arith.constant 1 : index
    %c0_123 = arith.constant 0 : index
    %c0_124 = arith.constant 0 : index
    %341 = vector.load %arg11[%c1_122, %c0_123, %c0_124] : memref<2x1x32xf32, #tpu.memory_space<vmem>>, vector<1x1x32xf32>
    %342 = vector.shape_cast %341 : vector<1x1x32xf32> to vector<1x32xf32>
    %343 = vector.broadcast %342 : vector<1x32xf32> to vector<17x32xf32>
    %344 = arith.addf %340, %343 : vector<17x32xf32>
    %c1_125 = arith.constant 1 : index
    %c0_126 = arith.constant 0 : index
    %c0_127 = arith.constant 0 : index
    %345 = vector.load %arg12[%c1_125, %c0_126, %c0_127] : memref<2x1x32xf32, #tpu.memory_space<vmem>>, vector<1x1x32xf32>
    %346 = vector.shape_cast %345 : vector<1x1x32xf32> to vector<1x32xf32>
    %c1_128 = arith.constant 1 : index
    %c0_129 = arith.constant 0 : index
    %c0_130 = arith.constant 0 : index
    %347 = vector.load %arg13[%c1_128, %c0_129, %c0_130] : memref<2x1x32xf32, #tpu.memory_space<vmem>>, vector<1x1x32xf32>
    %348 = vector.shape_cast %347 : vector<1x1x32xf32> to vector<1x32xf32>
    %cst_131 = arith.constant dense<0.000000e+00> : vector<17xf32>
    %349 = vector.multi_reduction <add>, %344, %cst_131 [1] : vector<17x32xf32> to vector<17xf32>
    %350 = vector.shape_cast %349 : vector<17xf32> to vector<17x1xf32>
    %cst_132 = arith.constant 3.200000e+01 : f32
    %351 = vector.broadcast %cst_132 : f32 to vector<17x1xf32>
    %352 = arith.divf %350, %351 : vector<17x1xf32>
    %353 = vector.broadcast %352 : vector<17x1xf32> to vector<17x32xf32>
    %354 = arith.subf %344, %353 : vector<17x32xf32>
    %355 = arith.mulf %354, %354 : vector<17x32xf32>
    %cst_133 = arith.constant dense<0.000000e+00> : vector<17xf32>
    %356 = vector.multi_reduction <add>, %355, %cst_133 [1] : vector<17x32xf32> to vector<17xf32>
    %357 = vector.shape_cast %356 : vector<17xf32> to vector<17x1xf32>
    %cst_134 = arith.constant 3.200000e+01 : f32
    %358 = vector.broadcast %cst_134 : f32 to vector<17x1xf32>
    %359 = arith.divf %357, %358 : vector<17x1xf32>
    %360 = vector.broadcast %352 : vector<17x1xf32> to vector<17x32xf32>
    %361 = arith.subf %344, %360 : vector<17x32xf32>
    %cst_135 = arith.constant 9.99999974E-6 : f32
    %362 = vector.broadcast %cst_135 : f32 to vector<17x1xf32>
    %363 = arith.addf %359, %362 : vector<17x1xf32>
    %364 = math.rsqrt %363 : vector<17x1xf32>
    %365 = vector.broadcast %364 : vector<17x1xf32> to vector<17x32xf32>
    %366 = arith.mulf %361, %365 : vector<17x32xf32>
    %367 = vector.broadcast %346 : vector<1x32xf32> to vector<17x32xf32>
    %368 = arith.mulf %366, %367 : vector<17x32xf32>
    %369 = vector.broadcast %348 : vector<1x32xf32> to vector<17x32xf32>
    %370 = arith.addf %368, %369 : vector<17x32xf32>
    %c1_136 = arith.constant 1 : index
    %c0_137 = arith.constant 0 : index
    %c0_138 = arith.constant 0 : index
    %371 = vector.load %arg14[%c1_136, %c0_137, %c0_138] : memref<2x32x128xf32, #tpu.memory_space<vmem>>, vector<1x32x128xf32>
    %372 = vector.shape_cast %371 : vector<1x32x128xf32> to vector<32x128xf32>
    %373 = arith.truncf %370 : vector<17x32xf32> to vector<17x32xbf16>
    %374 = arith.truncf %372 : vector<32x128xf32> to vector<32x128xbf16>
    %cst_139 = arith.constant dense<0.000000e+00> : vector<17x128xf32>
    %375 = tpu.matmul %373, %374, %cst_139 {dimension_numbers = #tpu.dot_dimension_numbers<[1], [0], [0], [1], [0, 0, 1, 1], [], []>} : vector<17x32xbf16>, vector<32x128xbf16>, vector<17x128xf32> -> vector<17x128xf32>
    %c1_140 = arith.constant 1 : index
    %c0_141 = arith.constant 0 : index
    %c0_142 = arith.constant 0 : index
    %376 = vector.load %arg15[%c1_140, %c0_141, %c0_142] : memref<2x1x128xf32, #tpu.memory_space<vmem>>, vector<1x1x128xf32>
    %377 = vector.shape_cast %376 : vector<1x1x128xf32> to vector<1x128xf32>
    %378 = vector.broadcast %377 : vector<1x128xf32> to vector<17x128xf32>
    %379 = arith.addf %375, %378 : vector<17x128xf32>
    %cst_143 = arith.constant 1.702000e+00 : f32
    %380 = vector.broadcast %cst_143 : f32 to vector<17x128xf32>
    %381 = arith.mulf %380, %379 : vector<17x128xf32>
    %382 = arith.negf %381 : vector<17x128xf32>
    %383 = math.exp %382 : vector<17x128xf32>
    %cst_144 = arith.constant 1.000000e+00 : f32
    %384 = vector.broadcast %cst_144 : f32 to vector<17x128xf32>
    %385 = arith.addf %384, %383 : vector<17x128xf32>
    %386 = arith.divf %384, %385 : vector<17x128xf32>
    %387 = arith.mulf %379, %386 : vector<17x128xf32>
    %c1_145 = arith.constant 1 : index
    %c0_146 = arith.constant 0 : index
    %c0_147 = arith.constant 0 : index
    %388 = vector.load %arg16[%c1_145, %c0_146, %c0_147] : memref<2x128x32xf32, #tpu.memory_space<vmem>>, vector<1x128x32xf32>
    %389 = vector.shape_cast %388 : vector<1x128x32xf32> to vector<128x32xf32>
    %390 = arith.truncf %387 : vector<17x128xf32> to vector<17x128xbf16>
    %391 = arith.truncf %389 : vector<128x32xf32> to vector<128x32xbf16>
    %cst_148 = arith.constant dense<0.000000e+00> : vector<17x32xf32>
    %392 = tpu.matmul %390, %391, %cst_148 {dimension_numbers = #tpu.dot_dimension_numbers<[1], [0], [0], [1], [0, 0, 1, 1], [], []>} : vector<17x128xbf16>, vector<128x32xbf16>, vector<17x32xf32> -> vector<17x32xf32>
    %393 = arith.addf %344, %392 : vector<17x32xf32>
    %c1_149 = arith.constant 1 : index
    %c0_150 = arith.constant 0 : index
    %c0_151 = arith.constant 0 : index
    %394 = vector.load %arg17[%c1_149, %c0_150, %c0_151] : memref<2x1x32xf32, #tpu.memory_space<vmem>>, vector<1x1x32xf32>
    %395 = vector.shape_cast %394 : vector<1x1x32xf32> to vector<1x32xf32>
    %396 = vector.broadcast %395 : vector<1x32xf32> to vector<17x32xf32>
    %397 = arith.addf %393, %396 : vector<17x32xf32>
    %398 = vector.extract_strided_slice %397 {offsets = [0, 0], sizes = [1, 32], strides = [1, 1]} : vector<17x32xf32> to vector<1x32xf32>
    %c0_152 = arith.constant 0 : index
    %c0_153 = arith.constant 0 : index
    %399 = vector.load %arg18[%c0_152, %c0_153] : memref<32x128xf32, #tpu.memory_space<vmem>>, vector<32x128xf32>
    %400 = arith.truncf %398 : vector<1x32xf32> to vector<1x32xbf16>
    %401 = arith.truncf %399 : vector<32x128xf32> to vector<32x128xbf16>
    %cst_154 = arith.constant dense<0.000000e+00> : vector<1x128xf32>
    %402 = tpu.matmul %400, %401, %cst_154 {dimension_numbers = #tpu.dot_dimension_numbers<[1], [0], [0], [1], [0, 0, 1, 1], [], []>} : vector<1x32xbf16>, vector<32x128xbf16>, vector<1x128xf32> -> vector<1x128xf32>
    %c0_155 = arith.constant 0 : index
    %c0_156 = arith.constant 0 : index
    %403 = vector.load %arg19[%c0_155, %c0_156] : memref<1x128xf32, #tpu.memory_space<vmem>>, vector<1x128xf32>
    %404 = arith.addf %402, %403 : vector<1x128xf32>
    %c0_157 = arith.constant 0 : index
    %c0_158 = arith.constant 0 : index
    %c0_159 = arith.constant 0 : index
    %405 = vector.load %arg20[%c0_157, %c0_158, %c0_159] : memref<1x1x128xf32, #tpu.memory_space<vmem>>, vector<1x1x128xf32>
    %406 = vector.shape_cast %405 : vector<1x1x128xf32> to vector<1x128xf32>
    %407 = vector.shape_cast %404 : vector<1x128xf32> to vector<1x1x128xf32>
    tpu.vector_store %arg20[%c0_157, %c0_158, %c0_159], %407 {strides = array<i32>} : memref<1x1x128xf32, #tpu.memory_space<vmem>>, vector<1x1x128xf32>,
    return
  }
  func.func @transform_0(%arg0: i32) -> (i32, i32, i32) {
    %c0_i32 = arith.constant 0 : i32
    %c0_i32_0 = arith.constant 0 : i32
    %c0_i32_1 = arith.constant 0 : i32
    return %arg0, %c0_i32, %c0_i32_0 : i32, i32, i32
  }
  func.func @transform_1(%arg0: i32) -> (i32, i32) {
    %c0_i32 = arith.constant 0 : i32
    %c0_i32_0 = arith.constant 0 : i32
    %c0_i32_1 = arith.constant 0 : i32
    return %c0_i32, %c0_i32_0 : i32, i32
  }
  func.func @transform_2(%arg0: i32) -> (i32, i32) {
    %c0_i32 = arith.constant 0 : i32
    %c0_i32_0 = arith.constant 0 : i32
    %c0_i32_1 = arith.constant 0 : i32
    return %c0_i32, %c0_i32_0 : i32, i32
  }
  func.func @transform_3(%arg0: i32) -> (i32, i32) {
    %c0_i32 = arith.constant 0 : i32
    %c0_i32_0 = arith.constant 0 : i32
    %c0_i32_1 = arith.constant 0 : i32
    return %c0_i32, %c0_i32_0 : i32, i32
  }
  func.func @transform_4(%arg0: i32) -> (i32, i32) {
    %c0_i32 = arith.constant 0 : i32
    %c0_i32_0 = arith.constant 0 : i32
    %c0_i32_1 = arith.constant 0 : i32
    return %c0_i32, %c0_i32_0 : i32, i32
  }
  func.func @transform_5(%arg0: i32) -> (i32, i32, i32) {
    %c0_i32 = arith.constant 0 : i32
    %c0_i32_0 = arith.constant 0 : i32
    %c0_i32_1 = arith.constant 0 : i32
    %c0_i32_2 = arith.constant 0 : i32
    return %c0_i32, %c0_i32_0, %c0_i32_1 : i32, i32, i32
  }
  func.func @transform_6(%arg0: i32) -> (i32, i32, i32) {
    %c0_i32 = arith.constant 0 : i32
    %c0_i32_0 = arith.constant 0 : i32
    %c0_i32_1 = arith.constant 0 : i32
    %c0_i32_2 = arith.constant 0 : i32
    return %c0_i32, %c0_i32_0, %c0_i32_1 : i32, i32, i32
  }
  func.func @transform_7(%arg0: i32) -> (i32, i32, i32) {
    %c0_i32 = arith.constant 0 : i32
    %c0_i32_0 = arith.constant 0 : i32
    %c0_i32_1 = arith.constant 0 : i32
    %c0_i32_2 = arith.constant 0 : i32
    return %c0_i32, %c0_i32_0, %c0_i32_1 : i32, i32, i32
  }
  func.func @transform_8(%arg0: i32) -> (i32, i32, i32) {
    %c0_i32 = arith.constant 0 : i32
    %c0_i32_0 = arith.constant 0 : i32
    %c0_i32_1 = arith.constant 0 : i32
    %c0_i32_2 = arith.constant 0 : i32
    return %c0_i32, %c0_i32_0, %c0_i32_1 : i32, i32, i32
  }
  func.func @transform_9(%arg0: i32) -> (i32, i32, i32) {
    %c0_i32 = arith.constant 0 : i32
    %c0_i32_0 = arith.constant 0 : i32
    %c0_i32_1 = arith.constant 0 : i32
    %c0_i32_2 = arith.constant 0 : i32
    return %c0_i32, %c0_i32_0, %c0_i32_1 : i32, i32, i32
  }
  func.func @transform_10(%arg0: i32) -> (i32, i32, i32) {
    %c0_i32 = arith.constant 0 : i32
    %c0_i32_0 = arith.constant 0 : i32
    %c0_i32_1 = arith.constant 0 : i32
    %c0_i32_2 = arith.constant 0 : i32
    return %c0_i32, %c0_i32_0, %c0_i32_1 : i32, i32, i32
  }
  func.func @transform_11(%arg0: i32) -> (i32, i32, i32) {
    %c0_i32 = arith.constant 0 : i32
    %c0_i32_0 = arith.constant 0 : i32
    %c0_i32_1 = arith.constant 0 : i32
    %c0_i32_2 = arith.constant 0 : i32
    return %c0_i32, %c0_i32_0, %c0_i32_1 : i32, i32, i32
  }
  func.func @transform_12(%arg0: i32) -> (i32, i32, i32) {
    %c0_i32 = arith.constant 0 : i32
    %c0_i32_0 = arith.constant 0 : i32
    %c0_i32_1 = arith.constant 0 : i32
    %c0_i32_2 = arith.constant 0 : i32
    return %c0_i32, %c0_i32_0, %c0_i32_1 : i32, i32, i32
  }
  func.func @transform_13(%arg0: i32) -> (i32, i32, i32) {
    %c0_i32 = arith.constant 0 : i32
    %c0_i32_0 = arith.constant 0 : i32
    %c0_i32_1 = arith.constant 0 : i32
    %c0_i32_2 = arith.constant 0 : i32
    return %c0_i32, %c0_i32_0, %c0_i32_1 : i32, i32, i32
  }
  func.func @transform_14(%arg0: i32) -> (i32, i32, i32) {
    %c0_i32 = arith.constant 0 : i32
    %c0_i32_0 = arith.constant 0 : i32
    %c0_i32_1 = arith.constant 0 : i32
    %c0_i32_2 = arith.constant 0 : i32
    return %c0_i32, %c0_i32_0, %c0_i32_1 : i32, i32, i32
  }
  func.func @transform_15(%arg0: i32) -> (i32, i32, i32) {
    %c0_i32 = arith.constant 0 : i32
    %c0_i32_0 = arith.constant 0 : i32
    %c0_i32_1 = arith.constant 0 : i32
    %c0_i32_2 = arith.constant 0 : i32
    return %c0_i32, %c0_i32_0, %c0_i32_1 : i32, i32, i32
  }
  func.func @transform_16(%arg0: i32) -> (i32, i32, i32) {
    %c0_i32 = arith.constant 0 : i32
    %c0_i32_0 = arith.constant 0 : i32
    %c0_i32_1 = arith.constant 0 : i32
    %c0_i32_2 = arith.constant 0 : i32
    return %c0_i32, %c0_i32_0, %c0_i32_1 : i32, i32, i32
  }
  func.func @transform_17(%arg0: i32) -> (i32, i32) {
    %c0_i32 = arith.constant 0 : i32
    %c0_i32_0 = arith.constant 0 : i32
    %c0_i32_1 = arith.constant 0 : i32
    return %c0_i32, %c0_i32_0 : i32, i32
  }
  func.func @transform_18(%arg0: i32) -> (i32, i32) {
    %c0_i32 = arith.constant 0 : i32
    %c0_i32_0 = arith.constant 0 : i32
    %c0_i32_1 = arith.constant 0 : i32
    return %c0_i32, %c0_i32_0 : i32, i32
  }
  func.func @transform_19(%arg0: i32) -> (i32, i32, i32) {
    %c0_i32 = arith.constant 0 : i32
    %c0_i32_0 = arith.constant 0 : i32
    %c0_i32_1 = arith.constant 0 : i32
    return %arg0, %c0_i32, %c0_i32_0 : i32, i32, i32
  }
}

</mosaic_0001>

<bundles_post_ra>
// kernel: clip_linear_probe_forward.1
= control target key start
LH: loop header
LB: loop body
LE: loop exit
PB: predicated region body
PF: predicated region fallthrough
CT: control target
= control target key end

     0   :  { %s5233_s0 = inlined_call_operand.vmem [shape: f32[2,17,192], index: 0, kind: input, shape index: {}]   ;;  %s5234_s1 = inlined_call_operand.vmem [shape: f32[17,32], index: 1, kind: input, shape index: {}]   ;;  %s5235_s2 = inlined_call_operand.vmem [shape: f32[192,32], index: 2, kind: input, shape index: {}]   ;;  %s5236_s3 = inlined_call_operand.vmem [shape: f32[1,32], index: 3, kind: input, shape index: {}]   ;;  %s5237_s4 = inlined_call_operand.vmem [shape: f32[1,32], index: 4, kind: input, shape index: {}]   ;;  %s5238_s5 = inlined_call_operand.vmem [shape: f32[2,1,32], index: 5, kind: input, shape index: {}]   ;;  %s5239_s6 = inlined_call_operand.vmem [shape: f32[2,1,32], index: 6, kind: input, shape index: {}]   ;;  %s5240_s7 = inlined_call_operand.vmem [shape: f32[2,32,96], index: 7, kind: input, shape index: {}]   ;;  %s5241_s8 = inlined_call_operand.vmem [shape: f32[2,1,96], index: 8, kind: input, shape index: {}]   ;;  %s5242_s9 = inlined_call_operand.vmem [shape: f32[2,32,32], index: 9, kind: input, shape index: {}]   ;;  %s5243_s10 = inlined_call_operand.vmem [shape: f32[2,1,32], index: 10, kind: input, shape index: {}]   ;;  %s5244_s11 = inlined_call_operand.vmem [shape: f32[2,1,32], index: 11, kind: input, shape index: {}]   ;;  %s5245_s12 = inlined_call_operand.vmem [shape: f32[2,1,32], index: 12, kind: input, shape index: {}]   ;;  %s5246_s13 = inlined_call_operand.vmem [shape: f32[2,32,128], index: 13, kind: input, shape index: {}]   ;;  %s5247_s14 = inlined_call_operand.vmem [shape: f32[2,1,128], index: 14, kind: input, shape index: {}]   ;;  %s5248_s15 = inlined_call_operand.vmem [shape: f32[2,128,32], index: 15, kind: input, shape index: {}]   ;;  %s5249_s16 = inlined_call_operand.vmem [shape: f32[2,1,32], index: 16, kind: input, shape index: {}]   ;;  %s5250_s17 = inlined_call_operand.vmem [shape: f32[32,128], index: 17, kind: input, shape index: {}]   ;;  %s5251_s18 = inlined_call_operand.vmem [shape: f32[1,128], index: 18, kind: input, shape index: {}]   ;;  %s5252_s19 = inlined_call_operand.hbm [shape: f32[2,1,128], index: 19, kind: output, shape index: {}]  }
   0x1   :  { %5284 = sst [smem:[#allocation11_spill]] %s5233_s0 }
   0x2   :  { %5285 = sst [smem:[#allocation12_spill]] %s5234_s1 }
   0x3   :  { %5286 = sst [smem:[#allocation13_spill]] %s5235_s2 }
   0x4   :  { %5287 = sst [smem:[#allocation14_spill]] %s5236_s3 }
   0x5   :  { %5288 = sst [smem:[#allocation15_spill]] %s5237_s4 }
   0x6   :  { %5289 = sst [smem:[#allocation16_spill]] %s5252_s19 }
   0x7   :  { %24 = vsyncpa [#allocation3], 0 }
   0x8   :  { %26 = vsyncpa [#allocation3 + $0x1], 0  ;;  %s4422_s0 = smov 0   ;;  %s4424_s30 = smov 0  }
   0x9   :  { %s4426_s20 = smov 0   ;;  %s4428_s21 = smov 0  }
   0xa LB: > { %5290 = sst [smem:[#allocation5_spill]] %s4289_s0  ;;  %s4443_s1 = sadd.s32 4294967295, %s4301_s21   ;;  %s4301_s21 = sphi %s4428_s21, %s5320_s21   ;;  %s4297_s20 = sphi %s4426_s20, %s5322_s20   ;;  %s4293_s30 = sphi %s4424_s30, %s5324_s30   ;;  %s4289_s0 = sphi %s4422_s0, %s5323_s0  }
   0xb   : > { %5291 = sst [smem:[#allocation6_spill]] %s4297_s20  ;;  %s3515_s22 = sadd.s32 4294967294, %s4301_s21  }
   0xc   : > { %5292 = sst [smem:[#allocation7_spill]] %s4301_s21  ;;  %s4447_s2 = sadd.s32 1, %s4301_s21  }
   0xd   : > { %5293 = sst [smem:[#allocation8_spill]] %s4447_s2  ;;  %s443_s23 = sadd.s32 1, %s4297_s20 }
   0xe   : > { %s440_s24 = ssub.s32 %s4301_s21, %s4447_s2  ;;  %p453_p0 = scmp.ne.s32.totalorder %s4297_s20, %s4293_s30 }
   0xf   : > { %p441_p1 = scmp.eq.s32.totalorder %s440_s24, 0  ;;  %p454_p2 = scmp.eq.s32.totalorder %s4443_s1, 1 }
  0x10   : > { %p459_p3 = scmp.ne.s32.totalorder %s4293_s30, %s4289_s0  ;;  %p460_p4 = scmp.eq.s32.totalorder %s3515_s22, 1 }
  0x11   : > { %s4458_s25 = scalar_select %p441_p1, %s4297_s20, %s443_s23  }
  0x12   : > { %p4460_p5 = por %p454_p2, %p453_p0  ;;  %p4464_p6 = por %p460_p4, %p459_p3 }
  0x13   : > { %5294 = sst [smem:[#allocation9_spill]] %s4458_s25  ;;  %p3518_p7 = scmp.ge.s32.totalorder %s4301_s21, 1 }
  0x14   : > { %s5296_s26 = scalar_select %p4464_p6, 1, 0 }
  0x15   : > { %p540_p8 = scmp.lt.s32.totalorder %s4301_s21, 3 }
  0x16   : > { %5297 = sst [smem:[#allocation10_spill]] %s5296_s26 }
  0x17   : > { %p541_p9 = pnand %p3518_p7, %p540_p8 }
  0x18   : > { %s5298_s29 = sld [smem:[#allocation13_spill]] (!%p541_p9)  ;;  %p595_p10 = scmp.lt.s32.totalorder (!%p541_p9), %s4443_s1, 1  ;;  %v4303_v3 = vmov (!%p541_p9), 0.0|0.0   ;;  %vm634_vm0 = vcmask (!%p541_p9), 523264   ;;  %vm726_vm1 = vcmask (!%p541_p9), 261120   ;;  %vm733_vm2 = vcmask (!%p541_p9), 253952  }
  0x19   : > { %544 = sbr.rel (%p541_p9) target bundleno = 7953 (0x1f11), region = 96  ;;  %3942 = vmatprep.subr.bf16.mxu0 (!%p541_p9), %v4303_v3  ;;  %s5299_s21 = sld [smem:[#allocation11_spill]] (!%p541_p9)  ;;  %vm964_vm3 = vcmask (!%p541_p9), 64512   ;;  %vm971_vm4 = vcmask (!%p541_p9), 1043456   ;;  %vm1023_vm5 = vcmask (!%p541_p9), 138240   ;;  %vm1030_vm6 = vcmask (!%p541_p9), 131072  }
  0x1a   : > { %s5302_s2 = sld [smem:[#allocation14_spill]] (!%p541_p9)  ;;  %s5303_s4 = sld [smem:[#allocation15_spill]] (!%p541_p9)  ;;  %vm1075_vm7 = vcmask (!%p541_p9), 1040384   ;;  %vm1770_vm8 = vcmask (!%p541_p9), 130048   ;;  %vm1774_vm9 = vcmask (!%p541_p9), 195584   ;;  %vm4320_vm10 = vmmov (!%p541_p9), 0  }
  0x1b   : > { %s4304_s23 = smov (!%p541_p9), 96   ;;  %s5276_s24 = smov (!%p541_p9), 120  }
  0x1c   : > { %s5280_s20 = smov (!%p541_p9), 80   ;;  %s5262_s26 = smov (!%p541_p9), 56  }
  0x1d   : > { %s5274_s28 = smov (!%p541_p9), 112   ;;  %s5272_s0 = smov (!%p541_p9), 104  }
  0x1e   : > { %v607_v0 = vld [vmem:[%s5298_s29] sm:$0xff] (!%p541_p9)  ;;  %v608_v1 = vld [vmem:[%s5298_s29 + $0x8] sm:$0xff] (!%p541_p9)  ;;  %v609_v2 = vld [vmem:[%s5298_s29 + $0x10] sm:$0xff] (!%p541_p9)  ;;  %s5264_s22 = smov (!%p541_p9), 8  }
  0x1f   : > { %v3943_v4 = vpack.c.bf16 (!%p541_p9), %v608_v1, %v607_v0  ;;  %v610_v5 = vld [vmem:[%s5298_s29 + $0x18] sm:$0xff] (!%p541_p9)  ;;  %v611_v7 = vld [vmem:[%s5298_s29 + $0x20] sm:$0xff] (!%p541_p9)  ;;  %v612_v8 = vld [vmem:[%s5298_s29 + $0x28] sm:$0xff] (!%p541_p9) }
  0x20   : > { %s596_s27 = scalar_select %p595_p10, %s4443_s1, 1  ;;  %v3946_v6 = vpack.c.bf16 %v610_v5, %v609_v2  ;;  %v3949_v9 = vpack.c.bf16 %v612_v8, %v611_v7  ;;  %v613_v10 = vld [vmem:[%s5298_s29 + $0x30] sm:$0xff]  ;;  %v614_v11 = vld [vmem:[%s5298_s29 + $0x38] sm:$0xff]  ;;  %v615_v14 = vld [vmem:[%s5298_s29 + $0x40] sm:$0xff] }
  0x21   : > { %3944 = vmatpush1.bf16.msra.mxu0 %v3943_v4  ;;  %v3952_v13 = vpack.c.bf16 %v614_v11, %v613_v10  ;;  %v616_v15 = vld [vmem:[%s5298_s29 + $0x48] sm:$0xff]  ;;  %v617_v17 = vld [vmem:[%s5298_s29 + $0x50] sm:$0xff]  ;;  %v618_v18 = vld [vmem:[%s5298_s29 + $0x58] sm:$0xff] }
  0x22   : > { %3945 = vmatprep.subr.bf16.mxu0 %v4303_v3  ;;  %s3986_s25 = smul.u32 48, %s596_s27  ;;  %v3955_v16 = vpack.c.bf16 %v616_v15, %v615_v14  ;;  %v3958_v19 = vpack.c.bf16 %v618_v18, %v617_v17  ;;  %v619_v20 = vld [vmem:[%s5298_s29 + $0x60] sm:$0xff]  ;;  %v620_v21 = vld [vmem:[%s5298_s29 + $0x68] sm:$0xff]  ;;  %v621_v23 = vld [vmem:[%s5298_s29 + $0x70] sm:$0xff] }
  0x23   : > { %v3961_v22 = vpack.c.bf16 %v620_v21, %v619_v20  ;;  %v622_v24 = vld [vmem:[%s5298_s29 + $0x78] sm:$0xff]  ;;  %v623_v26 = vld [vmem:[%s5298_s29 + $0x80] sm:$0xff]  ;;  %v624_v27 = vld [vmem:[%s5298_s29 + $0x88] sm:$0xff] }
  0x24   : > { %s4493_s19 = scalar_lea.vmem %s5299_s21, %s3986_s25  ;;  %v3964_v25 = vpack.c.bf16 %v622_v24, %v621_v23  ;;  %v3967_v28 = vpack.c.bf16 %v624_v27, %v623_v26  ;;  %v625_v29 = vld [vmem:[%s5298_s29 + $0x90] sm:$0xff]  ;;  %v626_v30 = vld [vmem:[%s5298_s29 + $0x98] sm:$0xff]  ;;  %v627_v32 = vld [vmem:[%s5298_s29 + $0xa0] sm:$0xff]  ;;  %s5300_s21 = sld [smem:[#allocation12_spill]] }
  0x25   : > { %3947 = vmatpush1.bf16.msra.mxu0 %v3946_v6  ;;  %v602_v12 = vld [vmem:[%s4493_s19 + $0x8] sm:$0xff]  ;;  %v3970_v31 = vpack.c.bf16 %v626_v30, %v625_v29  ;;  %v629_v35 = vld [vmem:[%s5298_s29 + $0xb0] sm:$0xff]  ;;  %v630_v36 = vld [vmem:[%s5298_s29 + $0xb8] sm:$0xff]  ;;  %s5278_s25 = smov 64  }
  0x26   : > { %3948 = vmatprep.subr.bf16.mxu0 %v4303_v3  ;;  %3520 = vmatprep.mubr.msk.f32.mxu0 %vm634_vm0, %v602_v12  ;;  %v628_v33 = vld [vmem:[%s5298_s29 + $0xa8] sm:$0xff]  ;;  %v3976_v37 = vpack.c.bf16 %v630_v36, %v629_v35  ;;  %v601_v38 = vld [vmem:[%s4493_s19] sm:$0xff]  ;;  %v604_v39 = vld [vmem:[%s4493_s19 + $0x18] sm:$0xff] }
  0x27   : > { %v3973_v34 = vpack.c.bf16 %v628_v33, %v627_v32  ;;  %v603_v40 = vld [vmem:[%s4493_s19 + $0x10] sm:$0xff]  ;;  %v606_v41 = vld [vmem:[%s4493_s19 + $0x28] sm:$0x1]  ;;  %v605_v42 = vld [vmem:[%s4493_s19 + $0x20] sm:$0x1]  ;;  %s4305_s19 = smov 88  }
  0x28   : > { %v3524_v21 = vld [vmem:[%s5303_s4] ss:$0 sm:$0xff] }
  0x29   : > { %3950 = vmatpush1.bf16.msra.mxu0 %v3949_v9 }
  0x2a   : > { %3951 = vmatprep.subr.bf16.mxu0 %v4303_v3  ;;  %s5301_s27 = smov %s5300_s21  ;;  %v631_v43 = vld [vmem:[%s5300_s21] sm:$0xff]  ;;  %s5268_s21 = smov 48  }
  0x2b   : > { %v632_v47 = vld [vmem:[%s5301_s27 + $0x8] sm:$0xff]  ;;  %v633_v52 = vld [vmem:[%s5301_s27 + $0x10] sm:$0x1] }
  0x2d   : > { %3953 = vmatpush1.bf16.msra.mxu0 %v3952_v13 }
  0x2e   : > { %3954 = vmatprep.subr.bf16.mxu0 %v4303_v3 }
  0x31   : > { %3956 = vmatpush1.bf16.msra.mxu0 %v3955_v16 }
  0x32   : > { %3957 = vmatprep.subr.bf16.mxu0 %v4303_v3 }
  0x35   : > { %3959 = vmatpush1.bf16.msra.mxu0 %v3958_v19  ;;  %v3523_v19 = vld [vmem:[%s5302_s2] ss:$0 sm:$0xff]  ;;  %s5270_s2 = smov 72  }
  0x36   : > { %3960 = vmatprep.subr.bf16.mxu0 %v4303_v3 }
  0x39   : > { %3962 = vmatpush1.bf16.msra.mxu0 %v3961_v22 }
  0x3a   : > { %3963 = vmatprep.subr.bf16.mxu0 %v4303_v3 }
  0x3d   : > { %3965 = vmatpush1.bf16.msra.mxu0 %v3964_v25 }
  0x3e   : > { %3966 = vmatprep.subr.bf16.mxu0 %v4303_v3 }
  0x41   : > { %3968 = vmatpush1.bf16.msra.mxu0 %v3967_v28 }
  0x42   : > { %3969 = vmatprep.subr.bf16.mxu0 %v4303_v3 }
  0x45   : > { %3971 = vmatpush1.bf16.msra.mxu0 %v3970_v31 }
  0x46   : > { %3972 = vmatprep.subr.bf16.mxu0 %v4303_v3 }
  0x49   : > { %3974 = vmatpush1.bf16.msra.mxu0 %v3973_v34 }
  0x4a   : > { %3975 = vmatprep.subr.bf16.mxu0 %v4303_v3 }
  0x4d   : > { %3977 = vmatpush1.bf16.msra.mxu0 %v3976_v37 }
  0x50   : > { %709 = vmatmul.mubr.f32.vlgmr.msra.gmra.mrb[0].mxu0 %v601_v38 }
  0x51   : > { %3521 = vmatprep.mubr.msk.f32.mxu0 %vm634_vm0, %v604_v39 }
  0x54   : > { %714 = vmatmul.mubr.f32.gmra.mrb[2].mxu0 %v603_v40 }
  0x55   : > { %3522 = vmatprep.mubr.msk.f32.mxu0 %vm634_vm0, %v606_v41 }
  0x58   : > { %719 = vmatmul.mubr.f32.gmra.mrb[4].mxu0 %v605_v42 }
 0x123   : > { %v710_v44 = vpop.f32.mrb[0].mxu0 }
 0x124   : > { %v711_v45 = vadd.f32 %v710_v44, %v631_v43  ;;  %v712_v46 = vpop.f32.mrb[1].mxu0 }
 0x126   : > { %v727_v48 = vsel %vm726_vm1, %v711_v45, 0.0 }
 0x127   : > { %v715_v49 = vpop.f32.mrb[2].mxu0  ;;  %728 = vadd.xlane.f32.xlu0 %v727_v48 }
 0x128   : > { %v716_v50 = vadd.f32 %v715_v49, %v632_v47  ;;  %v717_v51 = vpop.f32.mrb[3].mxu0 }
 0x129   : > { %v846_v51 = vld [vmem:[%s5240_s7 + $0x8] sm:$0xff] }
 0x12a   : > { %v730_v53 = vsel %vm726_vm1, %v716_v50, 0.0 }
 0x12b   : > { %v720_v54 = vpop.f32.mrb[4].mxu0  ;;  %731 = vadd.xlane.f32.xlu0 %v730_v53  ;;  %v847_v53 = vld [vmem:[%s5240_s7 + $0x10] sm:$0xff] }
 0x12c   : > { %v721_v55 = vadd.f32 %v720_v54, %v633_v52  ;;  %v722_v56 = vpop.f32.mrb[5].mxu0  ;;  %v848_v54 = vld [vmem:[%s5240_s7 + $0x18] sm:$0xff] }
 0x12e   : > { %v734_v57 = vsel %vm733_vm2, %v721_v55, 0.0 }
 0x12f   : > { %735 = vadd.xlane.f32.xlu1 %v734_v57 }
 0x1b4   : > { %v729_v58 = vpop.xlane.xlu0 %728 }
 0x1b5   : > { %v738_v59 = vmul.f32 0.03125, %v729_v58 }
 0x1b7   : > { %v741_v60 = vsub.f32 %v711_v45, %v738_v59 }
 0x1b8   : > { %v732_v61 = vpop.xlane.xlu0 %731 }
 0x1b9   : > { %v739_v62 = vmul.f32 0.03125, %v732_v61  ;;  %v744_v63 = vmul.f32 %v741_v60, %v741_v60 }
 0x1bb   : > { %v742_v0 = vsub.f32 %v716_v50, %v739_v62  ;;  %v747_v1 = vsel %vm726_vm1, %v744_v63, 0.0  ;;  %v845_v50 = vld [vmem:[%s5240_s7] sm:$0xff] }
 0x1bc   : > { %v736_v2 = vpop.xlane.xlu1 %735  ;;  %748 = vadd.xlane.f32.xlu1 %v747_v1  ;;  %v851_v52 = vpack.c.bf16 %v846_v51, %v845_v50 }
 0x1bd   : > { %v740_v3 = vmul.f32 0.03125, %v736_v2  ;;  %v745_v4 = vmul.f32 %v742_v0, %v742_v0 }
 0x1be   : > { %3734 = vmatprep.subr.bf16.mxu0 %v851_v52 }
 0x1bf   : > { %v743_v5 = vsub.f32 %v721_v55, %v740_v3  ;;  %v750_v6 = vsel %vm726_vm1, %v745_v4, 0.0  ;;  %3735 = vmatpush3.bf16.msra.mxu0 %v851_v52  ;;  %v852_v55 = vpack.c.bf16 %v848_v54, %v847_v53  ;;  %v3525_v3 = vld [vmem:[%s5238_s5] ss:$0 sm:$0xff] }
 0x1c0   : > { %751 = vadd.xlane.f32.xlu0 %v750_v6 }
 0x1c1   : > { %v746_v7 = vmul.f32 %v743_v5, %v743_v5  ;;  %3736 = vmatprep.subr.bf16.mxu0 %v852_v55 }
 0x1c3   : > { %v753_v8 = vsel %vm733_vm2, %v746_v7, 0.0  ;;  %3737 = vmatpush3.bf16.msra.mxu0 %v852_v55  ;;  %v3526_v7 = vld [vmem:[%s5239_s6] ss:$0 sm:$0xff] }
 0x1c4   : > { %754 = vadd.xlane.f32.xlu1 %v753_v8 }
 0x249   : > { %v749_v9 = vpop.xlane.xlu1 %748 }
 0x24a   : > { %v756_v10 = vmul.f32 0.03125, %v749_v9 }
 0x24c   : > { %v759_v11 = vadd.f32 1e-05, %v756_v10 }
 0x24d   : > { %v752_v12 = vpop.xlane.xlu0 %751 }
 0x24e   : > { %4089 = vrsqrt.f32 %v759_v11  ;;  %v757_v13 = vmul.f32 0.03125, %v752_v12 }
 0x250   : > { %v760_v14 = vadd.f32 1e-05, %v757_v13 }
 0x251   : > { %v755_v15 = vpop.xlane.xlu1 %754 }
 0x252   : > { %4091 = vrsqrt.f32 %v760_v14  ;;  %v758_v16 = vmul.f32 0.03125, %v755_v15 }
 0x254   : > { %v761_v17 = vadd.f32 1e-05, %v758_v16 }
 0x256   : > { %4093 = vrsqrt.f32 %v761_v17  ;;  %v3527_v17 = vld [vmem:[%s5241_s8] ss:$0 sm:$0xff] }
 0x258   : > { %v4090_v18 = vpop.eup %4089 }
 0x259   : > { %v765_v20 = vmul.f32 %v4090_v18, %v741_v60 }
 0x25b   : > { %v774_v22 = vmul.f32 %v3523_v19, %v765_v20 }
 0x25c   : > { %v4092_v23 = vpop.eup %4091 }
 0x25d   : > { %v4579_v24 = vadd.f32 %v3524_v21, %v774_v22  ;;  %v766_v25 = vmul.f32 %v4092_v23, %v742_v0 }
 0x25f   : > { %v788_v26 = vsel %vm726_vm1, %v4579_v24, 0.0  ;;  %v775_v27 = vmul.f32 %v3523_v19, %v766_v25 }
 0x260   : > { %v4094_v28 = vpop.eup %4093  ;;  %789 = vadd.xlane.f32.xlu0 %v788_v26 }
 0x261   : > { %v4583_v29 = vadd.f32 %v3524_v21, %v775_v27  ;;  %v767_v30 = vmul.f32 %v4094_v28, %v743_v5 }
 0x263   : > { %v791_v31 = vsel %vm726_vm1, %v4583_v29, 0.0  ;;  %v776_v32 = vmul.f32 %v3523_v19, %v767_v30 }
 0x264   : > { %792 = vadd.xlane.f32.xlu1 %v791_v31 }
 0x265   : > { %v4587_v33 = vadd.f32 %v3524_v21, %v776_v32 }
 0x267   : > { %v794_v34 = vsel %vm733_vm2, %v4587_v33, 0.0 }
 0x268   : > { %795 = vadd.xlane.f32.xlu0 %v794_v34 }
 0x2ed   : > { %v790_v35 = vpop.xlane.xlu0 %789 }
 0x2ee   : > { %v797_v36 = vmul.f32 0.03125, %v790_v35 }
 0x2f0   : > { %v800_v37 = vsub.f32 %v4579_v24, %v797_v36 }
 0x2f1   : > { %v793_v38 = vpop.xlane.xlu1 %792 }
 0x2f2   : > { %v798_v39 = vmul.f32 0.03125, %v793_v38  ;;  %v803_v40 = vmul.f32 %v800_v37, %v800_v37 }
 0x2f4   : > { %v801_v41 = vsub.f32 %v4583_v29, %v798_v39  ;;  %v806_v42 = vsel %vm726_vm1, %v803_v40, 0.0 }
 0x2f5   : > { %807 = vadd.xlane.f32.xlu1 %v806_v42  ;;  %v796_v43 = vpop.xlane.xlu0 %795 }
 0x2f6   : > { %v799_v44 = vmul.f32 0.03125, %v796_v43  ;;  %v804_v45 = vmul.f32 %v801_v41, %v801_v41 }
 0x2f8   : > { %v802_v46 = vsub.f32 %v4587_v33, %v799_v44  ;;  %v809_v47 = vsel %vm726_vm1, %v804_v45, 0.0 }
 0x2f9   : > { %810 = vadd.xlane.f32.xlu0 %v809_v47 }
 0x2fa   : > { %v805_v48 = vmul.f32 %v802_v46, %v802_v46 }
 0x2fc   : > { %v812_v49 = vsel %vm733_vm2, %v805_v48, 0.0 }
 0x2fd   : > { %813 = vadd.xlane.f32.xlu1 %v812_v49 }
 0x382   : > { %v808_v56 = vpop.xlane.xlu1 %807 }
 0x383   : > { %v815_v57 = vmul.f32 0.03125, %v808_v56 }
 0x385   : > { %v818_v58 = vadd.f32 1e-05, %v815_v57 }
 0x386   : > { %v811_v59 = vpop.xlane.xlu0 %810 }
 0x387   : > { %4095 = vrsqrt.f32 %v818_v58  ;;  %v816_v60 = vmul.f32 0.03125, %v811_v59 }
 0x389   : > { %v819_v61 = vadd.f32 1e-05, %v816_v60 }
 0x38a   : > { %v814_v62 = vpop.xlane.xlu1 %813 }
 0x38b   : > { %4097 = vrsqrt.f32 %v819_v61  ;;  %v817_v63 = vmul.f32 0.03125, %v814_v62 }
 0x38d   : > { %v820_v0 = vadd.f32 1e-05, %v817_v63 }
 0x38f   : > { %4099 = vrsqrt.f32 %v820_v0 }
 0x391   : > { %v4096_v1 = vpop.eup %4095 }
 0x392   : > { %v824_v2 = vmul.f32 %v4096_v1, %v800_v37 }
 0x394   : > { %v833_v6 = vmul.f32 %v3525_v3, %v824_v2 }
 0x395   : > { %v4098_v4 = vpop.eup %4097 }
 0x396   : > { %v825_v5 = vmul.f32 %v4098_v4, %v801_v41  ;;  %v842_v11 = vadd.f32 %v3526_v7, %v833_v6  ;;  %v4308_v6 = vmov 0  }
 0x398   : > { %v834_v8 = vmul.f32 %v3525_v3, %v825_v5 }
 0x399   : > { %v4100_v9 = vpop.eup %4099 }
 0x39a   : > { %v826_v10 = vmul.f32 %v4100_v9, %v802_v46  ;;  %v843_v12 = vadd.f32 %v3526_v7, %v834_v8 }
 0x39c   : > { %v835_v13 = vmul.f32 %v3525_v3, %v826_v10  ;;  %v849_v14 = vpack.c.bf16 %v843_v12, %v842_v11 }
 0x39e   : > { %v844_v15 = vadd.f32 %v3526_v7, %v835_v13  ;;  %3738 = vmatprep.mubr.msk.bf16.mxu0 %vm726_vm1, %v849_v14  ;;  %v4675_v7 = vsel %vm1075_vm7, 65535, %v4308_v6 }
 0x3a0   : > { %v850_v16 = vpack.c.bf16 %v844_v15, %v844_v15 }
 0x3a2   : > { %3739 = vmatmul.mubr.msk.bf16.vlgmr.msra.gmra.mrb[8].mxu0 %vm726_vm1, %v850_v16 }
 0x475   : > { %v3740_v18 = vpop.f32.mrb[8].mxu0 }
 0x476   : > { %v900_v19 = vpop.f32.mrb[9].mxu0  ;;  %v4630_v27 = vadd.f32 %v3740_v18, %v3527_v17 }
 0x477   : > { %v4620_v20 = vadd.f32 %v3527_v17, %v900_v19  ;;  %v3741_v21 = vpop.f32.mrb[10].mxu0 }
 0x478   : > { %v903_v22 = vpop.f32.mrb[11].mxu0  ;;  %v916_v36 = vmul.f32 0.35355338, %v4630_v27  ;;  %v4667_v1 = vpack.c.bf16 %v4630_v27, %v4630_v27 }
 0x479   : > { %v4622_v23 = vadd.f32 %v3527_v17, %v903_v22  ;;  %920 = vrot.lane.b32.xlu0 %v4620_v20, %s4304_s23  ;;  %v914_v25 = vmul.f32 0.35355338, %v4620_v20 }
 0x47a   : > { %v4643_v38 = vpack.c.bf16 %v916_v36, %v916_v36 }
 0x47b   : > { %922 = vrot.lane.b32.xlu1 %v4622_v23, %s4304_s23  ;;  %v915_v26 = vmul.f32 0.35355338, %v4622_v23  ;;  %v4652_v46 = vpack.i.bf16 %v4622_v23, %v4620_v20  ;;  %v4658_v47 = vpack.c.bf16 %v4622_v23, %v4620_v20 }
 0x47d   : > { %v4632_v28 = vpack.c.bf16 %v915_v26, %v914_v25 }
 0x47f   : > { %924 = vrot.lane.b32.xlu1 %v4630_v27, %s4304_s23  ;;  %3744 = vmatprep.mubr.msk.bf16.mxu1 %vm964_vm3, %v4632_v28 }
 0x4eb   : > { %v921_v30 = vpop.permute.xlu0 %920 }
 0x4ec   : > { %929 = vxpose.xlu1.b32.start [1/3] (short) (narrow) %v921_v30, 8 }
 0x4ed   : > { %v923_v31 = vpop.permute.xlu1 %922 }
 0x4f0   : > { %930 = vxpose.xlu1.b32.cont [2/3] (short) (narrow) %v923_v31, 8 }
 0x4f1   : > { %v925_v32 = vpop.permute.xlu1 %924 }
 0x4f4   : > { %931 = vxpose.xlu1.b32.end [3/3] (short) (narrow) %v925_v32, 8 }
 0x512   : > { %1133 = vrot.lane.b32.xlu1 %v4630_v27, %s4305_s19 }
 0x56c   : > { %v945_v34 = vpop.trf.xlu1 }
 0x56d   : > { %v963_v35 = vpack.c.bf16 %v945_v34, %v945_v34 }
 0x56f   : > { %3978 = vmatprep.subr.msk.bf16.mxu1 %vm971_vm4, %v963_v35  ;;  %v973_v37 = vsel %vm971_vm4, %v963_v35, 0 }
 0x570   : > { %3743 = vmatpush3.bf16.msra.mxu1 %v973_v37 }
 0x573   : > { %3745 = vmatmul.mubr.msk.bf16.vlgmr.msra.gmra.mrb[0].mxu1 %vm964_vm3, %v4643_v38 }
 0x584   : > { %v1134_v4 = vpop.permute.xlu1 %1133 }
 0x646   : > { %v3746_v39 = vpop.f32.mrb[0].mxu1 }
 0x647   : > { %v1009_v40 = vpop.f32.mrb[1].mxu1  ;;  %v1031_v45 = vsel %vm1030_vm6, %v3746_v39, -inf }
 0x648   : > { %v3747_v41 = vpop.f32.mrb[2].mxu1  ;;  %v1024_v42 = vsel %vm1023_vm5, %v1009_v40, -inf }
 0x649   : > { %1025 = vmax.xlane.f32.xlu0 %v1024_v42  ;;  %v1012_v43 = vpop.f32.mrb[3].mxu1 }
 0x64a   : > { %v1027_v44 = vsel %vm1023_vm5, %v1012_v43, -inf }
 0x64d   : > { %1028 = vmax.xlane.f32.xlu0 %v1027_v44 }
 0x651   : > { %1032 = vmax.xlane.f32.xlu0 %v1031_v45 }
 0x667   : > { %4045 = vrot.lane.b32.xlu0 %v4652_v46, %s4305_s19 }
 0x66b   : > { %1064 = vrot.lane.b32.xlu0 %v4658_v47, %s5278_s25 }
 0x6d6   : > { %v1026_v48 = vpop.xlane.xlu0 %1025 }
 0x6d7   : > { %v1034_v51 = vsub.f32 %v1009_v40, %v1026_v48 }
 0x6d9   : > { %v1037_v55 = vmul.f32 1.442695, %v1034_v51 }
 0x6da   : > { %v1029_v49 = vpop.xlane.xlu0 %1028 }
 0x6db   : > { %v1035_v50 = vsub.f32 %v1012_v43, %v1029_v49 }
 0x6dd   : > { %v1039_v52 = vmul.f32 1.442695, %v1035_v50 }
 0x6de   : > { %v1033_v53 = vpop.xlane.xlu0 %1032 }
 0x6df   : > { %4101 = vpow2.f32 %v1039_v52  ;;  %v1036_v54 = vsub.f32 %v3746_v39, %v1033_v53 }
 0x6e1   : > { %v1041_v56 = vmul.f32 1.442695, %v1036_v54 }
 0x6e2   : > { %v4046_v57 = vpop.permute.xlu0 %4045 }
 0x6e3   : > { %4103 = vpow2.f32 %v1041_v56  ;;  %v4047_v2 = vunpack.i.l.bf16 %v4046_v57  ;;  %v4048_v3 = vunpack.i.h.bf16 %v4046_v57 }
 0x6e4   : > { %4105 = vpow2.f32 %v1037_v55 }
 0x6e6   : > { %v1065_v58 = vpop.permute.xlu0 %1064 }
 0x6e7   : > { %3748 = vmatprep.subr.bf16.mxu1 %v1065_v58 }
 0x6e8   : > { %3749 = vmatpush3.bf16.msra.mxu1 %v1065_v58 }
 0x6e9   : > { %v4102_v59 = vpop.eup %4101 }
 0x6ea   : > { %v1046_v60 = vsel %vm1023_vm5, %v4102_v59, 0.0 }
 0x6eb   : > { %1047 = vadd.xlane.f32.xlu1 %v1046_v60 }
 0x6ed   : > { %v4104_v61 = vpop.eup %4103 }
 0x6ee   : > { %v1049_v62 = vsel %vm1030_vm6, %v4104_v61, 0.0  ;;  %v4106_v63 = vpop.eup %4105 }
 0x6ef   : > { %1050 = vadd.xlane.f32.xlu0 %v1049_v62  ;;  %v1043_v0 = vsel %vm1023_vm5, %v4106_v63, 0.0 }
 0x6f3   : > { %1044 = vadd.xlane.f32.xlu0 %v1043_v0 }
 0x6fc   : > { %1066 = vrot.lane.b32.xlu1 %v4667_v1, %s5278_s25  ;;  %s5304_s25 = smov 80  }
 0x709   : > { %1173 = vrot.lane.b32.xlu0 %v4632_v28, %s5276_s24 }
 0x70d   : > { %1175 = vrot.lane.b32.xlu0 %v4643_v38, %s5276_s24  ;;  %s5306_s24 = smov 120  }
 0x72b   : > { %1138 = vxpose.xlu0.b32.start [1/3] (short) (narrow) %v4047_v2, 8 }
 0x72f   : > { %1139 = vxpose.xlu0.b32.cont [2/3] (short) (narrow) %v4048_v3, 8 }
 0x733   : > { %1140 = vxpose.xlu0.b32.end [3/3] (short) (narrow) %v1134_v4, 8 }
 0x778   : > { %v1048_v5 = vpop.xlane.xlu1 %1047 }
 0x77c   : > { %v1067_v8 = vpop.permute.xlu1 %1066  ;;  %v1051_v9 = vpop.xlane.xlu0 %1050 }
 0x77d   : > { %v1079_v10 = vand.u32 %v4675_v7, %v1067_v8  ;;  %4107 = vrcp.f32 %v1051_v9 }
 0x77e   : > { %4109 = vrcp.f32 %v1048_v5 }
 0x77f   : > { %3750 = vmatprep.subr.bf16.mxu1 %v1079_v10 }
 0x780   : > { %3751 = vmatpush3.bf16.msra.mxu1 %v1079_v10  ;;  %v1045_v11 = vpop.xlane.xlu0 %1044 }
 0x781   : > { %4111 = vrcp.f32 %v1045_v11 }
 0x784   : > { %v1174_v21 = vpop.permute.xlu0 %1173 }
 0x787   : > { %v4108_v12 = vpop.eup %4107 }
 0x788   : > { %v4110_v13 = vpop.eup %4109  ;;  %v1057_v15 = vmul.f32 %v4108_v12, %v4104_v61  ;;  %v1176_v22 = vpop.permute.xlu0 %1175 }
 0x789   : > { %v1056_v17 = vmul.f32 %v4110_v13, %v4102_v59 }
 0x78a   : > { %v1059_v19 = vpack.c.bf16 %v1057_v15, %v1057_v15 }
 0x78b   : > { %v4112_v14 = vpop.eup %4111 }
 0x78c   : > { %v1055_v16 = vmul.f32 %v4112_v14, %v4106_v63 }
 0x78e   : > { %v1058_v18 = vpack.c.bf16 %v1056_v17, %v1055_v16 }
 0x790   : > { %3752 = vmatprep.mubr.msk.bf16.mxu1 %vm1023_vm5, %v1058_v18 }
 0x791   : > { %3753 = vmatmul.mubr.msk.bf16.vlgmr.msra.gmra.mrb[4].mxu1 %vm1023_vm5, %v1059_v19 }
 0x792   : > { %3758 = vmatprep.mubr.msk.bf16.mxu1 %vm964_vm3, %v1174_v21 }
 0x7ab   : > { %v1154_v25 = vpop.trf.xlu0 }
 0x7ac   : > { %v1170_v26 = vpack.c.bf16 %v1154_v25, %v1154_v25 }
 0x7ae   : > { %3979 = vmatprep.subr.msk.bf16.mxu1 %vm971_vm4, %v1170_v26  ;;  %v1184_v30 = vsel %vm971_vm4, %v1170_v26, 0 }
 0x7af   : > { %3757 = vmatpush3.bf16.msra.mxu1 %v1184_v30 }
 0x7b2   : > { %3759 = vmatmul.mubr.msk.bf16.vlgmr.msra.gmra.mrb[8].mxu1 %vm964_vm3, %v1176_v22 }
 0x864   : > { %v4684_v31 = vpop.f32.mrb[4].mxu1 }
 0x865   : > { %v4686_v32 = vpop.f32.mrb[5].mxu1 }
 0x866   : > { %v3755_v34 = vpop.f32.mrb[6].mxu1 }
 0x867   : > { %v4688_v35 = vpop.f32.mrb[7].mxu1 }
 0x885   : > { %v3760_v36 = vpop.f32.mrb[8].mxu1 }
 0x886   : > { %v1220_v37 = vpop.f32.mrb[9].mxu1  ;;  %v1240_v43 = vsel %vm1030_vm6, %v3760_v36, -inf }
 0x887   : > { %v3761_v39 = vpop.f32.mrb[10].mxu1  ;;  %v1234_v40 = vsel %vm1023_vm5, %v1220_v37, -inf }
 0x888   : > { %1235 = vmax.xlane.f32.xlu1 %v1234_v40  ;;  %v1223_v41 = vpop.f32.mrb[11].mxu1 }
 0x889   : > { %v1237_v42 = vsel %vm1023_vm5, %v1223_v41, -inf }
 0x88a   : > { %1238 = vmax.xlane.f32.xlu0 %v1237_v42 }
 0x88c   : > { %1241 = vmax.xlane.f32.xlu1 %v1240_v43 }
 0x89d   : > { %4050 = vrot.lane.b32.xlu1 %v4652_v46, %s5280_s20 }
 0x8a0   : > { %1531 = vrot.lane.b32.xlu0 %v4620_v20, %s5270_s2 }
 0x8a1   : > { %1335 = vrot.lane.b32.xlu1 %v4630_v27, %s5280_s20  ;;  %s5308_s20 = smov 104  }
 0x8a4   : > { %1535 = vrot.lane.b32.xlu0 %v4630_v27, %s5270_s2 }
 0x8a5   : > { %1533 = vrot.lane.b32.xlu1 %v4622_v23, %s5270_s2  ;;  %s5282_s2 = smov 24  }
 0x8a8   : > { %1269 = vrot.lane.b32.xlu0 %v4658_v47, %s5262_s26 }
 0x8a9   : > { %1271 = vrot.lane.b32.xlu1 %v4667_v1, %s5262_s26  ;;  %s5266_s26 = smov 40  }
 0x8ac   : > { %1373 = vrot.lane.b32.xlu0 %v4632_v28, %s5274_s28 }
 0x8ad   : > { %1375 = vrot.lane.b32.xlu1 %v4643_v38, %s5274_s28  ;;  %s5311_s28 = smov 48  }
 0x915   : > { %v1236_v20 = vpop.xlane.xlu1 %1235 }
 0x916   : > { %v1243_v44 = vsub.f32 %v1220_v37, %v1236_v20 }
 0x917   : > { %v1239_v27 = vpop.xlane.xlu0 %1238 }
 0x918   : > { %v1246_v45 = vmul.f32 1.442695, %v1243_v44  ;;  %v1244_v46 = vsub.f32 %v1223_v41, %v1239_v27 }
 0x919   : > { %v1242_v23 = vpop.xlane.xlu1 %1241 }
 0x91a   : > { %4113 = vpow2.f32 %v1246_v45  ;;  %v1245_v48 = vsub.f32 %v3760_v36, %v1242_v23  ;;  %v1248_v50 = vmul.f32 1.442695, %v1244_v46 }
 0x91b   : > { %v1532_v49 = vpop.permute.xlu0 %1531 }
 0x91c   : > { %v1250_v51 = vmul.f32 1.442695, %v1245_v48 }
 0x91d   : > { %v4051_v52 = vpop.permute.xlu1 %4050 }
 0x91e   : > { %4115 = vpow2.f32 %v1250_v51  ;;  %v4052_v2 = vunpack.i.l.bf16 %v4051_v52  ;;  %v4053_v3 = vunpack.i.h.bf16 %v4051_v52 }
 0x91f   : > { %v1536_v53 = vpop.permute.xlu0 %1535  ;;  %4117 = vpow2.f32 %v1248_v50 }
 0x921   : > { %v1336_v54 = vpop.permute.xlu1 %1335 }
 0x923   : > { %v1270_v55 = vpop.permute.xlu0 %1269 }
 0x924   : > { %v4114_v56 = vpop.eup %4113  ;;  %3762 = vmatprep.subr.bf16.mxu1 %v1270_v55 }
 0x925   : > { %v1534_v57 = vpop.permute.xlu1 %1533  ;;  %3763 = vmatpush3.bf16.msra.mxu1 %v1270_v55  ;;  %v1252_v58 = vsel %vm1023_vm5, %v4114_v56, 0.0 }
 0x926   : > { %1253 = vadd.xlane.f32.xlu1 %v1252_v58 }
 0x927   : > { %v1374_v4 = vpop.permute.xlu0 %1373 }
 0x928   : > { %v4116_v59 = vpop.eup %4115 }
 0x929   : > { %v1272_v60 = vpop.permute.xlu1 %1271  ;;  %v1258_v61 = vsel %vm1030_vm6, %v4116_v59, 0.0  ;;  %v4118_v62 = vpop.eup %4117 }
 0x92a   : > { %v1281_v63 = vand.u32 %v1272_v60, %v4675_v7  ;;  %1259 = vadd.xlane.f32.xlu0 %v1258_v61  ;;  %v1255_v0 = vsel %vm1023_vm5, %v4118_v62, 0.0 }
 0x92c   : > { %3764 = vmatprep.subr.bf16.mxu1 %v1281_v63 }
 0x92d   : > { %3765 = vmatpush3.bf16.msra.mxu1 %v1281_v63  ;;  %v1376_v5 = vpop.permute.xlu1 %1375 }
 0x92e   : > { %1256 = vadd.xlane.f32.xlu0 %v1255_v0 }
 0x937   : > { %1575 = vrot.lane.b32.xlu1 %v4643_v38, %s5272_s0 }
 0x944   : > { %1573 = vrot.lane.b32.xlu0 %v4632_v28, %s5272_s0  ;;  %s4317_s0 = smov 16  }
 0x960   : > { %1540 = vxpose.xlu1.b32.start [1/3] (short) (narrow) %v1532_v49, 8 }
 0x962   : > { %1340 = vxpose.xlu0.b32.start [1/3] (short) (narrow) %v4052_v2, 8 }
 0x964   : > { %1541 = vxpose.xlu1.b32.cont [2/3] (short) (narrow) %v1534_v57, 8 }
 0x966   : > { %1341 = vxpose.xlu0.b32.cont [2/3] (short) (narrow) %v4053_v3, 8 }
 0x968   : > { %1542 = vxpose.xlu1.b32.end [3/3] (short) (narrow) %v1536_v53, 8 }
 0x96a   : > { %1342 = vxpose.xlu0.b32.end [3/3] (short) (narrow) %v1336_v54, 8 }
 0x9b3   : > { %v1254_v6 = vpop.xlane.xlu1 %1253 }
 0x9b7   : > { %v1260_v8 = vpop.xlane.xlu0 %1259  ;;  %v1576_v17 = vpop.permute.xlu1 %1575 }
 0x9b8   : > { %4119 = vrcp.f32 %v1260_v8 }
 0x9b9   : > { %4121 = vrcp.f32 %v1254_v6 }
 0x9bb   : > { %v1257_v9 = vpop.xlane.xlu0 %1256 }
 0x9bc   : > { %4123 = vrcp.f32 %v1257_v9 }
 0x9bf   : > { %v1574_v38 = vpop.permute.xlu0 %1573 }
 0x9c0   : > { %3786 = vmatprep.mubr.msk.bf16.mxu0 %vm964_vm3, %v1574_v38 }
 0x9c2   : > { %v4120_v28 = vpop.eup %4119 }
 0x9c3   : > { %v4122_v10 = vpop.eup %4121  ;;  %v1266_v12 = vmul.f32 %v4120_v28, %v4116_v59 }
 0x9c4   : > { %v1264_v13 = vmul.f32 %v4122_v10, %v4114_v56 }
 0x9c5   : > { %v1268_v16 = vpack.c.bf16 %v1266_v12, %v1266_v12 }
 0x9c6   : > { %v4124_v11 = vpop.eup %4123 }
 0x9c7   : > { %v1265_v14 = vmul.f32 %v4124_v11, %v4118_v62 }
 0x9c9   : > { %v1267_v15 = vpack.c.bf16 %v1265_v14, %v1264_v13 }
 0x9cb   : > { %3766 = vmatprep.mubr.msk.bf16.mxu1 %vm1023_vm5, %v1267_v15 }
 0x9cc   : > { %3767 = vmatmul.mubr.msk.bf16.vlgmr.msra.gmra.mrb[12].mxu1 %vm1023_vm5, %v1268_v16 }
 0x9cd   : > { %3772 = vmatprep.mubr.msk.bf16.mxu1 %vm964_vm3, %v1374_v4 }
 0x9e0   : > { %v1556_v18 = vpop.trf.xlu1 }
 0x9e1   : > { %v1572_v19 = vpack.c.bf16 %v1556_v18, %v1556_v18 }
 0x9e2   : > { %v1356_v21 = vpop.trf.xlu0 }
 0x9e3   : > { %v1584_v22 = vsel %vm971_vm4, %v1572_v19, 0  ;;  %v1372_v25 = vpack.c.bf16 %v1356_v21, %v1356_v21  ;;  %3981 = vmatprep.subr.msk.bf16.mxu0 %vm971_vm4, %v1572_v19 }
 0x9e4   : > { %3785 = vmatpush3.bf16.msra.mxu0 %v1584_v22 }
 0x9e5   : > { %3980 = vmatprep.subr.msk.bf16.mxu1 %vm971_vm4, %v1372_v25  ;;  %v1384_v26 = vsel %vm971_vm4, %v1372_v25, 0 }
 0x9e6   : > { %3771 = vmatpush3.bf16.msra.mxu1 %v1384_v26 }
 0x9e7   : > { %3787 = vmatmul.mubr.msk.bf16.vlgmr.msra.gmra.mrb[12].mxu0 %vm964_vm3, %v1576_v17 }
 0x9e9   : > { %3773 = vmatmul.mubr.msk.bf16.vlgmr.msra.gmra.mrb[16].mxu1 %vm964_vm3, %v1376_v5 }
 0xa9f   : > { %v4729_v30 = vpop.f32.mrb[12].mxu1 }
 0xaa0   : > { %v1317_v34 = vpop.f32.mrb[13].mxu1 }
 0xaa1   : > { %v3769_v36 = vpop.f32.mrb[14].mxu1 }
 0xaa2   : > { %v1320_v37 = vpop.f32.mrb[15].mxu1 }
 0xaa3   : > { %v4054_v39 = vpack.i.bf16 %v1320_v37, %v1317_v34 }
 0xaba   : > { %v3788_v40 = vpop.f32.mrb[12].mxu0 }
 0xabb   : > { %v1620_v41 = vpop.f32.mrb[13].mxu0  ;;  %v1640_v51 = vsel %vm1030_vm6, %v3788_v40, -inf }
 0xabc   : > { %v3774_v42 = vpop.f32.mrb[16].mxu1  ;;  %v3789_v43 = vpop.f32.mrb[14].mxu0  ;;  %v1634_v50 = vsel %vm1023_vm5, %v1620_v41, -inf }
 0xabd   : > { %v1420_v20 = vpop.f32.mrb[17].mxu1  ;;  %v1623_v44 = vpop.f32.mrb[15].mxu0  ;;  %v1440_v48 = vsel %vm1030_vm6, %v3774_v42, -inf }
 0xabe   : > { %v3775_v27 = vpop.f32.mrb[18].mxu1  ;;  %v1434_v45 = vsel %vm1023_vm5, %v1420_v20, -inf  ;;  %v1637_v49 = vsel %vm1023_vm5, %v1623_v44, -inf }
 0xabf   : > { %1435 = vmax.xlane.f32.xlu0 %v1434_v45  ;;  %v1423_v46 = vpop.f32.mrb[19].mxu1 }
 0xac0   : > { %v1437_v23 = vsel %vm1023_vm5, %v1423_v46, -inf }
 0xac1   : > { %1438 = vmax.xlane.f32.xlu1 %v1437_v23 }
 0xac3   : > { %1441 = vmax.xlane.f32.xlu0 %v1440_v48 }
 0xac5   : > { %1638 = vmax.xlane.f32.xlu1 %v1637_v49 }
 0xac7   : > { %1635 = vmax.xlane.f32.xlu0 %v1634_v50 }
 0xacb   : > { %1641 = vmax.xlane.f32.xlu0 %v1640_v51 }
 0xb4c   : > { %v1436_v52 = vpop.xlane.xlu0 %1435 }
 0xb4d   : > { %v1443_v11 = vsub.f32 %v1420_v20, %v1436_v52 }
 0xb4e   : > { %v1439_v53 = vpop.xlane.xlu1 %1438 }
 0xb4f   : > { %v1444_v60 = vsub.f32 %v1423_v46, %v1439_v53  ;;  %v1446_v13 = vmul.f32 1.442695, %v1443_v11  ;;  %v1778_v53 = vld [vmem:[%s5242_s9] sm:$0xff] }
 0xb50   : > { %v1442_v54 = vpop.xlane.xlu0 %1441 }
 0xb51   : > { %v1448_v0 = vmul.f32 1.442695, %v1444_v60  ;;  %v1445_v10 = vsub.f32 %v3774_v42, %v1442_v54  ;;  %v1779_v54 = vld [vmem:[%s5242_s9 + $0x8] sm:$0xff] }
 0xb52   : > { %v1639_v55 = vpop.xlane.xlu1 %1638 }
 0xb53   : > { %v1644_v56 = vsub.f32 %v1623_v44, %v1639_v55  ;;  %v1450_v12 = vmul.f32 1.442695, %v1445_v10  ;;  %v1784_v55 = vpack.c.bf16 %v1779_v54, %v1778_v53 }
 0xb54   : > { %v1636_v57 = vpop.xlane.xlu0 %1635 }
 0xb55   : > { %v1648_v58 = vmul.f32 1.442695, %v1644_v56  ;;  %v1643_v59 = vsub.f32 %v1620_v41, %v1636_v57  ;;  %3798 = vmatprep.subr.bf16.mxu0 %v1784_v55 }
 0xb56   : > { %3799 = vmatpush3.bf16.msra.mxu0 %v1784_v55 }
 0xb57   : > { %4125 = vpow2.f32 %v1648_v58  ;;  %v1646_v61 = vmul.f32 1.442695, %v1643_v59  ;;  %v1780_v58 = vld [vmem:[%s5242_s9 + $0x10] sm:$0xff]  ;;  %v1781_v59 = vld [vmem:[%s5242_s9 + $0x18] sm:$0xff] }
 0xb58   : > { %v1642_v62 = vpop.xlane.xlu0 %1641 }
 0xb59   : > { %4127 = vpow2.f32 %v1646_v61  ;;  %v1645_v63 = vsub.f32 %v3788_v40, %v1642_v62  ;;  %v1785_v61 = vpack.c.bf16 %v1781_v59, %v1780_v58  ;;  %v1912_v58 = vld [vmem:[%s5246_s13] sm:$0xff]  ;;  %v1913_v59 = vld [vmem:[%s5246_s13 + $0x8] sm:$0xff] }
 0xb5b   : > { %v1650_v2 = vmul.f32 1.442695, %v1645_v63  ;;  %3800 = vmatprep.subr.bf16.mxu0 %v1785_v61 }
 0xb5c   : > { %3801 = vmatpush3.bf16.msra.mxu0 %v1785_v61  ;;  %v1914_v61 = vld [vmem:[%s5246_s13 + $0x10] sm:$0xff] }
 0xb5d   : > { %4129 = vpow2.f32 %v1650_v2 }
 0xb5e   : > { %4131 = vpow2.f32 %v1448_v0 }
 0xb5f   : > { %4133 = vpow2.f32 %v1450_v12 }
 0xb60   : > { %4135 = vpow2.f32 %v1446_v13 }
 0xb61   : > { %v4737_v3 = vpop.eup %4125 }
 0xb62   : > { %v1655_v4 = vsel %vm1023_vm5, %v4737_v3, 0.0 }
 0xb63   : > { %v4128_v5 = vpop.eup %4127  ;;  %1656 = vadd.xlane.f32.xlu1 %v1655_v4 }
 0xb64   : > { %v1652_v6 = vsel %vm1023_vm5, %v4128_v5, 0.0 }
 0xb65   : > { %1653 = vadd.xlane.f32.xlu0 %v1652_v6 }
 0xb67   : > { %v4742_v8 = vpop.eup %4129 }
 0xb68   : > { %v1658_v9 = vsel %vm1030_vm6, %v4742_v8, 0.0  ;;  %v4132_v38 = vpop.eup %4131 }
 0xb69   : > { %1659 = vadd.xlane.f32.xlu0 %v1658_v9  ;;  %v1455_v28 = vsel %vm1023_vm5, %v4132_v38, 0.0  ;;  %v4134_v14 = vpop.eup %4133 }
 0xb6a   : > { %v1458_v15 = vsel %vm1030_vm6, %v4134_v14, 0.0  ;;  %v4136_v16 = vpop.eup %4135 }
 0xb6b   : > { %v1452_v17 = vsel %vm1023_vm5, %v4136_v16, 0.0 }
 0xb6d   : > { %1456 = vadd.xlane.f32.xlu0 %v1455_v28 }
 0xb74   : > { %1469 = vrot.lane.b32.xlu1 %v4658_v47, %s5268_s21 }
 0xb83   : > { %1471 = vrot.lane.b32.xlu0 %v4667_v1, %s5268_s21  ;;  %s5312_s21 = smov 40  }
 0xb87   : > { %4055 = vrot.lane.b32.xlu0 %v4054_v39, %s5264_s22 }
 0xb98   : > { %1459 = vadd.xlane.f32.xlu1 %v1458_v15 }
 0xb9c   : > { %1453 = vadd.xlane.f32.xlu1 %v1452_v17 }
 0xbad   : > { %1669 = vrot.lane.b32.xlu1 %v4658_v47, %s5266_s26 }
 0xbb1   : > { %1671 = vrot.lane.b32.xlu1 %v4667_v1, %s5266_s26  ;;  %s5310_s26 = smov 56  }
 0xbb5   : > { %1738 = vrot.lane.b32.xlu1 %v4729_v30, %s5264_s22  ;;  %s5313_s22 = smov 8  }
 0xbf0   : > { %v1657_v18 = vpop.xlane.xlu1 %1656 }
 0xbf2   : > { %v1654_v19 = vpop.xlane.xlu0 %1653 }
 0xbf3   : > { %4137 = vrcp.f32 %v1654_v19 }
 0xbf4   : > { %v1470_v21 = vpop.permute.xlu1 %1469 }
 0xbf5   : > { %3776 = vmatprep.subr.bf16.mxu1 %v1470_v21 }
 0xbf6   : > { %v1660_v22 = vpop.xlane.xlu0 %1659  ;;  %3777 = vmatpush3.bf16.msra.mxu1 %v1470_v21 }
 0xbfa   : > { %v1457_v25 = vpop.xlane.xlu0 %1456 }
 0xbfd   : > { %v4138_v30 = vpop.eup %4137 }
 0xbfe   : > { %v1472_v26 = vpop.permute.xlu0 %1471  ;;  %v1664_v44 = vmul.f32 %v4138_v30, %v4128_v5 }
 0xbff   : > { %v1481_v34 = vand.u32 %v1472_v26, %v4675_v7 }
 0xc01   : > { %3778 = vmatprep.subr.bf16.mxu1 %v1481_v34 }
 0xc02   : > { %3779 = vmatpush3.bf16.msra.mxu1 %v1481_v34  ;;  %v4056_v6 = vpop.permute.xlu0 %4055 }
 0xc03   : > { %v4058_v28 = vunpack.i.h.bf16 %v4056_v6  ;;  %v4057_v10 = vunpack.i.l.bf16 %v4056_v6 }
 0xc05   : > { %v1767_v17 = vsel %vm964_vm3, %v4686_v32, %v4057_v10  ;;  %v3549_v10 = vld [vmem:[%s5244_s11] ss:$0 sm:$0xff] }
 0xc25   : > { %v1460_v36 = vpop.xlane.xlu1 %1459 }
 0xc26   : > { %4139 = vrcp.f32 %v1460_v36 }
 0xc27   : > { %4141 = vrcp.f32 %v1457_v25 }
 0xc28   : > { %4143 = vrcp.f32 %v1657_v18 }
 0xc29   : > { %v1454_v47 = vpop.xlane.xlu1 %1453 }
 0xc2a   : > { %4145 = vrcp.f32 %v1454_v47  ;;  %v3548_v47 = vld [vmem:[%s5243_s10] ss:$0 sm:$0xff] }
 0xc2b   : > { %4147 = vrcp.f32 %v1660_v22 }
 0xc2d   : > { %v1670_v1 = vpop.permute.xlu1 %1669 }
 0xc2e   : > { %3790 = vmatprep.subr.bf16.mxu1 %v1670_v1 }
 0xc30   : > { %v4140_v37 = vpop.eup %4139 }
 0xc31   : > { %v4142_v39 = vpop.eup %4141  ;;  %v1466_v42 = vmul.f32 %v4140_v37, %v4134_v14  ;;  %v1672_v27 = vpop.permute.xlu1 %1671  ;;  %v1768_v14 = vsel %vm964_vm3, %v4688_v35, %v4058_v28 }
 0xc32   : > { %v4144_v40 = vpop.eup %4143  ;;  %v1465_v20 = vmul.f32 %v4142_v39, %v4132_v38  ;;  %v1681_v50 = vand.u32 %v1672_v27, %v4675_v7 }
 0xc33   : > { %v1665_v46 = vmul.f32 %v4144_v40, %v4737_v3  ;;  %v1468_v23 = vpack.c.bf16 %v1466_v42, %v1466_v42 }
 0xc34   : > { %v4146_v41 = vpop.eup %4145 }
 0xc35   : > { %v1464_v43 = vmul.f32 %v4146_v41, %v4136_v16  ;;  %v4148_v48 = vpop.eup %4147  ;;  %v1667_v49 = vpack.c.bf16 %v1665_v46, %v1664_v44 }
 0xc36   : > { %v1666_v51 = vmul.f32 %v4148_v48, %v4742_v8  ;;  %v1739_v8 = vpop.permute.xlu1 %1738 }
 0xc37   : > { %v1467_v45 = vpack.c.bf16 %v1465_v20, %v1464_v43  ;;  %v1769_v15 = vsel %vm964_vm3, %v4684_v31, %v1739_v8 }
 0xc38   : > { %v1668_v52 = vpack.c.bf16 %v1666_v51, %v1666_v51 }
 0xc39   : > { %3780 = vmatprep.mubr.msk.bf16.mxu1 %vm1023_vm5, %v1467_v45 }
 0xc3a   : > { %3781 = vmatmul.mubr.msk.bf16.vlgmr.msra.gmra.mrb[20].mxu1 %vm1023_vm5, %v1468_v23 }
 0xc3b   : > { %3791 = vmatpush3.bf16.msra.mxu1 %v1670_v1  ;;  %3794 = vmatprep.mubr.msk.bf16.mxu1 %vm1023_vm5, %v1667_v49 }
 0xc3c   : > { %3792 = vmatprep.subr.bf16.mxu1 %v1681_v50 }
 0xc3f   : > { %3793 = vmatpush3.bf16.msra.mxu1 %v1681_v50 }
 0xc42   : > { %3795 = vmatmul.mubr.msk.bf16.vlgmr.msra.gmra.mrb[24].mxu1 %vm1023_vm5, %v1668_v52 }
 0xd0d   : > { %v3782_v56 = vpop.f32.mrb[20].mxu1 }
 0xd0e   : > { %1750 = vrot.lane.b32.xlu1 %v3782_v56, %s4317_s0  ;;  %v1517_v57 = vpop.f32.mrb[21].mxu1 }
 0xd0f   : > { %v3783_v60 = vpop.f32.mrb[22].mxu1 }
 0xd10   : > { %v1520_v62 = vpop.f32.mrb[23].mxu1  ;;  %v1918_v60 = vpack.c.bf16 %v1913_v59, %v1912_v58 }
 0xd11   : > { %v4059_v63 = vpack.i.bf16 %v1520_v62, %v1517_v57  ;;  %v1915_v62 = vld [vmem:[%s5246_s13 + $0x18] sm:$0xff] }
 0xd12   : > { %3806 = vmatprep.subr.bf16.mxu1 %v1918_v60 }
 0xd13   : > { %4060 = vrot.lane.b32.xlu0 %v4059_v63, %s4317_s0  ;;  %v1919_v63 = vpack.c.bf16 %v1915_v62, %v1914_v61  ;;  %3807 = vmatpush3.bf16.msra.mxu1 %v1918_v60 }
 0xd15   : > { %v3796_v0 = vpop.f32.mrb[24].mxu1  ;;  %3808 = vmatprep.subr.bf16.mxu1 %v1919_v63 }
 0xd16   : > { %1762 = vrot.lane.b32.xlu1 %v3796_v0, %s5282_s2  ;;  %v1717_v2 = vpop.f32.mrb[25].mxu1 }
 0xd17   : > { %v3797_v3 = vpop.f32.mrb[26].mxu1  ;;  %3809 = vmatpush3.bf16.msra.mxu1 %v1919_v63 }
 0xd18   : > { %v1720_v4 = vpop.f32.mrb[27].mxu1 }
 0xd19   : > { %v4064_v5 = vpack.i.bf16 %v1720_v4, %v1717_v2 }
 0xd1b   : > { %4065 = vrot.lane.b32.xlu0 %v4064_v5, %s5282_s2  ;;  %s5307_s2 = smov 112  }
 0xd80   : > { %v1751_v9 = vpop.permute.xlu1 %1750 }
 0xd81   : > { %v1773_v18 = vsel %vm1770_vm8, %v1769_v15, %v1751_v9 }
 0xd85   : > { %v4061_v38 = vpop.permute.xlu0 %4060 }
 0xd86   : > { %v4063_v11 = vunpack.i.h.bf16 %v4061_v38  ;;  %v4062_v12 = vunpack.i.l.bf16 %v4061_v38 }
 0xd88   : > { %v1763_v13 = vpop.permute.xlu1 %1762  ;;  %v1772_v22 = vsel %vm1770_vm8, %v1768_v14, %v4063_v11  ;;  %v1771_v25 = vsel %vm1770_vm8, %v1767_v17, %v4062_v12 }
 0xd89   : > { %v1777_v26 = vsel %vm1774_vm9, %v1773_v18, %v1763_v13 }
 0xd8a   : > { %v1783_v31 = vpack.c.bf16 %v1777_v26, %v1777_v26 }
 0xd8d   : > { %v4066_v16 = vpop.permute.xlu0 %4065 }
 0xd8e   : > { %v4068_v19 = vunpack.i.h.bf16 %v4066_v16  ;;  %v4067_v21 = vunpack.i.l.bf16 %v4066_v16  ;;  %v3550_v16 = vld [vmem:[%s5245_s12] ss:$0 sm:$0xff] }
 0xd90   : > { %v1776_v34 = vsel %vm1774_vm9, %v1772_v22, %v4068_v19  ;;  %v1775_v35 = vsel %vm1774_vm9, %v1771_v25, %v4067_v21 }
 0xd91   : > { %v1782_v36 = vpack.c.bf16 %v1776_v34, %v1775_v35  ;;  %v2005_v35 = vld [vmem:[%s5248_s15] sm:$0xff] }
 0xd93   : > { %3802 = vmatprep.mubr.msk.bf16.mxu0 %vm726_vm1, %v1782_v36  ;;  %v2006_v36 = vld [vmem:[%s5248_s15 + $0x8] sm:$0xff] }
 0xd94   : > { %3803 = vmatmul.mubr.msk.bf16.vlgmr.msra.gmra.mrb[16].mxu0 %vm726_vm1, %v1783_v31  ;;  %v2023_v31 = vpack.c.bf16 %v2006_v36, %v2005_v35 }
 0xd96   : > { %3814 = vmatprep.subr.bf16.mxu0 %v2023_v31 }
 0xd97   : > { %3815 = vmatpush3.bf16.msra.mxu0 %v2023_v31 }
 0xe67   : > { %v3804_v32 = vpop.f32.mrb[16].mxu0 }
 0xe68   : > { %v1826_v1 = vpop.f32.mrb[17].mxu0  ;;  %v1842_v30 = vadd.f32 %v3804_v32, %v4587_v33  ;;  %v2007_v32 = vld [vmem:[%s5248_s15 + $0x10] sm:$0xff] }
 0xe69   : > { %v1840_v37 = vadd.f32 %v1826_v1, %v4579_v24  ;;  %v3805_v39 = vpop.f32.mrb[18].mxu0 }
 0xe6a   : > { %v1829_v40 = vpop.f32.mrb[19].mxu0  ;;  %v4806_v43 = vadd.f32 %v3548_v47, %v1842_v30  ;;  %v2009_v30 = vld [vmem:[%s5248_s15 + $0x20] sm:$0xff] }
 0xe6b   : > { %v4803_v41 = vadd.f32 %v3548_v47, %v1840_v37  ;;  %v1841_v42 = vadd.f32 %v1829_v40, %v4583_v29  ;;  %v2010_v37 = vld [vmem:[%s5248_s15 + $0x28] sm:$0xff]  ;;  %v2011_v40 = vld [vmem:[%s5248_s15 + $0x30] sm:$0xff] }
 0xe6c   : > { %v1861_v24 = vsel %vm733_vm2, %v4806_v43, 0.0  ;;  %v2025_v39 = vpack.c.bf16 %v2010_v37, %v2009_v30 }
 0xe6d   : > { %v4808_v20 = vadd.f32 %v3548_v47, %v1841_v42  ;;  %v1855_v44 = vsel %vm726_vm1, %v4803_v41, 0.0  ;;  %v2008_v47 = vld [vmem:[%s5248_s15 + $0x18] sm:$0xff] }
 0xe6e   : > { %1856 = vadd.xlane.f32.xlu0 %v1855_v44  ;;  %v2024_v1 = vpack.c.bf16 %v2008_v47, %v2007_v32  ;;  %v2012_v42 = vld [vmem:[%s5248_s15 + $0x38] sm:$0xff] }
 0xe6f   : > { %v1858_v27 = vsel %vm726_vm1, %v4808_v20, 0.0  ;;  %v2026_v44 = vpack.c.bf16 %v2012_v42, %v2011_v40 }
 0xe70   : > { %1859 = vadd.xlane.f32.xlu1 %v1858_v27  ;;  %3816 = vmatprep.subr.bf16.mxu0 %v2024_v1  ;;  %v2013_v27 = vld [vmem:[%s5248_s15 + $0x40] sm:$0xff] }
 0xe71   : > { %3817 = vmatpush3.bf16.msra.mxu0 %v2024_v1 }
 0xe72   : > { %1862 = vadd.xlane.f32.xlu0 %v1861_v24  ;;  %3818 = vmatprep.subr.bf16.mxu0 %v2025_v39  ;;  %v2014_v24 = vld [vmem:[%s5248_s15 + $0x48] sm:$0xff] }
 0xe75   : > { %3819 = vmatpush3.bf16.msra.mxu0 %v2025_v39 }
 0xe76   : > { %3820 = vmatprep.subr.bf16.mxu0 %v2026_v44 }
 0xe79   : > { %3821 = vmatpush3.bf16.msra.mxu0 %v2026_v44 }
 0xefb   : > { %v1857_v33 = vpop.xlane.xlu0 %1856 }
 0xefc   : > { %v1864_v45 = vmul.f32 0.03125, %v1857_v33  ;;  %v2027_v33 = vpack.c.bf16 %v2014_v24, %v2013_v27 }
 0xefd   : > { %v1860_v46 = vpop.xlane.xlu1 %1859 }
 0xefe   : > { %v1867_v29 = vsub.f32 %v4803_v41, %v1864_v45  ;;  %v1865_v23 = vmul.f32 0.03125, %v1860_v46  ;;  %3822 = vmatprep.subr.bf16.mxu0 %v2027_v33  ;;  %v2015_v45 = vld [vmem:[%s5248_s15 + $0x50] sm:$0xff]  ;;  %v2016_v46 = vld [vmem:[%s5248_s15 + $0x58] sm:$0xff] }
 0xeff   : > { %v1863_v48 = vpop.xlane.xlu0 %1862  ;;  %3823 = vmatpush3.bf16.msra.mxu0 %v2027_v33 }
 0xf00   : > { %v1868_v49 = vsub.f32 %v4808_v20, %v1865_v23  ;;  %v1866_v50 = vmul.f32 0.03125, %v1863_v48  ;;  %v1870_v51 = vmul.f32 %v1867_v29, %v1867_v29  ;;  %v2017_v23 = vld [vmem:[%s5248_s15 + $0x60] sm:$0xff]  ;;  %v2018_v48 = vld [vmem:[%s5248_s15 + $0x68] sm:$0xff] }
 0xf02   : > { %v1869_v52 = vsub.f32 %v4806_v43, %v1866_v50  ;;  %v1873_v53 = vsel %vm726_vm1, %v1870_v51, 0.0  ;;  %v1871_v54 = vmul.f32 %v1868_v49, %v1868_v49  ;;  %v2019_v50 = vld [vmem:[%s5248_s15 + $0x70] sm:$0xff]  ;;  %v2020_v51 = vld [vmem:[%s5248_s15 + $0x78] sm:$0xff] }
 0xf03   : > { %1874 = vadd.xlane.f32.xlu0 %v1873_v53  ;;  %v3551_v53 = vld [vmem:[%s5247_s14] ss:$0 sm:$0xff] }
 0xf04   : > { %v1876_v55 = vsel %vm726_vm1, %v1871_v54, 0.0  ;;  %v1872_v56 = vmul.f32 %v1869_v52, %v1869_v52 }
 0xf05   : > { %1877 = vadd.xlane.f32.xlu1 %v1876_v55 }
 0xf06   : > { %v1879_v57 = vsel %vm733_vm2, %v1872_v56, 0.0 }
 0xf07   : > { %1880 = vadd.xlane.f32.xlu0 %v1879_v57 }
 0xf90   : > { %v1875_v0 = vpop.xlane.xlu0 %1874 }
 0xf91   : > { %v1882_v2 = vmul.f32 0.03125, %v1875_v0 }
 0xf92   : > { %v1878_v3 = vpop.xlane.xlu1 %1877 }
 0xf93   : > { %v1885_v4 = vadd.f32 1e-05, %v1882_v2  ;;  %v1883_v5 = vmul.f32 0.03125, %v1878_v3 }
 0xf94   : > { %v1881_v6 = vpop.xlane.xlu0 %1880 }
 0xf95   : > { %4149 = vrsqrt.f32 %v1885_v4  ;;  %v1886_v8 = vadd.f32 1e-05, %v1883_v5  ;;  %v1884_v9 = vmul.f32 0.03125, %v1881_v6 }
 0xf97   : > { %4151 = vrsqrt.f32 %v1886_v8  ;;  %v1887_v38 = vadd.f32 1e-05, %v1884_v9 }
 0xf99   : > { %4153 = vrsqrt.f32 %v1887_v38 }
 0xf9f   : > { %v4150_v28 = vpop.eup %4149 }
 0xfa0   : > { %v1891_v11 = vmul.f32 %v4150_v28, %v1867_v29  ;;  %v2028_v29 = vpack.c.bf16 %v2016_v46, %v2015_v45 }
 0xfa1   : > { %v4152_v12 = vpop.eup %4151 }
 0xfa2   : > { %v1892_v13 = vmul.f32 %v4152_v12, %v1868_v49  ;;  %v1900_v14 = vmul.f32 %v3549_v10, %v1891_v11  ;;  %3824 = vmatprep.subr.bf16.mxu0 %v2028_v29  ;;  %v2029_v49 = vpack.c.bf16 %v2018_v48, %v2017_v23  ;;  %v3562_v23 = vld [vmem:[%s5240_s7 + $0x20] sm:$0xff]  ;;  %v3563_v48 = vld [vmem:[%s5240_s7 + $0x28] sm:$0xff] }
 0xfa3   : > { %v4154_v15 = vpop.eup %4153  ;;  %3825 = vmatpush3.bf16.msra.mxu0 %v2028_v29 }
 0xfa4   : > { %v1893_v17 = vmul.f32 %v4154_v15, %v1869_v52  ;;  %v1901_v18 = vmul.f32 %v3549_v10, %v1892_v13  ;;  %v1909_v19 = vadd.f32 %v3550_v16, %v1900_v14  ;;  %3826 = vmatprep.subr.bf16.mxu0 %v2029_v49  ;;  %v2030_v52 = vpack.c.bf16 %v2020_v51, %v2019_v50  ;;  %v3564_v50 = vld [vmem:[%s5240_s7 + $0x30] sm:$0xff]  ;;  %v3565_v51 = vld [vmem:[%s5240_s7 + $0x38] sm:$0xff] }
 0xfa6   : > { %v1910_v21 = vadd.f32 %v3550_v16, %v1901_v18  ;;  %v1902_v22 = vmul.f32 %v3549_v10, %v1893_v17  ;;  %v3557_v18 = vld [vmem:[%s5249_s16] ss:$0 sm:$0xff] }
 0xfa7   : > { %3827 = vmatpush3.bf16.msra.mxu0 %v2029_v49  ;;  %v2160_v49 = vpack.c.bf16 %v3563_v48, %v3562_v23 }
 0xfa8   : > { %v1916_v25 = vpack.c.bf16 %v1910_v21, %v1909_v19  ;;  %v1911_v26 = vadd.f32 %v3550_v16, %v1902_v22  ;;  %3828 = vmatprep.subr.bf16.mxu0 %v2030_v52 }
 0xfa9   : > { %3834 = vmatprep.subr.bf16.mxu1 %v2160_v49 }
 0xfaa   : > { %3810 = vmatprep.mubr.msk.bf16.mxu1 %vm726_vm1, %v1916_v25  ;;  %v1917_v34 = vpack.c.bf16 %v1911_v26, %v1911_v26 }
 0xfab   : > { %3829 = vmatpush3.bf16.msra.mxu0 %v2030_v52  ;;  %v2161_v52 = vpack.c.bf16 %v3565_v51, %v3564_v50 }
 0xfac   : > { %3811 = vmatmul.mubr.msk.bf16.vlgmr.msra.gmra.mrb[28].mxu1 %vm726_vm1, %v1917_v34 }
 0xfad   : > { %3835 = vmatpush3.bf16.msra.mxu1 %v2160_v49 }
 0xfae   : > { %3836 = vmatprep.subr.bf16.mxu1 %v2161_v52 }
 0xfb1   : > { %3837 = vmatpush3.bf16.msra.mxu1 %v2161_v52 }
0x107f   : > { %v3812_v54 = vpop.f32.mrb[28].mxu1 }
0x1080   : > { %v1976_v55 = vadd.f32 %v3812_v54, %v3551_v53  ;;  %v1967_v56 = vpop.f32.mrb[29].mxu1 }
0x1081   : > { %v1968_v57 = vadd.f32 %v3551_v53, %v1967_v56  ;;  %v3813_v58 = vpop.f32.mrb[30].mxu1 }
0x1082   : > { %v3556_v59 = vmul.f32 -1.702, %v1976_v55  ;;  %v1970_v60 = vpop.f32.mrb[31].mxu1 }
0x1083   : > { %v3554_v61 = vmul.f32 -1.702, %v1968_v57  ;;  %v1971_v62 = vadd.f32 %v3551_v53, %v1970_v60 }
0x1084   : > { %v1991_v63 = vmul.f32 1.442695, %v3556_v59 }
0x1085   : > { %v1987_v0 = vmul.f32 1.442695, %v3554_v61  ;;  %v3555_v2 = vmul.f32 -1.702, %v1971_v62 }
0x1086   : > { %4155 = vpow2.f32 %v1991_v63  ;;  %v3560_v63 = vld [vmem:[%s5238_s5 + $0x1] ss:$0 sm:$0xff] }
0x1087   : > { %4157 = vpow2.f32 %v1987_v0  ;;  %v1989_v3 = vmul.f32 1.442695, %v3555_v2 }
0x1089   : > { %4159 = vpow2.f32 %v1989_v3 }
0x1090   : > { %v4156_v4 = vpop.eup %4155 }
0x1091   : > { %v4158_v5 = vpop.eup %4157  ;;  %v1995_v6 = vadd.f32 1.0, %v4156_v4 }
0x1092   : > { %v1993_v8 = vadd.f32 1.0, %v4158_v5 }
0x1093   : > { %v4160_v9 = vpop.eup %4159  ;;  %4161 = vrcp.f32 %v1995_v6  ;;  %v3561_v6 = vld [vmem:[%s5239_s6 + $0x1] ss:$0 sm:$0xff] }
0x1094   : > { %4163 = vrcp.f32 %v1993_v8  ;;  %v1994_v38 = vadd.f32 1.0, %v4160_v9 }
0x1096   : > { %4165 = vrcp.f32 %v1994_v38 }
0x109d   : > { %v4162_v28 = vpop.eup %4161 }
0x109e   : > { %v4164_v10 = vpop.eup %4163  ;;  %v2004_v12 = vmul.f32 %v4162_v28, %v1976_v55 }
0x109f   : > { %v2002_v13 = vmul.f32 %v4164_v10, %v1968_v57 }
0x10a0   : > { %v4166_v11 = vpop.eup %4165  ;;  %v2022_v16 = vpack.c.bf16 %v2004_v12, %v2004_v12 }
0x10a1   : > { %v2003_v14 = vmul.f32 %v4166_v11, %v1971_v62 }
0x10a3   : > { %v2021_v15 = vpack.c.bf16 %v2003_v14, %v2002_v13  ;;  %v3567_v14 = vld [vmem:[%s5241_s8 + $0x1] ss:$0 sm:$0xff] }
0x10a5   : > { %3830 = vmatprep.mubr.bf16.mxu0 %v2021_v15 }
0x10a6   : > { %3831 = vmatmul.mubr.bf16.vlgmr.msra.gmra.mrb[20].mxu0 %v2022_v16 }
0x1179   : > { %v3832_v17 = vpop.f32.mrb[20].mxu0 }
0x117a   : > { %v2065_v19 = vpop.f32.mrb[21].mxu0  ;;  %v2081_v21 = vadd.f32 %v3832_v17, %v4806_v43 }
0x117b   : > { %v2079_v22 = vadd.f32 %v2065_v19, %v4803_v41  ;;  %v3833_v25 = vpop.f32.mrb[22].mxu0 }
0x117c   : > { %v2068_v26 = vpop.f32.mrb[23].mxu0  ;;  %v4901_v36 = vadd.f32 %v3557_v18, %v2081_v21 }
0x117d   : > { %v4898_v34 = vadd.f32 %v3557_v18, %v2079_v22  ;;  %v2080_v35 = vadd.f32 %v2068_v26, %v4808_v20 }
0x117e   : > { %v2102_v41 = vsel %vm733_vm2, %v4901_v36, 0.0 }
0x117f   : > { %v4903_v31 = vadd.f32 %v3557_v18, %v2080_v35  ;;  %v2096_v32 = vsel %vm726_vm1, %v4898_v34, 0.0 }
0x1180   : > { %2097 = vadd.xlane.f32.xlu1 %v2096_v32 }
0x1181   : > { %v2099_v47 = vsel %vm726_vm1, %v4903_v31, 0.0 }
0x1182   : > { %2100 = vadd.xlane.f32.xlu0 %v2099_v47 }
0x1184   : > { %2103 = vadd.xlane.f32.xlu1 %v2102_v41 }
0x120d   : > { %v2098_v43 = vpop.xlane.xlu1 %2097 }
0x120e   : > { %v2105_v1 = vmul.f32 0.03125, %v2098_v43 }
0x120f   : > { %v2101_v30 = vpop.xlane.xlu0 %2100 }
0x1210   : > { %v2108_v20 = vsub.f32 %v4898_v34, %v2105_v1  ;;  %v2106_v37 = vmul.f32 0.03125, %v2101_v30 }
0x1211   : > { %v2104_v39 = vpop.xlane.xlu1 %2103 }
0x1212   : > { %v2109_v40 = vsub.f32 %v4903_v31, %v2106_v37  ;;  %v2107_v42 = vmul.f32 0.03125, %v2104_v39  ;;  %v2111_v44 = vmul.f32 %v2108_v20, %v2108_v20 }
0x1214   : > { %v2110_v27 = vsub.f32 %v4901_v36, %v2107_v42  ;;  %v2114_v24 = vsel %vm726_vm1, %v2111_v44, 0.0  ;;  %v2112_v33 = vmul.f32 %v2109_v40, %v2109_v40 }
0x1215   : > { %2115 = vadd.xlane.f32.xlu0 %v2114_v24 }
0x1216   : > { %v2117_v45 = vsel %vm726_vm1, %v2112_v33, 0.0  ;;  %v2113_v46 = vmul.f32 %v2110_v27, %v2110_v27 }
0x1217   : > { %2118 = vadd.xlane.f32.xlu1 %v2117_v45 }
0x1218   : > { %v2120_v29 = vsel %vm733_vm2, %v2113_v46, 0.0 }
0x1219   : > { %2121 = vadd.xlane.f32.xlu0 %v2120_v29 }
0x12a2   : > { %v2116_v53 = vpop.xlane.xlu0 %2115 }
0x12a3   : > { %v2123_v54 = vmul.f32 0.03125, %v2116_v53 }
0x12a4   : > { %v2119_v55 = vpop.xlane.xlu1 %2118 }
0x12a5   : > { %v2126_v56 = vadd.f32 1e-05, %v2123_v54  ;;  %v2124_v57 = vmul.f32 0.03125, %v2119_v55 }
0x12a6   : > { %v2122_v58 = vpop.xlane.xlu0 %2121 }
0x12a7   : > { %4167 = vrsqrt.f32 %v2126_v56  ;;  %v2127_v59 = vadd.f32 1e-05, %v2124_v57  ;;  %v2125_v60 = vmul.f32 0.03125, %v2122_v58 }
0x12a9   : > { %4169 = vrsqrt.f32 %v2127_v59  ;;  %v2128_v61 = vadd.f32 1e-05, %v2125_v60 }
0x12ab   : > { %4171 = vrsqrt.f32 %v2128_v61 }
0x12b1   : > { %v4168_v62 = vpop.eup %4167 }
0x12b2   : > { %v2132_v0 = vmul.f32 %v4168_v62, %v2108_v20 }
0x12b3   : > { %v4170_v2 = vpop.eup %4169 }
0x12b4   : > { %v2133_v3 = vmul.f32 %v4170_v2, %v2109_v40  ;;  %v2141_v4 = vmul.f32 %v3560_v63, %v2132_v0 }
0x12b5   : > { %v4172_v5 = vpop.eup %4171 }
0x12b6   : > { %v2134_v8 = vmul.f32 %v4172_v5, %v2110_v27  ;;  %v2142_v9 = vmul.f32 %v3560_v63, %v2133_v3  ;;  %v2150_v38 = vadd.f32 %v3561_v6, %v2141_v4 }
0x12b8   : > { %v2151_v28 = vadd.f32 %v3561_v6, %v2142_v9  ;;  %v2143_v10 = vmul.f32 %v3560_v63, %v2134_v8 }
0x12ba   : > { %v2158_v11 = vpack.c.bf16 %v2151_v28, %v2150_v38  ;;  %v2152_v12 = vadd.f32 %v3561_v6, %v2143_v10 }
0x12bc   : > { %3838 = vmatprep.mubr.msk.bf16.mxu1 %vm726_vm1, %v2158_v11  ;;  %v2159_v13 = vpack.c.bf16 %v2152_v12, %v2152_v12 }
0x12be   : > { %3839 = vmatmul.mubr.msk.bf16.vlgmr.msra.gmra.mrb[32].mxu1 %vm726_vm1, %v2159_v13 }
0x1391   : > { %v3840_v15 = vpop.f32.mrb[32].mxu1 }
0x1392   : > { %v2210_v16 = vpop.f32.mrb[33].mxu1  ;;  %v2219_v22 = vadd.f32 %v3840_v15, %v3567_v14 }
0x1393   : > { %v2211_v17 = vadd.f32 %v3567_v14, %v2210_v16  ;;  %v3841_v18 = vpop.f32.mrb[34].mxu1 }
0x1394   : > { %v2213_v19 = vpop.f32.mrb[35].mxu1  ;;  %v2226_v37 = vmul.f32 0.35355338, %v2219_v22  ;;  %v4965_v49 = vpack.c.bf16 %v2219_v22, %v2219_v22 }
0x1395   : > { %v2214_v21 = vadd.f32 %v3567_v14, %v2213_v19  ;;  %2230 = vrot.lane.b32.xlu1 %v2211_v17, %s4304_s23  ;;  %v2224_v25 = vmul.f32 0.35355338, %v2211_v17 }
0x1396   : > { %v2272_v40 = vpack.c.bf16 %v2226_v37, %v2226_v37 }
0x1397   : > { %2232 = vrot.lane.b32.xlu0 %v2214_v21, %s4304_s23  ;;  %v2225_v26 = vmul.f32 0.35355338, %v2214_v21  ;;  %v4069_v35 = vpack.i.bf16 %v2214_v21, %v2211_v17  ;;  %v4948_v1 = vpack.c.bf16 %v2214_v21, %v2211_v17 }
0x1399   : > { %2234 = vrot.lane.b32.xlu1 %v2219_v22, %s4304_s23  ;;  %v2271_v32 = vpack.c.bf16 %v2225_v26, %v2224_v25  ;;  %s5305_s23 = smov 64  }
0x139b   : > { %4070 = vrot.lane.b32.xlu0 %v4069_v35, %s4305_s19  ;;  %3844 = vmatprep.mubr.msk.bf16.mxu1 %vm964_vm3, %v2271_v32 }
0x139f   : > { %2634 = vrot.lane.b32.xlu0 %v2211_v17, %s5304_s25 }
0x1407   : > { %v2231_v47 = vpop.permute.xlu1 %2230 }
0x1408   : > { %2239 = vxpose.xlu1.b32.start [1/3] (short) (narrow) %v2231_v47, 8 }
0x1409   : > { %v2233_v41 = vpop.permute.xlu0 %2232 }
0x140b   : > { %v2235_v43 = vpop.permute.xlu1 %2234 }
0x140c   : > { %2240 = vxpose.xlu1.b32.cont [2/3] (short) (narrow) %v2233_v41, 8 }
0x140d   : > { %v4071_v50 = vpop.permute.xlu0 %4070 }
0x140e   : > { %v4072_v28 = vunpack.i.l.bf16 %v4071_v50  ;;  %v4073_v10 = vunpack.i.h.bf16 %v4071_v50 }
0x1410   : > { %2241 = vxpose.xlu1.b32.end [3/3] (short) (narrow) %v2235_v43, 8 }
0x1411   : > { %v2635_v51 = vpop.permute.xlu0 %2634 }
0x142e   : > { %2436 = vrot.lane.b32.xlu1 %v2219_v22, %s4305_s19  ;;  %s5309_s19 = smov 72  }
0x1432   : > { %2636 = vrot.lane.b32.xlu1 %v2214_v21, %s5304_s25 }
0x1436   : > { %2370 = vrot.lane.b32.xlu1 %v4948_v1, %s5305_s23 }
0x143a   : > { %2476 = vrot.lane.b32.xlu1 %v2271_v32, %s5306_s24 }
0x143e   : > { %2676 = vrot.lane.b32.xlu1 %v2271_v32, %s5307_s2 }
0x1442   : > { %2876 = vrot.lane.b32.xlu1 %v2271_v32, %s5308_s20 }
0x1488   : > { %v2255_v30 = vpop.trf.xlu1 }
0x1489   : > { %v2273_v20 = vpack.c.bf16 %v2255_v30, %v2255_v30 }
0x148b   : > { %v2281_v39 = vsel %vm971_vm4, %v2273_v20, 0  ;;  %3982 = vmatprep.subr.msk.bf16.mxu1 %vm971_vm4, %v2273_v20 }
0x148c   : > { %3843 = vmatpush3.bf16.msra.mxu1 %v2281_v39 }
0x148f   : > { %3845 = vmatmul.mubr.msk.bf16.vlgmr.msra.gmra.mrb[36].mxu1 %vm964_vm3, %v2272_v40 }
0x14a0   : > { %v2437_v42 = vpop.permute.xlu1 %2436 }
0x14a4   : > { %v2637_v44 = vpop.permute.xlu1 %2636 }
0x14a8   : > { %v2371_v27 = vpop.permute.xlu1 %2370 }
0x14a9   : > { %3848 = vmatprep.subr.bf16.mxu1 %v2371_v27 }
0x14aa   : > { %3849 = vmatpush3.bf16.msra.mxu1 %v2371_v27 }
0x14ac   : > { %v2477_v12 = vpop.permute.xlu1 %2476 }
0x14b0   : > { %v2677_v14 = vpop.permute.xlu1 %2676 }
0x14b4   : > { %v2877_v16 = vpop.permute.xlu1 %2876 }
0x1562   : > { %v3846_v24 = vpop.f32.mrb[36].mxu1 }
0x1563   : > { %v2317_v33 = vpop.f32.mrb[37].mxu1  ;;  %v2337_v45 = vsel %vm1030_vm6, %v3846_v24, -inf }
0x1564   : > { %2338 = vmax.xlane.f32.xlu0 %v2337_v45  ;;  %v3847_v46 = vpop.f32.mrb[38].mxu1  ;;  %v2331_v23 = vsel %vm1023_vm5, %v2317_v33, -inf }
0x1565   : > { %v2320_v29 = vpop.f32.mrb[39].mxu1 }
0x1566   : > { %v2334_v48 = vsel %vm1023_vm5, %v2320_v29, -inf }
0x1568   : > { %2332 = vmax.xlane.f32.xlu0 %v2331_v23 }
0x156c   : > { %2335 = vmax.xlane.f32.xlu0 %v2334_v48 }
0x1582   : > { %2638 = vrot.lane.b32.xlu0 %v2219_v22, %s5304_s25 }
0x1586   : > { %2834 = vrot.lane.b32.xlu0 %v2211_v17, %s5309_s19 }
0x158a   : > { %2836 = vrot.lane.b32.xlu0 %v2214_v21, %s5309_s19 }
0x158e   : > { %2838 = vrot.lane.b32.xlu0 %v2219_v22, %s5309_s19 }
0x1592   : > { %2372 = vrot.lane.b32.xlu0 %v4965_v49, %s5305_s23  ;;  %s593_s23 = sand.u32 1, %s4293_s30  }
0x1593   : > { %s594_s19 = scalar_lea.vmem [#allocation2], %s593_s23 }
0x1596   : > { %2478 = vrot.lane.b32.xlu0 %v2272_v40, %s5306_s24  ;;  %s3448_s24 = scalar_lea.sflag [#allocation3], %s593_s23 }
0x159a   : > { %2678 = vrot.lane.b32.xlu0 %v2272_v40, %s5307_s2  ;;  %s4321_s2 = smov [#allocation2]  }
0x159b   : > { %s4243_s4 = sshll.u32 %s4321_s2, 4  ;;  %s4244_s4 = int_to_ptr.vmem [resolvable:$false] %s4243_s4 }
0x15f1   : > { %v2339_v52 = vpop.xlane.xlu0 %2338 }
0x15f2   : > { %v2342_v53 = vsub.f32 %v3846_v24, %v2339_v52 }
0x15f4   : > { %v2347_v54 = vmul.f32 1.442695, %v2342_v53 }
0x15f5   : > { %v2333_v55 = vpop.xlane.xlu0 %2332 }
0x15f6   : > { %4173 = vpow2.f32 %v2347_v54  ;;  %v2340_v56 = vsub.f32 %v2317_v33, %v2333_v55 }
0x15f8   : > { %v2343_v57 = vmul.f32 1.442695, %v2340_v56 }
0x15f9   : > { %v2336_v58 = vpop.xlane.xlu0 %2335 }
0x15fa   : > { %4175 = vpow2.f32 %v2343_v57  ;;  %v2341_v59 = vsub.f32 %v2320_v29, %v2336_v58 }
0x15fc   : > { %v2345_v60 = vmul.f32 1.442695, %v2341_v59 }
0x15fd   : > { %v2639_v61 = vpop.permute.xlu0 %2638 }
0x15fe   : > { %4177 = vpow2.f32 %v2345_v60 }
0x1600   : > { %v4174_v62 = vpop.eup %4173 }
0x1601   : > { %v2835_v63 = vpop.permute.xlu0 %2834  ;;  %v2355_v0 = vsel %vm1030_vm6, %v4174_v62, 0.0 }
0x1602   : > { %2356 = vadd.xlane.f32.xlu0 %v2355_v0 }
0x1604   : > { %v4176_v2 = vpop.eup %4175 }
0x1605   : > { %v2837_v3 = vpop.permute.xlu0 %2836  ;;  %v2349_v4 = vsel %vm1023_vm5, %v4176_v2, 0.0 }
0x1606   : > { %2350 = vadd.xlane.f32.xlu0 %v2349_v4 }
0x1608   : > { %v4178_v5 = vpop.eup %4177 }
0x1609   : > { %v2839_v6 = vpop.permute.xlu0 %2838  ;;  %v2352_v8 = vsel %vm1023_vm5, %v4178_v5, 0.0 }
0x160a   : > { %2353 = vadd.xlane.f32.xlu1 %v2352_v8 }
0x160d   : > { %v2373_v9 = vpop.permute.xlu0 %2372 }
0x160e   : > { %v2382_v38 = vand.u32 %v2373_v9, %v4675_v7 }
0x1610   : > { %3850 = vmatprep.subr.bf16.mxu1 %v2382_v38 }
0x1611   : > { %3851 = vmatpush3.bf16.msra.mxu1 %v2382_v38  ;;  %v2479_v11 = vpop.permute.xlu0 %2478 }
0x1615   : > { %v2679_v13 = vpop.permute.xlu0 %2678 }
0x161c   : > { %2878 = vrot.lane.b32.xlu0 %v2272_v40, %s5308_s20  ;;  %s3628_s20 = sshll.u32 %s4443_s1, 4 }
0x163a   : > { %2643 = vxpose.xlu0.b32.start [1/3] (short) (narrow) %v2635_v51, 8 }
0x163d   : > { %2441 = vxpose.xlu1.b32.start [1/3] (short) (narrow) %v4072_v28, 8 }
0x163e   : > { %2644 = vxpose.xlu0.b32.cont [2/3] (short) (narrow) %v2637_v44, 8 }
0x1641   : > { %2442 = vxpose.xlu1.b32.cont [2/3] (short) (narrow) %v4073_v10, 8 }
0x1642   : > { %2645 = vxpose.xlu0.b32.end [3/3] (short) (narrow) %v2639_v61, 8 }
0x1645   : > { %2443 = vxpose.xlu1.b32.end [3/3] (short) (narrow) %v2437_v42, 8 }
0x1646   : > { %2843 = vxpose.xlu0.b32.start [1/3] (short) (narrow) %v2835_v63, 8 }
0x164a   : > { %2844 = vxpose.xlu0.b32.cont [2/3] (short) (narrow) %v2837_v3, 8 }
0x164e   : > { %2845 = vxpose.xlu0.b32.end [3/3] (short) (narrow) %v2839_v6, 8 }
0x168f   : > { %v2357_v15 = vpop.xlane.xlu0 %2356 }
0x1690   : > { %4179 = vrcp.f32 %v2357_v15 }
0x1693   : > { %v2351_v17 = vpop.xlane.xlu0 %2350 }
0x1694   : > { %4181 = vrcp.f32 %v2351_v17 }
0x1697   : > { %v2354_v18 = vpop.xlane.xlu1 %2353  ;;  %v2879_v41 = vpop.permute.xlu0 %2878 }
0x1698   : > { %4183 = vrcp.f32 %v2354_v18 }
0x169a   : > { %v4180_v19 = vpop.eup %4179 }
0x169b   : > { %v2363_v25 = vmul.f32 %v4180_v19, %v4174_v62 }
0x169d   : > { %v2365_v47 = vpack.c.bf16 %v2363_v25, %v2363_v25 }
0x169e   : > { %v4182_v21 = vpop.eup %4181 }
0x169f   : > { %v2361_v26 = vmul.f32 %v4182_v21, %v4176_v2 }
0x16a2   : > { %v4184_v22 = vpop.eup %4183 }
0x16a3   : > { %v2362_v35 = vmul.f32 %v4184_v22, %v4178_v5 }
0x16a5   : > { %v2364_v32 = vpack.c.bf16 %v2362_v35, %v2361_v26 }
0x16a7   : > { %3852 = vmatprep.mubr.msk.bf16.mxu1 %vm1023_vm5, %v2364_v32 }
0x16a8   : > { %3853 = vmatmul.mubr.msk.bf16.vlgmr.msra.gmra.mrb[40].mxu1 %vm1023_vm5, %v2365_v47 }
0x16a9   : > { %3858 = vmatprep.mubr.msk.bf16.mxu1 %vm964_vm3, %v2477_v12 }
0x16ba   : > { %v2659_v43 = vpop.trf.xlu0 }
0x16bb   : > { %v2675_v37 = vpack.c.bf16 %v2659_v43, %v2659_v43 }
0x16bd   : > { %v2457_v30 = vpop.trf.xlu1  ;;  %v2687_v40 = vsel %vm971_vm4, %v2675_v37, 0 }
0x16be   : > { %v2473_v20 = vpack.c.bf16 %v2457_v30, %v2457_v30 }
0x16c0   : > { %v2487_v39 = vsel %vm971_vm4, %v2473_v20, 0  ;;  %3983 = vmatprep.subr.msk.bf16.mxu1 %vm971_vm4, %v2473_v20 }
0x16c1   : > { %3857 = vmatpush3.bf16.msra.mxu1 %v2487_v39 }
0x16c2   : > { %3984 = vmatprep.subr.msk.bf16.mxu1 %vm971_vm4, %v2675_v37 }
0x16c4   : > { %3859 = vmatmul.mubr.msk.bf16.vlgmr.msra.gmra.mrb[44].mxu1 %vm964_vm3, %v2479_v11 }
0x16c5   : > { %3872 = vmatprep.mubr.msk.bf16.mxu1 %vm964_vm3, %v2677_v14  ;;  %3871 = vmatpush3.bf16.msra.mxu1 %v2687_v40 }
0x16c6   : > { %v2859_v42 = vpop.trf.xlu0 }
0x16c7   : > { %v2875_v44 = vpack.c.bf16 %v2859_v42, %v2859_v42 }
0x16c9   : > { %3985 = vmatprep.subr.msk.bf16.mxu1 %vm971_vm4, %v2875_v44  ;;  %v2887_v27 = vsel %vm971_vm4, %v2875_v44, 0 }
0x16cc   : > { %3873 = vmatmul.mubr.msk.bf16.vlgmr.msra.gmra.mrb[48].mxu1 %vm964_vm3, %v2679_v13 }
0x16cd   : > { %3886 = vmatprep.mubr.msk.bf16.mxu1 %vm964_vm3, %v2877_v16  ;;  %3885 = vmatpush3.bf16.msra.mxu1 %v2887_v27 }
0x16d4   : > { %3887 = vmatmul.mubr.msk.bf16.vlgmr.msra.gmra.mrb[52].mxu1 %vm964_vm3, %v2879_v41 }
0x177b   : > { %v4990_v24 = vpop.f32.mrb[40].mxu1 }
0x177c   : > { %v4992_v33 = vpop.f32.mrb[41].mxu1 }
0x177d   : > { %v3855_v45 = vpop.f32.mrb[42].mxu1 }
0x177e   : > { %v4994_v46 = vpop.f32.mrb[43].mxu1 }
0x1797   : > { %v3860_v29 = vpop.f32.mrb[44].mxu1 }
0x1798   : > { %v2523_v23 = vpop.f32.mrb[45].mxu1  ;;  %v2543_v53 = vsel %vm1030_vm6, %v3860_v29, -inf }
0x1799   : > { %v3861_v48 = vpop.f32.mrb[46].mxu1  ;;  %v2537_v50 = vsel %vm1023_vm5, %v2523_v23, -inf }
0x179a   : > { %2538 = vmax.xlane.f32.xlu1 %v2537_v50  ;;  %v2526_v51 = vpop.f32.mrb[47].mxu1 }
0x179b   : > { %v2540_v52 = vsel %vm1023_vm5, %v2526_v51, -inf }
0x179c   : > { %2541 = vmax.xlane.f32.xlu0 %v2540_v52 }
0x179e   : > { %2544 = vmax.xlane.f32.xlu1 %v2543_v53 }
0x179f   : > { %v3874_v54 = vpop.f32.mrb[48].mxu1 }
0x17a0   : > { %v2723_v55 = vpop.f32.mrb[49].mxu1  ;;  %v2743_v56 = vsel %vm1030_vm6, %v3874_v54, -inf }
0x17a1   : > { %2744 = vmax.xlane.f32.xlu0 %v2743_v56  ;;  %v3875_v57 = vpop.f32.mrb[50].mxu1  ;;  %v2737_v58 = vsel %vm1023_vm5, %v2723_v55, -inf }
0x17a2   : > { %2738 = vmax.xlane.f32.xlu1 %v2737_v58  ;;  %v2726_v59 = vpop.f32.mrb[51].mxu1 }
0x17a3   : > { %v2740_v60 = vsel %vm1023_vm5, %v2726_v59, -inf }
0x17a6   : > { %2741 = vmax.xlane.f32.xlu1 %v2740_v60 }
0x17a7   : > { %v3888_v61 = vpop.f32.mrb[52].mxu1 }
0x17a8   : > { %v2923_v62 = vpop.f32.mrb[53].mxu1  ;;  %v2943_v4 = vsel %vm1030_vm6, %v3888_v61, -inf }
0x17a9   : > { %v3889_v63 = vpop.f32.mrb[54].mxu1  ;;  %v2937_v0 = vsel %vm1023_vm5, %v2923_v62, -inf }
0x17aa   : > { %2938 = vmax.xlane.f32.xlu1 %v2937_v0  ;;  %v2926_v2 = vpop.f32.mrb[55].mxu1 }
0x17ab   : > { %v2940_v3 = vsel %vm1023_vm5, %v2926_v2, -inf }
0x17ac   : > { %2941 = vmax.xlane.f32.xlu0 %v2940_v3 }
0x17ae   : > { %2944 = vmax.xlane.f32.xlu1 %v2943_v4 }
0x17bf   : > { %2572 = vrot.lane.b32.xlu1 %v4948_v1, %s5310_s26 }
0x17c2   : > { %2574 = vrot.lane.b32.xlu0 %v4965_v49, %s5310_s26  ;;  %s3460_s26 = sshll.u32 %s594_s19, 4  ;;  %s5193_s26 = int_to_ptr.vmem [resolvable:$true] %s3460_s26 }
0x17c3   : > { %2772 = vrot.lane.b32.xlu1 %v4948_v1, %s5311_s28  ;;  %s4239_s1 = scalar_lea.vmem %s5193_s26, 16  ;;  %p4246_p0 = scmp.lt.s32.totalorder %s5193_s26, %s4244_s4 }
0x17c4   : > { %p4240_p11 = scmp.ne.s32.totalorder %s5193_s26, %s4239_s1 }
0x17c6   : > { %p4241_p12 = pnand %p4240_p11, %p4460_p5 }
0x17c7   : > { %2774 = vrot.lane.b32.xlu1 %v4965_v49, %s5311_s28  ;;  %s4245_s28 = scalar_lea.vmem %s4244_s4, 32 }
0x17c8   : > { %p4242_p13 = pneg %p4241_p12  ;;  %p4247_p1 = scmp.lt.s32.totalorder %s4245_s28, %s4239_s1 }
0x17ca   : > { %p4248_p2 = por %p4247_p1, %p4246_p0 }
0x17cc   : > { %p4249_p3 = pnand %p4248_p2, %p4242_p13 }
0x1827   : > { %v2539_v5 = vpop.xlane.xlu1 %2538 }
0x1828   : > { %v2546_v8 = vsub.f32 %v2523_v23, %v2539_v5 }
0x1829   : > { %v2542_v6 = vpop.xlane.xlu0 %2541 }
0x182a   : > { %v2547_v9 = vsub.f32 %v2526_v51, %v2542_v6  ;;  %v2549_v11 = vmul.f32 1.442695, %v2546_v8 }
0x182b   : > { %v2545_v38 = vpop.xlane.xlu1 %2544 }
0x182c   : > { %v2551_v28 = vmul.f32 1.442695, %v2547_v9  ;;  %v2548_v10 = vsub.f32 %v3860_v29, %v2545_v38 }
0x182e   : > { %4185 = vpow2.f32 %v2551_v28  ;;  %v2553_v12 = vmul.f32 1.442695, %v2548_v10  ;;  %v2745_v13 = vpop.xlane.xlu0 %2744 }
0x182f   : > { %v2748_v14 = vsub.f32 %v3874_v54, %v2745_v13  ;;  %v2739_v15 = vpop.xlane.xlu1 %2738 }
0x1830   : > { %4187 = vpow2.f32 %v2553_v12  ;;  %v2746_v16 = vsub.f32 %v2723_v55, %v2739_v15 }
0x1831   : > { %v2753_v17 = vmul.f32 1.442695, %v2748_v14  ;;  %4189 = vpow2.f32 %v2549_v11 }
0x1832   : > { %v2749_v18 = vmul.f32 1.442695, %v2746_v16 }
0x1833   : > { %4191 = vpow2.f32 %v2753_v17  ;;  %v2742_v19 = vpop.xlane.xlu1 %2741 }
0x1834   : > { %v2747_v21 = vsub.f32 %v2726_v59, %v2742_v19  ;;  %4193 = vpow2.f32 %v2749_v18 }
0x1836   : > { %v2751_v22 = vmul.f32 1.442695, %v2747_v21 }
0x1837   : > { %v2939_v25 = vpop.xlane.xlu1 %2938 }
0x1838   : > { %v5013_v26 = vpop.eup %4185  ;;  %4195 = vpow2.f32 %v2751_v22  ;;  %v2946_v41 = vsub.f32 %v2923_v62, %v2939_v25 }
0x1839   : > { %v2942_v35 = vpop.xlane.xlu0 %2941  ;;  %v2558_v32 = vsel %vm1023_vm5, %v5013_v26, 0.0 }
0x183a   : > { %v4188_v47 = vpop.eup %4187  ;;  %v2947_v43 = vsub.f32 %v2926_v2, %v2942_v35  ;;  %2559 = vadd.xlane.f32.xlu1 %v2558_v32  ;;  %v2949_v27 = vmul.f32 1.442695, %v2946_v41 }
0x183b   : > { %v2945_v30 = vpop.xlane.xlu1 %2944  ;;  %v2561_v20 = vsel %vm1030_vm6, %v4188_v47, 0.0  ;;  %v4190_v37 = vpop.eup %4189 }
0x183c   : > { %v2951_v39 = vmul.f32 1.442695, %v2947_v43  ;;  %v2948_v40 = vsub.f32 %v3888_v61, %v2945_v30  ;;  %2562 = vadd.xlane.f32.xlu0 %v2561_v20  ;;  %v2555_v50 = vsel %vm1023_vm5, %v4190_v37, 0.0 }
0x183d   : > { %v5018_v42 = vpop.eup %4191  ;;  %v2575_v44 = vpop.permute.xlu0 %2574 }
0x183e   : > { %4197 = vpow2.f32 %v2951_v39  ;;  %v2953_v45 = vmul.f32 1.442695, %v2948_v40  ;;  %v2761_v29 = vsel %vm1030_vm6, %v5018_v42, 0.0  ;;  %v4194_v23 = vpop.eup %4193  ;;  %v2584_v51 = vand.u32 %v2575_v44, %v4675_v7 }
0x183f   : > { %v2573_v48 = vpop.permute.xlu1 %2572  ;;  %2762 = vadd.xlane.f32.xlu1 %v2761_v29  ;;  %v2755_v53 = vsel %vm1023_vm5, %v4194_v23, 0.0  ;;  %v3586_v29 = vld [vmem:[%s5242_s9 + $0x20] sm:$0xff] }
0x1840   : > { %4199 = vpow2.f32 %v2953_v45  ;;  %3862 = vmatprep.subr.bf16.mxu0 %v2573_v48  ;;  %2556 = vadd.xlane.f32.xlu0 %v2555_v50 }
0x1841   : > { %3863 = vmatpush3.bf16.msra.mxu0 %v2573_v48  ;;  %4201 = vpow2.f32 %v2949_v27 }
0x1842   : > { %v4196_v52 = vpop.eup %4195  ;;  %3864 = vmatprep.subr.bf16.mxu0 %v2584_v51 }
0x1843   : > { %2756 = vadd.xlane.f32.xlu1 %v2755_v53  ;;  %v2758_v54 = vsel %vm1023_vm5, %v4196_v52, 0.0  ;;  %v2773_v55 = vpop.permute.xlu1 %2772  ;;  %v3589_v53 = vld [vmem:[%s5242_s9 + $0x38] sm:$0xff] }
0x1844   : > { %2759 = vadd.xlane.f32.xlu0 %v2758_v54 }
0x1845   : > { %3865 = vmatpush3.bf16.msra.mxu0 %v2584_v51 }
0x1846   : > { %3876 = vmatprep.subr.bf16.mxu0 %v2773_v55 }
0x1847   : > { %v2775_v62 = vpop.permute.xlu1 %2774 }
0x1848   : > { %v5026_v56 = vpop.eup %4197  ;;  %v2784_v19 = vand.u32 %v2775_v62, %v4675_v7 }
0x1849   : > { %v2958_v57 = vsel %vm1023_vm5, %v5026_v56, 0.0 }
0x184a   : > { %v4200_v58 = vpop.eup %4199  ;;  %2959 = vadd.xlane.f32.xlu1 %v2958_v57 }
0x184b   : > { %v2961_v59 = vsel %vm1030_vm6, %v4200_v58, 0.0  ;;  %v4202_v60 = vpop.eup %4201 }
0x184c   : > { %2962 = vadd.xlane.f32.xlu0 %v2961_v59  ;;  %v2955_v61 = vsel %vm1023_vm5, %v4202_v60, 0.0 }
0x1850   : > { %2956 = vadd.xlane.f32.xlu0 %v2955_v61 }
0x185b   : > { %2974 = vrot.lane.b32.xlu1 %v4965_v49, %s5312_s21 }
0x1866   : > { %2972 = vrot.lane.b32.xlu0 %v4948_v1, %s5312_s21  ;;  %s5314_s21 = smov 24  }
0x18c7   : > { %v2560_v63 = vpop.xlane.xlu1 %2559 }
0x18c9   : > { %v2563_v0 = vpop.xlane.xlu0 %2562 }
0x18ca   : > { %4203 = vrcp.f32 %v2563_v0 }
0x18cb   : > { %4205 = vrcp.f32 %v2560_v63 }
0x18cc   : > { %v2763_v2 = vpop.xlane.xlu1 %2762 }
0x18cd   : > { %v2557_v3 = vpop.xlane.xlu0 %2556 }
0x18ce   : > { %4207 = vrcp.f32 %v2557_v3 }
0x18d0   : > { %v2757_v4 = vpop.xlane.xlu1 %2756 }
0x18d1   : > { %4209 = vrcp.f32 %v2757_v4  ;;  %v2760_v5 = vpop.xlane.xlu0 %2759 }
0x18d2   : > { %4211 = vrcp.f32 %v2760_v5 }
0x18d3   : > { %4213 = vrcp.f32 %v2763_v2 }
0x18d4   : > { %v4204_v6 = vpop.eup %4203 }
0x18d5   : > { %v4206_v8 = vpop.eup %4205  ;;  %v2569_v49 = vmul.f32 %v4204_v6, %v4188_v47 }
0x18d6   : > { %v2568_v10 = vmul.f32 %v4206_v8, %v5013_v26 }
0x18d7   : > { %v2960_v38 = vpop.xlane.xlu1 %2959  ;;  %v2571_v14 = vpack.c.bf16 %v2569_v49, %v2569_v49 }
0x18d8   : > { %v4208_v9 = vpop.eup %4207 }
0x18d9   : > { %v2963_v28 = vpop.xlane.xlu0 %2962  ;;  %v2567_v1 = vmul.f32 %v4208_v9, %v4190_v37 }
0x18da   : > { %4215 = vrcp.f32 %v2963_v28 }
0x18db   : > { %v4210_v11 = vpop.eup %4209  ;;  %v2570_v12 = vpack.c.bf16 %v2568_v10, %v2567_v1  ;;  %4217 = vrcp.f32 %v2960_v38  ;;  %v2975_v26 = vpop.permute.xlu1 %2974 }
0x18dc   : > { %v4212_v13 = vpop.eup %4211  ;;  %v2767_v15 = vmul.f32 %v4210_v11, %v4194_v23  ;;  %v2984_v41 = vand.u32 %v2975_v26, %v4675_v7  ;;  %v3587_v23 = vld [vmem:[%s5242_s9 + $0x28] sm:$0xff] }
0x18dd   : > { %v4214_v16 = vpop.eup %4213  ;;  %3866 = vmatprep.mubr.msk.bf16.mxu0 %vm1023_vm5, %v2570_v12  ;;  %v2957_v17 = vpop.xlane.xlu0 %2956  ;;  %v2768_v18 = vmul.f32 %v4212_v13, %v4196_v52  ;;  %v3086_v48 = vpack.c.bf16 %v3587_v23, %v3586_v29  ;;  %v3588_v52 = vld [vmem:[%s5242_s9 + $0x30] sm:$0xff] }
0x18de   : > { %4219 = vrcp.f32 %v2957_v17  ;;  %3867 = vmatmul.mubr.msk.bf16.vlgmr.msra.gmra.mrb[24].mxu0 %vm1023_vm5, %v2571_v14  ;;  %v2769_v22 = vmul.f32 %v4214_v16, %v5018_v42 }
0x18df   : > { %3877 = vmatpush3.bf16.msra.mxu0 %v2773_v55  ;;  %v2770_v21 = vpack.c.bf16 %v2768_v18, %v2767_v15  ;;  %3898 = vmatprep.subr.bf16.mxu1 %v3086_v48  ;;  %v3087_v55 = vpack.c.bf16 %v3589_v53, %v3588_v52  ;;  %v3593_v18 = vld [vmem:[%s5243_s10 + $0x1] ss:$0 sm:$0xff]  ;;  %v3599_v52 = vld [vmem:[%s5246_s13 + $0x28] sm:$0xff] }
0x18e0   : > { %3878 = vmatprep.subr.bf16.mxu0 %v2784_v19  ;;  %v2771_v35 = vpack.c.bf16 %v2769_v22, %v2769_v22  ;;  %3899 = vmatpush3.bf16.msra.mxu1 %v3086_v48 }
0x18e1   : > { %3880 = vmatprep.mubr.msk.bf16.mxu0 %vm1023_vm5, %v2770_v21  ;;  %v2973_v25 = vpop.permute.xlu0 %2972  ;;  %3900 = vmatprep.subr.bf16.mxu1 %v3087_v55 }
0x18e3   : > { %3879 = vmatpush3.bf16.msra.mxu0 %v2784_v19 }
0x18e4   : > { %3890 = vmatprep.subr.bf16.mxu0 %v2973_v25  ;;  %v4216_v32 = vpop.eup %4215  ;;  %3901 = vmatpush3.bf16.msra.mxu1 %v3087_v55  ;;  %v3601_v55 = vld [vmem:[%s5246_s13 + $0x38] sm:$0xff] }
0x18e5   : > { %v4218_v47 = vpop.eup %4217  ;;  %v2969_v30 = vmul.f32 %v4216_v32, %v4200_v58 }
0x18e6   : > { %3881 = vmatmul.mubr.msk.bf16.vlgmr.msra.gmra.mrb[28].mxu0 %vm1023_vm5, %v2771_v35  ;;  %v2968_v37 = vmul.f32 %v4218_v47, %v5026_v56 }
0x18e7   : > { %3891 = vmatpush3.bf16.msra.mxu0 %v2973_v25  ;;  %v2971_v40 = vpack.c.bf16 %v2969_v30, %v2969_v30 }
0x18e8   : > { %v4220_v43 = vpop.eup %4219  ;;  %3892 = vmatprep.subr.bf16.mxu0 %v2984_v41 }
0x18e9   : > { %v2967_v20 = vmul.f32 %v4220_v43, %v4202_v60 }
0x18eb   : > { %3893 = vmatpush3.bf16.msra.mxu0 %v2984_v41  ;;  %v2970_v39 = vpack.c.bf16 %v2968_v37, %v2967_v20 }
0x18ed   : > { %3894 = vmatprep.mubr.msk.bf16.mxu0 %vm1023_vm5, %v2970_v39 }
0x18ee   : > { %3895 = vmatmul.mubr.msk.bf16.vlgmr.msra.gmra.mrb[32].mxu0 %vm1023_vm5, %v2971_v40 }
0x19b1   : > { %v3868_v42 = vpop.f32.mrb[24].mxu0 }
0x19b2   : > { %3041 = vrot.lane.b32.xlu1 %v3868_v42, %s5313_s22  ;;  %v2620_v7 = vpop.f32.mrb[25].mxu0 }
0x19b3   : > { %v3869_v44 = vpop.f32.mrb[26].mxu0 }
0x19b4   : > { %v2623_v27 = vpop.f32.mrb[27].mxu0 }
0x19b5   : > { %v4074_v45 = vpack.i.bf16 %v2623_v27, %v2620_v7 }
0x19b7   : > { %4075 = vrot.lane.b32.xlu0 %v4074_v45, %s5313_s22 }
0x19b9   : > { %v3882_v50 = vpop.f32.mrb[28].mxu0 }
0x19ba   : > { %3053 = vrot.lane.b32.xlu1 %v3882_v50, %s4317_s0  ;;  %v2820_v51 = vpop.f32.mrb[29].mxu0 }
0x19bb   : > { %v3883_v54 = vpop.f32.mrb[30].mxu0 }
0x19bc   : > { %v2823_v56 = vpop.f32.mrb[31].mxu0  ;;  %v3600_v54 = vld [vmem:[%s5246_s13 + $0x30] sm:$0xff] }
0x19bd   : > { %v4079_v57 = vpack.i.bf16 %v2823_v56, %v2820_v51  ;;  %v3598_v51 = vld [vmem:[%s5246_s13 + $0x20] sm:$0xff]  ;;  %v3225_v56 = vpack.c.bf16 %v3601_v55, %v3600_v54 }
0x19be   : > { %v3224_v53 = vpack.c.bf16 %v3599_v52, %v3598_v51 }
0x19bf   : > { %4080 = vrot.lane.b32.xlu0 %v4079_v57, %s4317_s0  ;;  %s5315_s0 = sld [smem:[#allocation16_spill]] }
0x19c0   : > { %3906 = vmatprep.subr.bf16.mxu0 %v3224_v53 }
0x19c1   : > { %v3896_v58 = vpop.f32.mrb[32].mxu0  ;;  %3907 = vmatpush3.bf16.msra.mxu0 %v3224_v53 }
0x19c2   : > { %3065 = vrot.lane.b32.xlu1 %v3896_v58, %s5314_s21  ;;  %v3020_v59 = vpop.f32.mrb[33].mxu0  ;;  %3908 = vmatprep.subr.bf16.mxu0 %v3225_v56 }
0x19c3   : > { %v3897_v60 = vpop.f32.mrb[34].mxu0 }
0x19c4   : > { %v3023_v61 = vpop.f32.mrb[35].mxu0 }
0x19c5   : > { %v4084_v62 = vpack.i.bf16 %v3023_v61, %v3020_v59  ;;  %3909 = vmatpush3.bf16.msra.mxu0 %v3225_v56  ;;  %s5316_s22 = smov %s5315_s0  ;;  %s5191_s25 = scalar_lea.hbm %s5315_s0, %s3628_s20 }
0x19c7   : > { %4085 = vrot.lane.b32.xlu0 %v4084_v62, %s5314_s21 }
0x1a24   : > { %v3042_v63 = vpop.permute.xlu1 %3041 }
0x1a25   : > { %v3072_v49 = vsel %vm964_vm3, %v4990_v24, %v3042_v63 }
0x1a29   : > { %v4076_v0 = vpop.permute.xlu0 %4075 }
0x1a2a   : > { %v4078_v4 = vunpack.i.h.bf16 %v4076_v0  ;;  %v4077_v5 = vunpack.i.l.bf16 %v4076_v0 }
0x1a2c   : > { %v3054_v2 = vpop.permute.xlu1 %3053  ;;  %v3071_v38 = vsel %vm964_vm3, %v4994_v46, %v4078_v4  ;;  %v3070_v1 = vsel %vm964_vm3, %v4992_v33, %v4077_v5  ;;  %v3596_v4 = vld [vmem:[%s5244_s11 + $0x1] ss:$0 sm:$0xff] }
0x1a2d   : > { %v3075_v10 = vsel %vm1770_vm8, %v3072_v49, %v3054_v2 }
0x1a31   : > { %v4081_v3 = vpop.permute.xlu0 %4080 }
0x1a32   : > { %v4083_v6 = vunpack.i.h.bf16 %v4081_v3  ;;  %v4082_v8 = vunpack.i.l.bf16 %v4081_v3 }
0x1a34   : > { %v3066_v9 = vpop.permute.xlu1 %3065  ;;  %v3073_v13 = vsel %vm1770_vm8, %v3070_v1, %v4082_v8  ;;  %v3074_v14 = vsel %vm1770_vm8, %v3071_v38, %v4083_v6  ;;  %v3597_v38 = vld [vmem:[%s5245_s12 + $0x1] ss:$0 sm:$0xff] }
0x1a35   : > { %v3078_v15 = vsel %vm1774_vm9, %v3075_v10, %v3066_v9 }
0x1a36   : > { %v3085_v46 = vpack.c.bf16 %v3078_v15, %v3078_v15 }
0x1a39   : > { %v4086_v28 = vpop.permute.xlu0 %4085 }
0x1a3a   : > { %v4088_v11 = vunpack.i.h.bf16 %v4086_v28  ;;  %v4087_v12 = vunpack.i.l.bf16 %v4086_v28 }
0x1a3c   : > { %v3076_v16 = vsel %vm1774_vm9, %v3073_v13, %v4087_v12  ;;  %v3077_v24 = vsel %vm1774_vm9, %v3074_v14, %v4088_v11 }
0x1a3d   : > { %v3084_v17 = vpack.c.bf16 %v3077_v24, %v3076_v16  ;;  %v3609_v16 = vld [vmem:[%s5248_s15 + $0x80] sm:$0xff]  ;;  %v3610_v24 = vld [vmem:[%s5248_s15 + $0x88] sm:$0xff] }
0x1a3f   : > { %3902 = vmatprep.mubr.msk.bf16.mxu1 %vm726_vm1, %v3084_v17  ;;  %v3331_v17 = vpack.c.bf16 %v3610_v24, %v3609_v16 }
0x1a40   : > { %3903 = vmatmul.mubr.msk.bf16.vlgmr.msra.gmra.mrb[56].mxu1 %vm726_vm1, %v3085_v46  ;;  %v3611_v46 = vld [vmem:[%s5248_s15 + $0x90] sm:$0xff] }
0x1a41   : > { %3914 = vmatprep.subr.bf16.mxu1 %v3331_v17 }
0x1a42   : > { %3915 = vmatpush3.bf16.msra.mxu1 %v3331_v17 }
0x1b13   : > { %v3904_v33 = vpop.f32.mrb[56].mxu1 }
0x1b14   : > { %v3128_v19 = vpop.f32.mrb[57].mxu1  ;;  %v3144_v21 = vadd.f32 %v3904_v33, %v4901_v36  ;;  %v3612_v33 = vld [vmem:[%s5248_s15 + $0x98] sm:$0xff] }
0x1b15   : > { %v3142_v22 = vadd.f32 %v3128_v19, %v4898_v34  ;;  %v3905_v25 = vpop.f32.mrb[58].mxu1  ;;  %v3613_v19 = vld [vmem:[%s5248_s15 + $0xa0] sm:$0xff] }
0x1b16   : > { %v3131_v26 = vpop.f32.mrb[59].mxu1  ;;  %v3155_v47 = vadd.f32 %v3593_v18, %v3144_v21  ;;  %v3614_v21 = vld [vmem:[%s5248_s15 + $0xa8] sm:$0xff]  ;;  %v3615_v25 = vld [vmem:[%s5248_s15 + $0xb0] sm:$0xff] }
0x1b17   : > { %v5084_v35 = vadd.f32 %v3593_v18, %v3142_v22  ;;  %v3143_v32 = vadd.f32 %v3131_v26, %v4903_v31  ;;  %v3333_v22 = vpack.c.bf16 %v3614_v21, %v3613_v19  ;;  %v3616_v26 = vld [vmem:[%s5248_s15 + $0xb8] sm:$0xff] }
0x1b18   : > { %v3166_v20 = vsel %vm733_vm2, %v3155_v47, 0.0 }
0x1b19   : > { %v3154_v41 = vadd.f32 %v3593_v18, %v3143_v32  ;;  %v3160_v43 = vsel %vm726_vm1, %v5084_v35, 0.0  ;;  %v3332_v18 = vpack.c.bf16 %v3612_v33, %v3611_v46  ;;  %v3334_v32 = vpack.c.bf16 %v3616_v26, %v3615_v25  ;;  %v3402_v33 = vld [vmem:[%s5251_s18] sm:$0x1] }
0x1b1a   : > { %3161 = vadd.xlane.f32.xlu0 %v3160_v43 }
0x1b1b   : > { %v3163_v30 = vsel %vm726_vm1, %v3154_v41, 0.0  ;;  %3916 = vmatprep.subr.bf16.mxu1 %v3332_v18 }
0x1b1c   : > { %3164 = vadd.xlane.f32.xlu1 %v3163_v30  ;;  %3917 = vmatpush3.bf16.msra.mxu1 %v3332_v18  ;;  %v3619_v30 = vld [vmem:[%s5248_s15 + $0xd0] sm:$0xff] }
0x1b1d   : > { %3918 = vmatprep.subr.bf16.mxu1 %v3333_v22 }
0x1b1e   : > { %3167 = vadd.xlane.f32.xlu0 %v3166_v20  ;;  %v3620_v20 = vld [vmem:[%s5248_s15 + $0xd8] sm:$0xff] }
0x1b20   : > { %3919 = vmatpush3.bf16.msra.mxu1 %v3333_v22 }
0x1b21   : > { %3920 = vmatprep.subr.bf16.mxu1 %v3334_v32 }
0x1b24   : > { %3921 = vmatpush3.bf16.msra.mxu1 %v3334_v32 }
0x1ba7   : > { %v3162_v36 = vpop.xlane.xlu0 %3161 }
0x1ba8   : > { %v3169_v34 = vmul.f32 0.03125, %v3162_v36  ;;  %v3336_v36 = vpack.c.bf16 %v3620_v20, %v3619_v30 }
0x1ba9   : > { %v3165_v37 = vpop.xlane.xlu1 %3164 }
0x1baa   : > { %v3172_v39 = vsub.f32 %v5084_v35, %v3169_v34  ;;  %v3170_v40 = vmul.f32 0.03125, %v3165_v37  ;;  %v3621_v34 = vld [vmem:[%s5248_s15 + $0xe0] sm:$0xff]  ;;  %v3622_v37 = vld [vmem:[%s5248_s15 + $0xe8] sm:$0xff] }
0x1bab   : > { %v3168_v42 = vpop.xlane.xlu0 %3167 }
0x1bac   : > { %v3173_v31 = vsub.f32 %v3154_v41, %v3170_v40  ;;  %v3171_v7 = vmul.f32 0.03125, %v3168_v42  ;;  %v3175_v44 = vmul.f32 %v3172_v39, %v3172_v39  ;;  %v3618_v41 = vld [vmem:[%s5248_s15 + $0xc8] sm:$0xff]  ;;  %v3623_v40 = vld [vmem:[%s5248_s15 + $0xf0] sm:$0xff]  ;;  %v3624_v42 = vld [vmem:[%s5248_s15 + $0xf8] sm:$0xff] }
0x1bae   : > { %v3174_v27 = vsub.f32 %v3155_v47, %v3171_v7  ;;  %v3178_v45 = vsel %vm726_vm1, %v3175_v44, 0.0  ;;  %v3176_v29 = vmul.f32 %v3173_v31, %v3173_v31  ;;  %v3617_v47 = vld [vmem:[%s5248_s15 + $0xc0] sm:$0xff] }
0x1baf   : > { %3179 = vadd.xlane.f32.xlu0 %v3178_v45  ;;  %v3335_v43 = vpack.c.bf16 %v3618_v41, %v3617_v47  ;;  %v3603_v7 = vld [vmem:[%s5247_s14 + $0x1] ss:$0 sm:$0xff] }
0x1bb0   : > { %v3181_v23 = vsel %vm726_vm1, %v3176_v29, 0.0  ;;  %v3177_v48 = vmul.f32 %v3174_v27, %v3174_v27 }
0x1bb1   : > { %3182 = vadd.xlane.f32.xlu1 %v3181_v23  ;;  %3922 = vmatprep.subr.bf16.mxu1 %v3335_v43 }
0x1bb2   : > { %v3184_v50 = vsel %vm733_vm2, %v3177_v48, 0.0  ;;  %3923 = vmatpush3.bf16.msra.mxu1 %v3335_v43 }
0x1bb3   : > { %3185 = vadd.xlane.f32.xlu0 %v3184_v50  ;;  %3924 = vmatprep.subr.bf16.mxu1 %v3336_v36 }
0x1bb6   : > { %3925 = vmatpush3.bf16.msra.mxu1 %v3336_v36 }
0x1c3c   : > { %v3180_v57 = vpop.xlane.xlu0 %3179 }
0x1c3d   : > { %v3187_v58 = vmul.f32 0.03125, %v3180_v57 }
0x1c3e   : > { %v3183_v59 = vpop.xlane.xlu1 %3182 }
0x1c3f   : > { %v3190_v60 = vadd.f32 1e-05, %v3187_v58  ;;  %v3188_v61 = vmul.f32 0.03125, %v3183_v59 }
0x1c40   : > { %v3186_v62 = vpop.xlane.xlu0 %3185 }
0x1c41   : > { %4221 = vrsqrt.f32 %v3190_v60  ;;  %v3191_v63 = vadd.f32 1e-05, %v3188_v61  ;;  %v3189_v0 = vmul.f32 0.03125, %v3186_v62 }
0x1c43   : > { %4223 = vrsqrt.f32 %v3191_v63  ;;  %v3192_v2 = vadd.f32 1e-05, %v3189_v0 }
0x1c45   : > { %4225 = vrsqrt.f32 %v3192_v2 }
0x1c4b   : > { %v4222_v3 = vpop.eup %4221 }
0x1c4c   : > { %v3196_v5 = vmul.f32 %v4222_v3, %v3172_v39  ;;  %v3337_v39 = vpack.c.bf16 %v3622_v37, %v3621_v34 }
0x1c4d   : > { %v4224_v6 = vpop.eup %4223 }
0x1c4e   : > { %v3197_v8 = vmul.f32 %v4224_v6, %v3173_v31  ;;  %v3205_v9 = vmul.f32 %v3596_v4, %v3196_v5  ;;  %3926 = vmatprep.subr.bf16.mxu1 %v3337_v39  ;;  %v3338_v31 = vpack.c.bf16 %v3624_v42, %v3623_v40 }
0x1c4f   : > { %v4226_v49 = vpop.eup %4225  ;;  %3927 = vmatpush3.bf16.msra.mxu1 %v3337_v39 }
0x1c50   : > { %v3198_v28 = vmul.f32 %v4226_v49, %v3174_v27  ;;  %v3206_v1 = vmul.f32 %v3596_v4, %v3197_v8  ;;  %v3214_v11 = vadd.f32 %v3597_v38, %v3205_v9  ;;  %3928 = vmatprep.subr.bf16.mxu1 %v3338_v31  ;;  %v3395_v9 = vld [vmem:[%s5250_s17] sm:$0xff]  ;;  %v3396_v49 = vld [vmem:[%s5250_s17 + $0x8] sm:$0xff] }
0x1c52   : > { %v3207_v10 = vmul.f32 %v3596_v4, %v3198_v28  ;;  %v3215_v12 = vadd.f32 %v3597_v38, %v3206_v1  ;;  %v4319_v28 = vmov 0.0   ;;  %v3397_v1 = vld [vmem:[%s5250_s17 + $0x10] sm:$0xff] }
0x1c53   : > { %3929 = vmatpush3.bf16.msra.mxu1 %v3338_v31  ;;  %3934 = vmatprep.subr.bf16.mxu0 %v4319_v28 }
0x1c54   : > { %v3222_v13 = vpack.c.bf16 %v3215_v12, %v3214_v11  ;;  %v3216_v14 = vadd.f32 %v3597_v38, %v3207_v10  ;;  %v3400_v38 = vpack.c.bf16 %v3396_v49, %v3395_v9  ;;  %v3398_v10 = vld [vmem:[%s5250_s17 + $0x18] sm:$0xff] }
0x1c55   : > { %v3401_v11 = vpack.c.bf16 %v3398_v10, %v3397_v1 }
0x1c56   : > { %3910 = vmatprep.mubr.msk.bf16.mxu0 %vm726_vm1, %v3222_v13  ;;  %v3223_v15 = vpack.c.bf16 %v3216_v14, %v3216_v14  ;;  %v3626_v14 = vld [vmem:[%s5249_s16 + $0x1] ss:$0 sm:$0xff] }
0x1c58   : > { %3911 = vmatmul.mubr.msk.bf16.vlgmr.msra.gmra.mrb[36].mxu0 %vm726_vm1, %v3223_v15 }
0x1c59   : > { %3935 = vmatpush3.bf16.msra.mxu0 %v3400_v38  ;;  %3938 = vmatprep.mubr.msk.bf16.mxu0 %vm4320_vm10, %v4319_v28 }
0x1c5a   : > { %3936 = vmatprep.subr.bf16.mxu0 %v4319_v28 }
0x1c5d   : > { %3937 = vmatpush3.bf16.msra.mxu0 %v3401_v11 }
0x1d2b   : > { %v3912_v44 = vpop.f32.mrb[36].mxu0 }
0x1d2c   : > { %v3283_v27 = vadd.f32 %v3912_v44, %v3603_v7  ;;  %v3274_v45 = vpop.f32.mrb[37].mxu0 }
0x1d2d   : > { %v3275_v29 = vadd.f32 %v3603_v7, %v3274_v45  ;;  %v3913_v23 = vpop.f32.mrb[38].mxu0 }
0x1d2e   : > { %v3608_v48 = vmul.f32 -1.702, %v3283_v27  ;;  %v3277_v50 = vpop.f32.mrb[39].mxu0 }
0x1d2f   : > { %v3606_v51 = vmul.f32 -1.702, %v3275_v29  ;;  %v3278_v52 = vadd.f32 %v3603_v7, %v3277_v50 }
0x1d30   : > { %v3298_v53 = vmul.f32 1.442695, %v3608_v48 }
0x1d31   : > { %v3294_v54 = vmul.f32 1.442695, %v3606_v51  ;;  %v3607_v55 = vmul.f32 -1.702, %v3278_v52 }
0x1d32   : > { %4227 = vpow2.f32 %v3298_v53 }
0x1d33   : > { %4229 = vpow2.f32 %v3294_v54  ;;  %v3296_v56 = vmul.f32 1.442695, %v3607_v55 }
0x1d35   : > { %4231 = vpow2.f32 %v3296_v56 }
0x1d3c   : > { %v4228_v57 = vpop.eup %4227 }
0x1d3d   : > { %v4230_v58 = vpop.eup %4229  ;;  %v3302_v59 = vadd.f32 1.0, %v4228_v57 }
0x1d3e   : > { %v3300_v60 = vadd.f32 1.0, %v4230_v58 }
0x1d3f   : > { %v4232_v61 = vpop.eup %4231  ;;  %4233 = vrcp.f32 %v3302_v59 }
0x1d40   : > { %4235 = vrcp.f32 %v3300_v60  ;;  %v3301_v62 = vadd.f32 1.0, %v4232_v61 }
0x1d42   : > { %4237 = vrcp.f32 %v3301_v62 }
0x1d49   : > { %v4234_v63 = vpop.eup %4233 }
0x1d4a   : > { %v4236_v0 = vpop.eup %4235  ;;  %v3311_v3 = vmul.f32 %v4234_v63, %v3283_v27 }
0x1d4b   : > { %v3309_v4 = vmul.f32 %v4236_v0, %v3275_v29 }
0x1d4c   : > { %v4238_v2 = vpop.eup %4237  ;;  %v3330_v8 = vpack.c.bf16 %v3311_v3, %v3311_v3 }
0x1d4d   : > { %v3310_v5 = vmul.f32 %v4238_v2, %v3278_v52 }
0x1d4f   : > { %v3329_v6 = vpack.c.bf16 %v3310_v5, %v3309_v4 }
0x1d51   : > { %3930 = vmatprep.mubr.bf16.mxu1 %v3329_v6 }
0x1d52   : > { %3931 = vmatmul.mubr.bf16.vlgmr.msra.gmra.mrb[60].mxu1 %v3330_v8 }
0x1e25   : > { %v3932_v12 = vpop.f32.mrb[60].mxu1 }
0x1e26   : > { %v3373_v13 = vpop.f32.mrb[61].mxu1 }
0x1e27   : > { %v3385_v15 = vadd.f32 %v3373_v13, %v5084_v35  ;;  %v3933_v16 = vpop.f32.mrb[62].mxu1 }
0x1e28   : > { %v3376_v24 = vpop.f32.mrb[63].mxu1 }
0x1e29   : > { %v3394_v17 = vadd.f32 %v3626_v14, %v3385_v15 }
0x1e2b   : > { %v3399_v46 = vpack.c.bf16 %v3394_v17, %v3394_v17 }
0x1e2d   : > { %3939 = vmatmul.mubr.msk.bf16.vlgmr.msra.gmra.mrb[40].mxu0 %vm726_vm1, %v3399_v46 }
0x1f00   : > { %v3440_v18 = vpop.f32.mrb[40].mxu0 }
0x1f01   : > { %v3441_v19 = vadd.f32 %v3440_v18, %v3402_v33  ;;  %v3940_v21 = vpop.f32.mrb[41].mxu0 }
0x1f02   : > { %v3443_v35 = vpop.f32.mrb[42].mxu0 }
0x1f03   : > { %3446 = vst [vmem:[%s594_s19] sm:$0x1] %v3441_v19  ;;  %v3941_v22 = vpop.f32.mrb[43].mxu0 }
0x1f04   : > { %4252 = shalt.err (!%p4249_p3)
}
0x1f05   : > { %s4253_s23 = scalar_lea.hbm %s5191_s25, 16  ;;  %s4257_s21 = scalar_lea.hbm %s5316_s22, 32 }
0x1f06   : > { %p4254_p4 = scmp.ne.s32.totalorder %s5191_s25, %s4253_s23  ;;  %p4258_p9 = scmp.lt.u32.totalorder %s5191_s25, %s5316_s22 }
0x1f07   : > { %p4259_p10 = scmp.lt.u32.totalorder %s4257_s21, %s4253_s23  ;;  %p4261_p12 = scmp.lt.u32.totalorder %s4253_s23, %s5191_s25 }
0x1f08   : > { %p4255_p7 = pnand %p4254_p4, %p4460_p5 }
0x1f09   : > { %p4260_p11 = por %p4259_p10, %p4258_p9 }
0x1f0a   : > { %p4256_p8 = pneg %p4255_p7 }
0x1f0b   : > { %p4262_p13 = por %p4261_p12, %p4260_p11 }
0x1f0d   : > { %p4263_p0 = pnand %p4262_p13, %p4256_p8 }
0x1f0f   : > { %4266 = shalt.err (!%p4263_p0)
}
0x1f10   : > { %3987 = dma.vmem_to_hbm [thread:$0]  (%p4460_p5), %s5193_s26, 16, %s5191_s25, %s3448_s24  }
0x1f11 PF: > { %s5317_s1 = sld [smem:[#allocation7_spill]]  ;;  %s5318_s2 = sld [smem:[#allocation5_spill]] }
0x1f17   : > { %p3993_p1 = scmp.ge.s32.totalorder %s5317_s1, 2  ;;  %s3472_s20 = sand.u32 1, %s5318_s2  }
0x1f18   : > { %s3473_s19 = scalar_lea.sflag [#allocation3], %s3472_s20 }
0x1f19   : > { %p3990_p2 = pnand %p3993_p1, %p4464_p6 }
0x1f1b   : > { %4284 = dma.done.wait (!%p3990_p2), %s3473_s19, 16  }
0x1f1c   : > { %4286 = vsyncadd (!%p3990_p2), %s3473_s19, 4294967280  ;;  %s5320_s21 = sld [smem:[#allocation8_spill]]  ;;  %s5321_s23 = sld [smem:[#allocation6_spill]] }
0x1f1d   : > { %s5322_s20 = sld [smem:[#allocation9_spill]]  ;;  %s5323_s0 = smov %s4293_s30 }
0x1f22   : > { %p29_p3 = scmp.ge.s32.totalorder %s5320_s21, 4   ;;  %s5324_s30 = smov %s5321_s23 }
0x1f24   :  { %31 = sbr.rel (!%p29_p3) target bundleno = 10 (0xa), region = 143 }
0x1f2b   :  { %3477 = vsyncpa [#allocation3], 1 }
0x1f2c   :  { %3479 = vsyncpa [#allocation3 + $0x1], 1 }

</bundles_post_ra>
